<compile_context>
chip_gen: v7x
topology: tpu7x:2x2x1
jax: 0.10.0
libtpu: 0.0.40
codegen_flags: <defaults>
</compile_context>

<pallas_src>
import math

import jax
import jax.numpy as jnp
from jax.experimental import pallas as pl
from jax.experimental.pallas import tpu as pltpu


# ----------------------------------------------------------------------------
# Encoder kernel: per-point MLP (conv1..conv5 + folded BN + ReLU) with a
# running global max carried in VMEM scratch; lane-dense embedding written
# once at the final N-tile.
# ----------------------------------------------------------------------------
def encoder_kernel(
    x_ref,                                     # (1, 3, TN) f32
    w1_ref, b1_ref,                            # (64, 3) f32, (64, 1) f32
    w2_ref, b2_ref,                            # (64, 64) bf16, (64, 1) f32
    w3_ref, b3_ref,                            # (64, 64) bf16, (64, 1) f32
    w4_ref, b4_ref,                            # (128, 64) bf16, (128, 1) f32
    w5_ref, b5_ref,                            # (L, 128) bf16, (L, 1) f32
    emb_ref,                                   # (1, 1, L) f32 -- lane-dense output
    max_scratch,                               # (L, 1) f32 VMEM -- running max
):
    n = pl.program_id(1)
    x = x_ref[0]                               # (3, TN) f32

    # conv1 (Cin=3): three VPU broadcast FMAs instead of a K=3 MXU matmul.
    w1 = w1_ref[...]
    h = b1_ref[...] + w1[:, 0:1] * x[0:1, :]
    h = h + w1[:, 1:2] * x[1:2, :]
    h = h + w1[:, 2:3] * x[2:3, :]
    h = jnp.maximum(h, 0.0)                    # (64, TN) f32

    def layer(h_f32, w_ref, b_ref):
        acc = jnp.dot(w_ref[...], h_f32.astype(jnp.bfloat16),
                      preferred_element_type=jnp.float32)
        return jnp.maximum(acc + b_ref[...], 0.0)

    h = layer(h, w2_ref, b2_ref)               # (64, TN)
    h = layer(h, w3_ref, b3_ref)               # (64, TN)
    h = layer(h, w4_ref, b4_ref)               # (128, TN)
    h = layer(h, w5_ref, b5_ref)               # (L, TN)

    # MaxPool2d((1, num_points)) == global max over points: per-tile max into a
    # VMEM running-max scratch; single lane-dense store at the last N-tile.
    m = jnp.max(h, axis=1, keepdims=True)      # (L, 1)

    @pl.when(n == 0)
    def _():
        max_scratch[...] = m

    @pl.when(n > 0)
    def _():
        max_scratch[...] = jnp.maximum(max_scratch[...], m)

    @pl.when(n == pl.num_programs(1) - 1)
    def _():
        emb_ref[0] = max_scratch[...].T        # (1, L): L on lanes, single store


# ----------------------------------------------------------------------------
# Decoder kernel: batched fc1 -> relu -> fc2 -> relu -> fc3 with fc3 tiled
# along its 3N output dimension and split across a leading "parallel" axis.
# fc1/fc2 are tiny and recomputed once per split (local j == 0) into a
# per-core bf16 VMEM scratch.
# ----------------------------------------------------------------------------
def decoder_kernel(
    emb_ref,                                   # (B, L) f32
    wf1_ref, bf1_ref,                          # (L, L) bf16, (1, L) f32
    wf2_ref, bf2_ref,                          # (L, L) bf16, (1, L) f32
    wf3_ref, bf3_ref,                          # (L, TO) bf16, (1, TO) f32
    out_ref,                                   # (B, TO) f32
    f2_scratch,                                # (B, L) bf16 VMEM
):
    @pl.when(pl.program_id(1) == 0)
    def _():
        g = emb_ref[...].astype(jnp.bfloat16)
        f = jnp.dot(g, wf1_ref[...], preferred_element_type=jnp.float32) + bf1_ref[...]
        f = jnp.maximum(f, 0.0).astype(jnp.bfloat16)
        f = jnp.dot(f, wf2_ref[...], preferred_element_type=jnp.float32) + bf2_ref[...]
        f2_scratch[...] = jnp.maximum(f, 0.0).astype(jnp.bfloat16)

    out_ref[...] = (jnp.dot(f2_scratch[...], wf3_ref[...],
                            preferred_element_type=jnp.float32) + bf3_ref[...])


# ----------------------------------------------------------------------------
# Parameter setup (deterministic, PyTorch-default-style uniform init).
# Encoder conv weights stored transposed as (Cout, Cin); decoder fc weights as
# (Cin, Cout).  BatchNorm bn1..bn5 (inference mode, fresh running stats) is
# folded into the conv weights/biases.
# ----------------------------------------------------------------------------
def _uniform(key, shape, bound):
    return jax.random.uniform(key, shape, jnp.float32, minval=-bound, maxval=bound)


def init_params(key, num_points, latent_size):
    L, N = latent_size, num_points
    enc_dims = [("conv1", 3, 64), ("conv2", 64, 64), ("conv3", 64, 64),
                ("conv4", 64, 128), ("conv5", 128, L)]
    dec_dims = [("fc1", L, L), ("fc2", L, L), ("fc3", L, 3 * N)]
    keys = jax.random.split(key, 2 * (len(enc_dims) + len(dec_dims)))

    eps = 1e-5
    bn_scale = 1.0 / math.sqrt(1.0 + eps)      # gamma=1, beta=0, mean=0, var=1
    # TODO(synk): the PyTorch module runs BatchNorm in training mode (batch
    # statistics); here BN is reproduced in eval/inference mode with default
    # running stats and folded into the conv weights.

    params = {}
    i = 0
    for name, cin, cout in enc_dims:
        bound = 1.0 / math.sqrt(cin)
        w = _uniform(keys[i], (cout, cin), bound) * bn_scale
        b = _uniform(keys[i + 1], (cout, 1), bound) * bn_scale
        wdtype = jnp.float32 if name == "conv1" else jnp.bfloat16
        params[name + "_w"] = w.astype(wdtype)
        params[name + "_b"] = b                                   # f32
        i += 2
    for name, cin, cout in dec_dims:
        bound = 1.0 / math.sqrt(cin)
        params[name + "_w"] = _uniform(keys[i], (cin, cout), bound).astype(jnp.bfloat16)
        params[name + "_b"] = _uniform(keys[i + 1], (1, cout), bound)   # f32
        i += 2
    return params


def _pick_tile(total, preferred):
    """Largest multiple of 128 that divides `total` and is <= preferred; else full.
    # TODO(synk): if `total` has no multiple-of-128 divisor (e.g. N=2500) the
    # whole axis lands in one block; the VMEM budget below keeps typical sizes
    # safe, but very large non-divisible N would need explicit remainder tiles.
    """
    best = None
    t = 128
    while t <= min(total, preferred):
        if total % t == 0:
            best = t
        t += 128
    return best if best is not None else total


def _maybe_buffered(shape, index_map, buffers):
    """BlockSpec with an explicit pipeline buffer count; plain BlockSpec when
    pipeline_mode is unavailable or buffers is None."""
    if buffers is not None and hasattr(pl, "Buffered"):
        try:
            return pl.BlockSpec(shape, index_map, pipeline_mode=pl.Buffered(buffers))
        except TypeError:
            pass
    return pl.BlockSpec(shape, index_map)


def _vmem_limit(estimate_bytes):
    # Re-derived per pallas_call from the chosen tiles, capped at 48 MiB so the
    # same configuration fits v7x's 64 MiB-per-core VMEM (v5e/v6e have 128 MiB).
    return int(min(48 * 1024 * 1024, max(32 * 1024 * 1024, int(estimate_bytes * 1.5))))


# ----------------------------------------------------------------------------
# Wrapper: encoder pallas_call over (B, N-tiles), decoder pallas_call over
# (split, fc3-output tiles).
# ----------------------------------------------------------------------------
def autoencoder_point_forward(point_cloud, params, *, point_tile=None, out_tile=None):
    # point_cloud: (B, 3, N) float32 -- same layout as the PyTorch forward input.
    B, point_dim, N = point_cloud.shape
    assert point_dim == 3
    L = params["conv5_w"].shape[0]
    M3 = 3 * N

    # ---- tile selection (large tiles, budget-capped for v7x VMEM) ----
    if point_tile is not None:
        TN = point_tile
    else:
        # approx. live bytes per point: f32 activations + bf16 MXU copies + input
        per_point = (64 * 3 + 128 + L) * 4 + (64 + 64 + 128 + L) * 2 + 3 * 4 * 2
        tn_cap = max(128, (24 * 1024 * 1024 // per_point) // 128 * 128)
        TN = _pick_tile(N, min(2048, tn_cap))
    if out_tile is not None:
        TO = out_tile
    else:
        # approx. bytes per fc3 output column: 3-buffered weight + 2-buffered out
        per_col = 3 * L * 2 + 2 * B * 4 + 2 * 4
        to_cap = max(128, (20 * 1024 * 1024 // per_col) // 128 * 128)
        TO = _pick_tile(M3, min(2048, to_cap))
    assert N % TN == 0 and M3 % TO == 0

    def _nbytes(arrs):
        return int(sum(a.size * a.dtype.itemsize for a in arrs))

    # ------------------------- encoder -------------------------
    enc_args = [point_cloud.astype(jnp.float32)]
    for name in ("conv1", "conv2", "conv3", "conv4", "conv5"):
        enc_args += [params[name + "_w"], params[name + "_b"]]

    enc_flops = 2 * B * N * (3 * 64 + 64 * 64 + 64 * 64 + 64 * 128 + 128 * L)
    enc_cost = pl.CostEstimate(
        flops=int(enc_flops), transcendentals=0,
        bytes_accessed=_nbytes(enc_args) + B * L * 4)

    enc_est = (2 * _nbytes(enc_args[1:])                              # weights (worst case 2x)
               + (64 * 3 + 128 + L) * TN * 4                          # f32 activations
               + (64 + 64 + 128 + L) * TN * 2                         # bf16 MXU inputs
               + 2 * 3 * TN * 4 + 2 * L * 4 + L * 128 * 4)            # input/out/scratch

    def build_encoder(use_buffered):
        def wspec(shape):
            # grid-invariant weights/biases: single-buffer (no wasted VMEM)
            return _maybe_buffered(shape, lambda b, n: (0, 0),
                                   1 if use_buffered else None)
        in_specs = [pl.BlockSpec((1, point_dim, TN), lambda b, n: (b, 0, n))]
        for name in ("conv1", "conv2", "conv3", "conv4", "conv5"):
            in_specs.append(wspec(params[name + "_w"].shape))
            in_specs.append(wspec(params[name + "_b"].shape))
        return pl.pallas_call(
            encoder_kernel,
            grid=(B, N // TN),
            in_specs=in_specs,
            out_specs=pl.BlockSpec((1, 1, L), lambda b, n: (b, 0, 0)),
            out_shape=jax.ShapeDtypeStruct((B, 1, L), jnp.float32),
            scratch_shapes=[pltpu.VMEM((L, 1), jnp.float32)],
            compiler_params=pltpu.CompilerParams(
                dimension_semantics=("parallel", "arbitrary"),
                vmem_limit_bytes=_vmem_limit(enc_est)),
            cost_estimate=enc_cost)

    try:
        emb3 = build_encoder(True)(*enc_args)
    except Exception:   # pipeline_mode unsupported on this Pallas build -> plain specs
        emb3 = build_encoder(False)(*enc_args)
    emb = emb3.reshape(B, L)                   # end_points['embedding']

    # ------------------------- decoder -------------------------
    dec_args = [emb,
                params["fc1_w"], params["fc1_b"],
                params["fc2_w"], params["fc2_b"],
                params["fc3_w"], params["fc3_b"]]

    n_j_total = M3 // TO
    # Split the fc3 output range across a leading "parallel" axis so both
    # TensorCores stream weights on v7x (sequential & still correct on 1-core chips).
    n_splits = 2 if (n_j_total % 2 == 0 and n_j_total >= 2) else 1
    n_j = n_j_total // n_splits

    dec_flops = 2 * B * (L * L + L * L + L * M3)
    dec_cost = pl.CostEstimate(
        flops=int(dec_flops), transcendentals=0,
        bytes_accessed=_nbytes(dec_args) + B * M3 * 4)

    dec_est = (2 * B * L * 4                        # embedding
               + 2 * 2 * (L * L * 2 + L * 4)        # fc1/fc2 weights+biases (worst case 2x)
               + 3 * L * TO * 2 + 2 * TO * 4        # fc3 weight (3 bufs) + bias tiles
               + 2 * B * TO * 4                     # output tiles
               + B * L * 2 + B * L * 4)             # f2 scratch + f32 intermediate

    def build_decoder(use_buffered):
        def bb(shape, index_map, buffers):
            return _maybe_buffered(shape, index_map, buffers if use_buffered else None)
        j3 = lambda c, j: (0, c * n_j + j)
        in_specs = [
            bb((B, L), lambda c, j: (0, 0), 1),     # embedding (grid-invariant)
            bb((L, L), lambda c, j: (0, 0), 1),     # fc1 w
            bb((1, L), lambda c, j: (0, 0), 1),     # fc1 b
            bb((L, L), lambda c, j: (0, 0), 1),     # fc2 w
            bb((1, L), lambda c, j: (0, 0), 1),     # fc2 b
            bb((L, TO), j3, 3),                     # fc3 w streams over 3N, 3-deep pipeline
            pl.BlockSpec((1, TO), j3),              # fc3 b
        ]
        return pl.pallas_call(
            decoder_kernel,
            grid=(n_splits, n_j),
            in_specs=in_specs,
            out_specs=pl.BlockSpec((B, TO), j3),
            out_shape=jax.ShapeDtypeStruct((B, M3), jnp.float32),
            scratch_shapes=[pltpu.VMEM((B, L), jnp.bfloat16)],
            compiler_params=pltpu.CompilerParams(
                dimension_semantics=("parallel", "arbitrary"),
                vmem_limit_bytes=_vmem_limit(dec_est)),
            cost_estimate=dec_cost)

    try:
        out_flat = build_decoder(True)(*dec_args)
    except Exception:   # pipeline_mode unsupported -> plain double-buffered specs
        out_flat = build_decoder(False)(*dec_args)

    net = out_flat.reshape(B, 3, N)            # matches .view(B, 3, N)
    end_points = {"embedding": emb}
    return net, end_points


# ----------------------------------------------------------------------------
# Plain-JAX reference (mirrors the bf16-weight / f32-accumulation math).
# ----------------------------------------------------------------------------
def reference_forward(point_cloud, params):
    B, _, N = point_cloud.shape
    x = point_cloud.astype(jnp.float32)                          # (B, 3, N)

    h = jnp.einsum("oi,bin->bon", params["conv1_w"], x) + params["conv1_b"][None]
    h = jnp.maximum(h, 0.0)
    for name in ("conv2", "conv3", "conv4", "conv5"):
        w = params[name + "_w"]
        b = params[name + "_b"]
        h = jnp.einsum("oi,bin->bon", w, h.astype(jnp.bfloat16),
                       preferred_element_type=jnp.float32) + b[None]
        h = jnp.maximum(h, 0.0)
    g = jnp.max(h, axis=2)                                       # (B, L)

    f = g
    for name in ("fc1", "fc2"):
        f = jnp.dot(f.astype(jnp.bfloat16), params[name + "_w"],
                    preferred_element_type=jnp.float32) + params[name + "_b"]
        f = jnp.maximum(f, 0.0)
    f = jnp.dot(f.astype(jnp.bfloat16), params["fc3_w"],
                preferred_element_type=jnp.float32) + params["fc3_b"]
    return f.reshape(B, 3, N), g


if __name__ == "__main__":
    B, N, L = 2, 256, 256                      # small num_points / latent_size
    key = jax.random.PRNGKey(0)
    pkey, xkey = jax.random.split(key)
    params = init_params(pkey, num_points=N, latent_size=L)
    point_cloud = jax.random.normal(xkey, (B, 3, N), jnp.float32)

    # point_tile=128 -> 2 N-tiles per batch (exercises the running-max carry and
    # the single lane-dense embedding store at the last tile);
    # out_tile=128   -> 6 fc3 tiles -> 2-way parallel split x 3 tiles each
    # (exercises the streamed fc3 weight and per-split fc1/fc2 recompute).
    net, end_points = autoencoder_point_forward(point_cloud, params,
                                                point_tile=128, out_tile=128)
    net = jax.block_until_ready(net)
    emb = jax.block_until_ready(end_points["embedding"])

    ref_net, ref_emb = reference_forward(point_cloud, params)
    assert net.shape == (B, 3, N)
    assert emb.shape == (B, L)
    assert jnp.allclose(emb, ref_emb, atol=2e-2, rtol=2e-2), float(
        jnp.max(jnp.abs(emb - ref_emb)))
    assert jnp.allclose(net, ref_net, atol=2e-2, rtol=2e-2), float(
        jnp.max(jnp.abs(net - ref_net)))
    print("KERNEL_OK")
</pallas_src>

<mosaic_0001>
module attributes {stable_mosaic.version = 11 : i64} {
  func.func @encoder_kernel(%arg0: i32, %arg1: i32, %arg2: memref<1x3x128xf32, #tpu.memory_space<vmem>>, %arg3: memref<64x3xf32, #tpu.memory_space<vmem>>, %arg4: memref<64x1xf32, #tpu.memory_space<vmem>>, %arg5: memref<64x64xbf16, #tpu.memory_space<vmem>>, %arg6: memref<64x1xf32, #tpu.memory_space<vmem>>, %arg7: memref<64x64xbf16, #tpu.memory_space<vmem>>, %arg8: memref<64x1xf32, #tpu.memory_space<vmem>>, %arg9: memref<128x64xbf16, #tpu.memory_space<vmem>>, %arg10: memref<128x1xf32, #tpu.memory_space<vmem>>, %arg11: memref<256x128xbf16, #tpu.memory_space<vmem>>, %arg12: memref<256x1xf32, #tpu.memory_space<vmem>>, %arg13: memref<1x1x256xf32, #tpu.memory_space<vmem>>, %arg14: memref<256x1xf32, #tpu.memory_space<vmem>>) attributes {dimension_semantics = [#tpu.dimension_semantics<parallel>, #tpu.dimension_semantics<arbitrary>], iteration_bounds = array<i64: 2, 2>, scalar_prefetch = 0 : i64, scratch_operands = 1 : i64, tpu.core_type = #tpu.core_type<tc>, window_params = [{transform_indices = @transform_0, window_bounds = array<i64: 1, 3, 128>}, {pipeline_mode = #tpu.pipeline_mode<synchronous>, transform_indices = @transform_1, window_bounds = array<i64: 64, 3>}, {pipeline_mode = #tpu.pipeline_mode<synchronous>, transform_indices = @transform_2, window_bounds = array<i64: 64, 1>}, {pipeline_mode = #tpu.pipeline_mode<synchronous>, transform_indices = @transform_3, window_bounds = array<i64: 64, 64>}, {pipeline_mode = #tpu.pipeline_mode<synchronous>, transform_indices = @transform_4, window_bounds = array<i64: 64, 1>}, {pipeline_mode = #tpu.pipeline_mode<synchronous>, transform_indices = @transform_5, window_bounds = array<i64: 64, 64>}, {pipeline_mode = #tpu.pipeline_mode<synchronous>, transform_indices = @transform_6, window_bounds = array<i64: 64, 1>}, {pipeline_mode = #tpu.pipeline_mode<synchronous>, transform_indices = @transform_7, window_bounds = array<i64: 128, 64>}, {pipeline_mode = #tpu.pipeline_mode<synchronous>, transform_indices = @transform_8, window_bounds = array<i64: 128, 1>}, {pipeline_mode = #tpu.pipeline_mode<synchronous>, transform_indices = @transform_9, window_bounds = array<i64: 256, 128>}, {pipeline_mode = #tpu.pipeline_mode<synchronous>, transform_indices = @transform_10, window_bounds = array<i64: 256, 1>}, {transform_indices = @transform_11, window_bounds = array<i64: 1, 1, 256>}]} {
    %c0 = arith.constant 0 : index
    %c0_0 = arith.constant 0 : index
    %c0_1 = arith.constant 0 : index
    %0 = vector.load %arg2[%c0, %c0_0, %c0_1] : memref<1x3x128xf32, #tpu.memory_space<vmem>>, vector<1x3x128xf32>
    %1 = vector.shape_cast %0 : vector<1x3x128xf32> to vector<3x128xf32>
    %c0_2 = arith.constant 0 : index
    %c0_3 = arith.constant 0 : index
    %2 = vector.load %arg3[%c0_2, %c0_3] : memref<64x3xf32, #tpu.memory_space<vmem>>, vector<64x3xf32>
    %c0_4 = arith.constant 0 : index
    %c0_5 = arith.constant 0 : index
    %3 = vector.load %arg4[%c0_4, %c0_5] : memref<64x1xf32, #tpu.memory_space<vmem>>, vector<64x1xf32>
    %4 = vector.extract_strided_slice %2 {offsets = [0, 0], sizes = [64, 1], strides = [1, 1]} : vector<64x3xf32> to vector<64x1xf32>
    %5 = vector.extract_strided_slice %1 {offsets = [0, 0], sizes = [1, 128], strides = [1, 1]} : vector<3x128xf32> to vector<1x128xf32>
    %6 = vector.broadcast %4 : vector<64x1xf32> to vector<64x128xf32>
    %7 = vector.broadcast %5 : vector<1x128xf32> to vector<64x128xf32>
    %8 = arith.mulf %6, %7 : vector<64x128xf32>
    %9 = vector.broadcast %3 : vector<64x1xf32> to vector<64x128xf32>
    %10 = arith.addf %9, %8 : vector<64x128xf32>
    %11 = vector.extract_strided_slice %2 {offsets = [0, 1], sizes = [64, 1], strides = [1, 1]} : vector<64x3xf32> to vector<64x1xf32>
    %12 = vector.extract_strided_slice %1 {offsets = [1, 0], sizes = [1, 128], strides = [1, 1]} : vector<3x128xf32> to vector<1x128xf32>
    %13 = vector.broadcast %11 : vector<64x1xf32> to vector<64x128xf32>
    %14 = vector.broadcast %12 : vector<1x128xf32> to vector<64x128xf32>
    %15 = arith.mulf %13, %14 : vector<64x128xf32>
    %16 = arith.addf %10, %15 : vector<64x128xf32>
    %17 = vector.extract_strided_slice %2 {offsets = [0, 2], sizes = [64, 1], strides = [1, 1]} : vector<64x3xf32> to vector<64x1xf32>
    %18 = vector.extract_strided_slice %1 {offsets = [2, 0], sizes = [1, 128], strides = [1, 1]} : vector<3x128xf32> to vector<1x128xf32>
    %19 = vector.broadcast %17 : vector<64x1xf32> to vector<64x128xf32>
    %20 = vector.broadcast %18 : vector<1x128xf32> to vector<64x128xf32>
    %21 = arith.mulf %19, %20 : vector<64x128xf32>
    %22 = arith.addf %16, %21 : vector<64x128xf32>
    %cst = arith.constant 0.000000e+00 : f32
    %23 = vector.broadcast %cst : f32 to vector<64x128xf32>
    %24 = arith.maximumf %22, %23 : vector<64x128xf32>
    %c0_6 = arith.constant 0 : index
    %c0_7 = arith.constant 0 : index
    %25 = vector.load %arg5[%c0_6, %c0_7] : memref<64x64xbf16, #tpu.memory_space<vmem>>, vector<64x64xbf16>
    %26 = arith.truncf %24 : vector<64x128xf32> to vector<64x128xbf16>
    %cst_8 = arith.constant dense<0.000000e+00> : vector<64x128xf32>
    %27 = tpu.matmul %25, %26, %cst_8 {dimension_numbers = #tpu.dot_dimension_numbers<[1], [0], [0], [1], [0, 0, 1, 1], [], []>} : vector<64x64xbf16>, vector<64x128xbf16>, vector<64x128xf32> -> vector<64x128xf32>
    %c0_9 = arith.constant 0 : index
    %c0_10 = arith.constant 0 : index
    %28 = vector.load %arg6[%c0_9, %c0_10] : memref<64x1xf32, #tpu.memory_space<vmem>>, vector<64x1xf32>
    %29 = vector.broadcast %28 : vector<64x1xf32> to vector<64x128xf32>
    %30 = arith.addf %27, %29 : vector<64x128xf32>
    %cst_11 = arith.constant 0.000000e+00 : f32
    %31 = vector.broadcast %cst_11 : f32 to vector<64x128xf32>
    %32 = arith.maximumf %30, %31 : vector<64x128xf32>
    %c0_12 = arith.constant 0 : index
    %c0_13 = arith.constant 0 : index
    %33 = vector.load %arg7[%c0_12, %c0_13] : memref<64x64xbf16, #tpu.memory_space<vmem>>, vector<64x64xbf16>
    %34 = arith.truncf %32 : vector<64x128xf32> to vector<64x128xbf16>
    %cst_14 = arith.constant dense<0.000000e+00> : vector<64x128xf32>
    %35 = tpu.matmul %33, %34, %cst_14 {dimension_numbers = #tpu.dot_dimension_numbers<[1], [0], [0], [1], [0, 0, 1, 1], [], []>} : vector<64x64xbf16>, vector<64x128xbf16>, vector<64x128xf32> -> vector<64x128xf32>
    %c0_15 = arith.constant 0 : index
    %c0_16 = arith.constant 0 : index
    %36 = vector.load %arg8[%c0_15, %c0_16] : memref<64x1xf32, #tpu.memory_space<vmem>>, vector<64x1xf32>
    %37 = vector.broadcast %36 : vector<64x1xf32> to vector<64x128xf32>
    %38 = arith.addf %35, %37 : vector<64x128xf32>
    %cst_17 = arith.constant 0.000000e+00 : f32
    %39 = vector.broadcast %cst_17 : f32 to vector<64x128xf32>
    %40 = arith.maximumf %38, %39 : vector<64x128xf32>
    %c0_18 = arith.constant 0 : index
    %c0_19 = arith.constant 0 : index
    %41 = vector.load %arg9[%c0_18, %c0_19] : memref<128x64xbf16, #tpu.memory_space<vmem>>, vector<128x64xbf16>
    %42 = arith.truncf %40 : vector<64x128xf32> to vector<64x128xbf16>
    %cst_20 = arith.constant dense<0.000000e+00> : vector<128x128xf32>
    %43 = tpu.matmul %41, %42, %cst_20 {dimension_numbers = #tpu.dot_dimension_numbers<[1], [0], [0], [1], [0, 0, 1, 1], [], []>} : vector<128x64xbf16>, vector<64x128xbf16>, vector<128x128xf32> -> vector<128x128xf32>
    %c0_21 = arith.constant 0 : index
    %c0_22 = arith.constant 0 : index
    %44 = vector.load %arg10[%c0_21, %c0_22] : memref<128x1xf32, #tpu.memory_space<vmem>>, vector<128x1xf32>
    %45 = vector.broadcast %44 : vector<128x1xf32> to vector<128x128xf32>
    %46 = arith.addf %43, %45 : vector<128x128xf32>
    %cst_23 = arith.constant 0.000000e+00 : f32
    %47 = vector.broadcast %cst_23 : f32 to vector<128x128xf32>
    %48 = arith.maximumf %46, %47 : vector<128x128xf32>
    %c0_24 = arith.constant 0 : index
    %c0_25 = arith.constant 0 : index
    %49 = vector.load %arg11[%c0_24, %c0_25] : memref<256x128xbf16, #tpu.memory_space<vmem>>, vector<256x128xbf16>
    %50 = arith.truncf %48 : vector<128x128xf32> to vector<128x128xbf16>
    %cst_26 = arith.constant dense<0.000000e+00> : vector<256x128xf32>
    %51 = tpu.matmul %49, %50, %cst_26 {dimension_numbers = #tpu.dot_dimension_numbers<[1], [0], [0], [1], [0, 0, 1, 1], [], []>} : vector<256x128xbf16>, vector<128x128xbf16>, vector<256x128xf32> -> vector<256x128xf32>
    %c0_27 = arith.constant 0 : index
    %c0_28 = arith.constant 0 : index
    %52 = vector.load %arg12[%c0_27, %c0_28] : memref<256x1xf32, #tpu.memory_space<vmem>>, vector<256x1xf32>
    %53 = vector.broadcast %52 : vector<256x1xf32> to vector<256x128xf32>
    %54 = arith.addf %51, %53 : vector<256x128xf32>
    %cst_29 = arith.constant 0.000000e+00 : f32
    %55 = vector.broadcast %cst_29 : f32 to vector<256x128xf32>
    %56 = arith.maximumf %54, %55 : vector<256x128xf32>
    %cst_30 = arith.constant dense<0xFF800000> : vector<256xf32>
    %57 = vector.multi_reduction <maximumf>, %56, %cst_30 [1] : vector<256x128xf32> to vector<256xf32>
    %58 = vector.shape_cast %57 : vector<256xf32> to vector<256x1xf32>
    %c0_i32 = arith.constant 0 : i32
    %59 = arith.cmpi eq, %arg1, %c0_i32 : i32
    %60 = arith.extui %59 : i1 to i32
    %c0_i32_31 = arith.constant 0 : i32
    %61 = arith.cmpi ne, %60, %c0_i32_31 : i32
    scf.if %61 {
      %c0_35 = arith.constant 0 : index
      %c0_36 = arith.constant 0 : index
      %68 = vector.load %arg14[%c0_35, %c0_36] : memref<256x1xf32, #tpu.memory_space<vmem>>, vector<256x1xf32>
      tpu.vector_store %arg14[%c0_35, %c0_36], %58 {strides = array<i32>} : memref<256x1xf32, #tpu.memory_space<vmem>>, vector<256x1xf32>,
    } else {
    }
    %c0_i32_32 = arith.constant 0 : i32
    %62 = arith.cmpi sgt, %arg1, %c0_i32_32 : i32
    %63 = arith.extui %62 : i1 to i32
    %c0_i32_33 = arith.constant 0 : i32
    %64 = arith.cmpi ne, %63, %c0_i32_33 : i32
    scf.if %64 {
      %c0_35 = arith.constant 0 : index
      %c0_36 = arith.constant 0 : index
      %68 = vector.load %arg14[%c0_35, %c0_36] : memref<256x1xf32, #tpu.memory_space<vmem>>, vector<256x1xf32>
      %69 = arith.maximumf %68, %58 : vector<256x1xf32>
      %c0_37 = arith.constant 0 : index
      %c0_38 = arith.constant 0 : index
      %70 = vector.load %arg14[%c0_37, %c0_38] : memref<256x1xf32, #tpu.memory_space<vmem>>, vector<256x1xf32>
      tpu.vector_store %arg14[%c0_37, %c0_38], %69 {strides = array<i32>} : memref<256x1xf32, #tpu.memory_space<vmem>>, vector<256x1xf32>,
    } else {
    }
    %c1_i32 = arith.constant 1 : i32
    %65 = arith.cmpi eq, %arg1, %c1_i32 : i32
    %66 = arith.extui %65 : i1 to i32
    %c0_i32_34 = arith.constant 0 : i32
    %67 = arith.cmpi ne, %66, %c0_i32_34 : i32
    scf.if %67 {
      %c0_35 = arith.constant 0 : index
      %c0_36 = arith.constant 0 : index
      %68 = vector.load %arg14[%c0_35, %c0_36] : memref<256x1xf32, #tpu.memory_space<vmem>>, vector<256x1xf32>
      %69 = tpu.transpose %68, [1, 0] : vector<256x1xf32> -> vector<1x256xf32>
      %c0_37 = arith.constant 0 : index
      %c0_38 = arith.constant 0 : index
      %c0_39 = arith.constant 0 : index
      %70 = vector.load %arg13[%c0_37, %c0_38, %c0_39] : memref<1x1x256xf32, #tpu.memory_space<vmem>>, vector<1x1x256xf32>
      %71 = vector.shape_cast %70 : vector<1x1x256xf32> to vector<1x256xf32>
      %72 = vector.shape_cast %69 : vector<1x256xf32> to vector<1x1x256xf32>
      tpu.vector_store %arg13[%c0_37, %c0_38, %c0_39], %72 {strides = array<i32>} : memref<1x1x256xf32, #tpu.memory_space<vmem>>, vector<1x1x256xf32>,
    } else {
    }
    return
  }
  func.func @transform_0(%arg0: i32, %arg1: i32) -> (i32, i32, i32) {
    %c0_i32 = arith.constant 0 : i32
    %c0_i32_0 = arith.constant 0 : i32
    return %arg0, %c0_i32, %arg1 : i32, i32, i32
  }
  func.func @transform_1(%arg0: i32, %arg1: i32) -> (i32, i32) {
    %c0_i32 = arith.constant 0 : i32
    %c0_i32_0 = arith.constant 0 : i32
    %c0_i32_1 = arith.constant 0 : i32
    return %c0_i32, %c0_i32_0 : i32, i32
  }
  func.func @transform_2(%arg0: i32, %arg1: i32) -> (i32, i32) {
    %c0_i32 = arith.constant 0 : i32
    %c0_i32_0 = arith.constant 0 : i32
    %c0_i32_1 = arith.constant 0 : i32
    return %c0_i32, %c0_i32_0 : i32, i32
  }
  func.func @transform_3(%arg0: i32, %arg1: i32) -> (i32, i32) {
    %c0_i32 = arith.constant 0 : i32
    %c0_i32_0 = arith.constant 0 : i32
    %c0_i32_1 = arith.constant 0 : i32
    return %c0_i32, %c0_i32_0 : i32, i32
  }
  func.func @transform_4(%arg0: i32, %arg1: i32) -> (i32, i32) {
    %c0_i32 = arith.constant 0 : i32
    %c0_i32_0 = arith.constant 0 : i32
    %c0_i32_1 = arith.constant 0 : i32
    return %c0_i32, %c0_i32_0 : i32, i32
  }
  func.func @transform_5(%arg0: i32, %arg1: i32) -> (i32, i32) {
    %c0_i32 = arith.constant 0 : i32
    %c0_i32_0 = arith.constant 0 : i32
    %c0_i32_1 = arith.constant 0 : i32
    return %c0_i32, %c0_i32_0 : i32, i32
  }
  func.func @transform_6(%arg0: i32, %arg1: i32) -> (i32, i32) {
    %c0_i32 = arith.constant 0 : i32
    %c0_i32_0 = arith.constant 0 : i32
    %c0_i32_1 = arith.constant 0 : i32
    return %c0_i32, %c0_i32_0 : i32, i32
  }
  func.func @transform_7(%arg0: i32, %arg1: i32) -> (i32, i32) {
    %c0_i32 = arith.constant 0 : i32
    %c0_i32_0 = arith.constant 0 : i32
    %c0_i32_1 = arith.constant 0 : i32
    return %c0_i32, %c0_i32_0 : i32, i32
  }
  func.func @transform_8(%arg0: i32, %arg1: i32) -> (i32, i32) {
    %c0_i32 = arith.constant 0 : i32
    %c0_i32_0 = arith.constant 0 : i32
    %c0_i32_1 = arith.constant 0 : i32
    return %c0_i32, %c0_i32_0 : i32, i32
  }
  func.func @transform_9(%arg0: i32, %arg1: i32) -> (i32, i32) {
    %c0_i32 = arith.constant 0 : i32
    %c0_i32_0 = arith.constant 0 : i32
    %c0_i32_1 = arith.constant 0 : i32
    return %c0_i32, %c0_i32_0 : i32, i32
  }
  func.func @transform_10(%arg0: i32, %arg1: i32) -> (i32, i32) {
    %c0_i32 = arith.constant 0 : i32
    %c0_i32_0 = arith.constant 0 : i32
    %c0_i32_1 = arith.constant 0 : i32
    return %c0_i32, %c0_i32_0 : i32, i32
  }
  func.func @transform_11(%arg0: i32, %arg1: i32) -> (i32, i32, i32) {
    %c0_i32 = arith.constant 0 : i32
    %c0_i32_0 = arith.constant 0 : i32
    %c0_i32_1 = arith.constant 0 : i32
    return %arg0, %c0_i32, %c0_i32_0 : i32, i32, i32
  }
}

module attributes {stable_mosaic.version = 11 : i64} {
  func.func @encoder_kernel(%arg0: i32, %arg1: i32, %arg2: memref<1x3x128xf32, #tpu.memory_space<vmem>>, %arg3: memref<64x3xf32, #tpu.memory_space<vmem>>, %arg4: memref<64x1xf32, #tpu.memory_space<vmem>>, %arg5: memref<64x64xbf16, #tpu.memory_space<vmem>>, %arg6: memref<64x1xf32, #tpu.memory_space<vmem>>, %arg7: memref<64x64xbf16, #tpu.memory_space<vmem>>, %arg8: memref<64x1xf32, #tpu.memory_space<vmem>>, %arg9: memref<128x64xbf16, #tpu.memory_space<vmem>>, %arg10: memref<128x1xf32, #tpu.memory_space<vmem>>, %arg11: memref<256x128xbf16, #tpu.memory_space<vmem>>, %arg12: memref<256x1xf32, #tpu.memory_space<vmem>>, %arg13: memref<1x1x256xf32, #tpu.memory_space<vmem>>, %arg14: memref<256x1xf32, #tpu.memory_space<vmem>>) attributes {dimension_semantics = [#tpu.dimension_semantics<parallel>, #tpu.dimension_semantics<arbitrary>], iteration_bounds = array<i64: 2, 2>, scalar_prefetch = 0 : i64, scratch_operands = 1 : i64, tpu.core_type = #tpu.core_type<tc>, window_params = [{transform_indices = @transform_0, window_bounds = array<i64: 1, 3, 128>}, {pipeline_mode = #tpu.pipeline_mode<synchronous>, transform_indices = @transform_1, window_bounds = array<i64: 64, 3>}, {pipeline_mode = #tpu.pipeline_mode<synchronous>, transform_indices = @transform_2, window_bounds = array<i64: 64, 1>}, {pipeline_mode = #tpu.pipeline_mode<synchronous>, transform_indices = @transform_3, window_bounds = array<i64: 64, 64>}, {pipeline_mode = #tpu.pipeline_mode<synchronous>, transform_indices = @transform_4, window_bounds = array<i64: 64, 1>}, {pipeline_mode = #tpu.pipeline_mode<synchronous>, transform_indices = @transform_5, window_bounds = array<i64: 64, 64>}, {pipeline_mode = #tpu.pipeline_mode<synchronous>, transform_indices = @transform_6, window_bounds = array<i64: 64, 1>}, {pipeline_mode = #tpu.pipeline_mode<synchronous>, transform_indices = @transform_7, window_bounds = array<i64: 128, 64>}, {pipeline_mode = #tpu.pipeline_mode<synchronous>, transform_indices = @transform_8, window_bounds = array<i64: 128, 1>}, {pipeline_mode = #tpu.pipeline_mode<synchronous>, transform_indices = @transform_9, window_bounds = array<i64: 256, 128>}, {pipeline_mode = #tpu.pipeline_mode<synchronous>, transform_indices = @transform_10, window_bounds = array<i64: 256, 1>}, {transform_indices = @transform_11, window_bounds = array<i64: 1, 1, 256>}]} {
    %c0 = arith.constant 0 : index
    %c0_0 = arith.constant 0 : index
    %c0_1 = arith.constant 0 : index
    %0 = vector.load %arg2[%c0, %c0_0, %c0_1] : memref<1x3x128xf32, #tpu.memory_space<vmem>>, vector<1x3x128xf32>
    %1 = vector.shape_cast %0 : vector<1x3x128xf32> to vector<3x128xf32>
    %c0_2 = arith.constant 0 : index
    %c0_3 = arith.constant 0 : index
    %2 = vector.load %arg3[%c0_2, %c0_3] : memref<64x3xf32, #tpu.memory_space<vmem>>, vector<64x3xf32>
    %c0_4 = arith.constant 0 : index
    %c0_5 = arith.constant 0 : index
    %3 = vector.load %arg4[%c0_4, %c0_5] : memref<64x1xf32, #tpu.memory_space<vmem>>, vector<64x1xf32>
    %4 = vector.extract_strided_slice %2 {offsets = [0, 0], sizes = [64, 1], strides = [1, 1]} : vector<64x3xf32> to vector<64x1xf32>
    %5 = vector.extract_strided_slice %1 {offsets = [0, 0], sizes = [1, 128], strides = [1, 1]} : vector<3x128xf32> to vector<1x128xf32>
    %6 = vector.broadcast %4 : vector<64x1xf32> to vector<64x128xf32>
    %7 = vector.broadcast %5 : vector<1x128xf32> to vector<64x128xf32>
    %8 = arith.mulf %6, %7 : vector<64x128xf32>
    %9 = vector.broadcast %3 : vector<64x1xf32> to vector<64x128xf32>
    %10 = arith.addf %9, %8 : vector<64x128xf32>
    %11 = vector.extract_strided_slice %2 {offsets = [0, 1], sizes = [64, 1], strides = [1, 1]} : vector<64x3xf32> to vector<64x1xf32>
    %12 = vector.extract_strided_slice %1 {offsets = [1, 0], sizes = [1, 128], strides = [1, 1]} : vector<3x128xf32> to vector<1x128xf32>
    %13 = vector.broadcast %11 : vector<64x1xf32> to vector<64x128xf32>
    %14 = vector.broadcast %12 : vector<1x128xf32> to vector<64x128xf32>
    %15 = arith.mulf %13, %14 : vector<64x128xf32>
    %16 = arith.addf %10, %15 : vector<64x128xf32>
    %17 = vector.extract_strided_slice %2 {offsets = [0, 2], sizes = [64, 1], strides = [1, 1]} : vector<64x3xf32> to vector<64x1xf32>
    %18 = vector.extract_strided_slice %1 {offsets = [2, 0], sizes = [1, 128], strides = [1, 1]} : vector<3x128xf32> to vector<1x128xf32>
    %19 = vector.broadcast %17 : vector<64x1xf32> to vector<64x128xf32>
    %20 = vector.broadcast %18 : vector<1x128xf32> to vector<64x128xf32>
    %21 = arith.mulf %19, %20 : vector<64x128xf32>
    %22 = arith.addf %16, %21 : vector<64x128xf32>
    %cst = arith.constant 0.000000e+00 : f32
    %23 = vector.broadcast %cst : f32 to vector<64x128xf32>
    %24 = arith.maximumf %22, %23 : vector<64x128xf32>
    %c0_6 = arith.constant 0 : index
    %c0_7 = arith.constant 0 : index
    %25 = vector.load %arg5[%c0_6, %c0_7] : memref<64x64xbf16, #tpu.memory_space<vmem>>, vector<64x64xbf16>
    %26 = arith.truncf %24 : vector<64x128xf32> to vector<64x128xbf16>
    %cst_8 = arith.constant dense<0.000000e+00> : vector<64x128xf32>
    %27 = tpu.matmul %25, %26, %cst_8 {dimension_numbers = #tpu.dot_dimension_numbers<[1], [0], [0], [1], [0, 0, 1, 1], [], []>} : vector<64x64xbf16>, vector<64x128xbf16>, vector<64x128xf32> -> vector<64x128xf32>
    %c0_9 = arith.constant 0 : index
    %c0_10 = arith.constant 0 : index
    %28 = vector.load %arg6[%c0_9, %c0_10] : memref<64x1xf32, #tpu.memory_space<vmem>>, vector<64x1xf32>
    %29 = vector.broadcast %28 : vector<64x1xf32> to vector<64x128xf32>
    %30 = arith.addf %27, %29 : vector<64x128xf32>
    %cst_11 = arith.constant 0.000000e+00 : f32
    %31 = vector.broadcast %cst_11 : f32 to vector<64x128xf32>
    %32 = arith.maximumf %30, %31 : vector<64x128xf32>
    %c0_12 = arith.constant 0 : index
    %c0_13 = arith.constant 0 : index
    %33 = vector.load %arg7[%c0_12, %c0_13] : memref<64x64xbf16, #tpu.memory_space<vmem>>, vector<64x64xbf16>
    %34 = arith.truncf %32 : vector<64x128xf32> to vector<64x128xbf16>
    %cst_14 = arith.constant dense<0.000000e+00> : vector<64x128xf32>
    %35 = tpu.matmul %33, %34, %cst_14 {dimension_numbers = #tpu.dot_dimension_numbers<[1], [0], [0], [1], [0, 0, 1, 1], [], []>} : vector<64x64xbf16>, vector<64x128xbf16>, vector<64x128xf32> -> vector<64x128xf32>
    %c0_15 = arith.constant 0 : index
    %c0_16 = arith.constant 0 : index
    %36 = vector.load %arg8[%c0_15, %c0_16] : memref<64x1xf32, #tpu.memory_space<vmem>>, vector<64x1xf32>
    %37 = vector.broadcast %36 : vector<64x1xf32> to vector<64x128xf32>
    %38 = arith.addf %35, %37 : vector<64x128xf32>
    %cst_17 = arith.constant 0.000000e+00 : f32
    %39 = vector.broadcast %cst_17 : f32 to vector<64x128xf32>
    %40 = arith.maximumf %38, %39 : vector<64x128xf32>
    %c0_18 = arith.constant 0 : index
    %c0_19 = arith.constant 0 : index
    %41 = vector.load %arg9[%c0_18, %c0_19] : memref<128x64xbf16, #tpu.memory_space<vmem>>, vector<128x64xbf16>
    %42 = arith.truncf %40 : vector<64x128xf32> to vector<64x128xbf16>
    %cst_20 = arith.constant dense<0.000000e+00> : vector<128x128xf32>
    %43 = tpu.matmul %41, %42, %cst_20 {dimension_numbers = #tpu.dot_dimension_numbers<[1], [0], [0], [1], [0, 0, 1, 1], [], []>} : vector<128x64xbf16>, vector<64x128xbf16>, vector<128x128xf32> -> vector<128x128xf32>
    %c0_21 = arith.constant 0 : index
    %c0_22 = arith.constant 0 : index
    %44 = vector.load %arg10[%c0_21, %c0_22] : memref<128x1xf32, #tpu.memory_space<vmem>>, vector<128x1xf32>
    %45 = vector.broadcast %44 : vector<128x1xf32> to vector<128x128xf32>
    %46 = arith.addf %43, %45 : vector<128x128xf32>
    %cst_23 = arith.constant 0.000000e+00 : f32
    %47 = vector.broadcast %cst_23 : f32 to vector<128x128xf32>
    %48 = arith.maximumf %46, %47 : vector<128x128xf32>
    %c0_24 = arith.constant 0 : index
    %c0_25 = arith.constant 0 : index
    %49 = vector.load %arg11[%c0_24, %c0_25] : memref<256x128xbf16, #tpu.memory_space<vmem>>, vector<256x128xbf16>
    %50 = arith.truncf %48 : vector<128x128xf32> to vector<128x128xbf16>
    %cst_26 = arith.constant dense<0.000000e+00> : vector<256x128xf32>
    %51 = tpu.matmul %49, %50, %cst_26 {dimension_numbers = #tpu.dot_dimension_numbers<[1], [0], [0], [1], [0, 0, 1, 1], [], []>} : vector<256x128xbf16>, vector<128x128xbf16>, vector<256x128xf32> -> vector<256x128xf32>
    %c0_27 = arith.constant 0 : index
    %c0_28 = arith.constant 0 : index
    %52 = vector.load %arg12[%c0_27, %c0_28] : memref<256x1xf32, #tpu.memory_space<vmem>>, vector<256x1xf32>
    %53 = vector.broadcast %52 : vector<256x1xf32> to vector<256x128xf32>
    %54 = arith.addf %51, %53 : vector<256x128xf32>
    %cst_29 = arith.constant 0.000000e+00 : f32
    %55 = vector.broadcast %cst_29 : f32 to vector<256x128xf32>
    %56 = arith.maximumf %54, %55 : vector<256x128xf32>
    %cst_30 = arith.constant dense<0xFF800000> : vector<256xf32>
    %57 = vector.multi_reduction <maximumf>, %56, %cst_30 [1] : vector<256x128xf32> to vector<256xf32>
    %58 = vector.shape_cast %57 : vector<256xf32> to vector<256x1xf32>
    %c0_i32 = arith.constant 0 : i32
    %59 = arith.cmpi eq, %arg1, %c0_i32 : i32
    %60 = arith.extui %59 : i1 to i32
    %c0_i32_31 = arith.constant 0 : i32
    %61 = arith.cmpi ne, %60, %c0_i32_31 : i32
    scf.if %61 {
      %c0_35 = arith.constant 0 : index
      %c0_36 = arith.constant 0 : index
      %68 = vector.load %arg14[%c0_35, %c0_36] : memref<256x1xf32, #tpu.memory_space<vmem>>, vector<256x1xf32>
      tpu.vector_store %arg14[%c0_35, %c0_36], %58 {strides = array<i32>} : memref<256x1xf32, #tpu.memory_space<vmem>>, vector<256x1xf32>,
    } else {
    }
    %c0_i32_32 = arith.constant 0 : i32
    %62 = arith.cmpi sgt, %arg1, %c0_i32_32 : i32
    %63 = arith.extui %62 : i1 to i32
    %c0_i32_33 = arith.constant 0 : i32
    %64 = arith.cmpi ne, %63, %c0_i32_33 : i32
    scf.if %64 {
      %c0_35 = arith.constant 0 : index
      %c0_36 = arith.constant 0 : index
      %68 = vector.load %arg14[%c0_35, %c0_36] : memref<256x1xf32, #tpu.memory_space<vmem>>, vector<256x1xf32>
      %69 = arith.maximumf %68, %58 : vector<256x1xf32>
      %c0_37 = arith.constant 0 : index
      %c0_38 = arith.constant 0 : index
      %70 = vector.load %arg14[%c0_37, %c0_38] : memref<256x1xf32, #tpu.memory_space<vmem>>, vector<256x1xf32>
      tpu.vector_store %arg14[%c0_37, %c0_38], %69 {strides = array<i32>} : memref<256x1xf32, #tpu.memory_space<vmem>>, vector<256x1xf32>,
    } else {
    }
    %c1_i32 = arith.constant 1 : i32
    %65 = arith.cmpi eq, %arg1, %c1_i32 : i32
    %66 = arith.extui %65 : i1 to i32
    %c0_i32_34 = arith.constant 0 : i32
    %67 = arith.cmpi ne, %66, %c0_i32_34 : i32
    scf.if %67 {
      %c0_35 = arith.constant 0 : index
      %c0_36 = arith.constant 0 : index
      %68 = vector.load %arg14[%c0_35, %c0_36] : memref<256x1xf32, #tpu.memory_space<vmem>>, vector<256x1xf32>
      %69 = tpu.transpose %68, [1, 0] : vector<256x1xf32> -> vector<1x256xf32>
      %c0_37 = arith.constant 0 : index
      %c0_38 = arith.constant 0 : index
      %c0_39 = arith.constant 0 : index
      %70 = vector.load %arg13[%c0_37, %c0_38, %c0_39] : memref<1x1x256xf32, #tpu.memory_space<vmem>>, vector<1x1x256xf32>
      %71 = vector.shape_cast %70 : vector<1x1x256xf32> to vector<1x256xf32>
      %72 = vector.shape_cast %69 : vector<1x256xf32> to vector<1x1x256xf32>
      tpu.vector_store %arg13[%c0_37, %c0_38, %c0_39], %72 {strides = array<i32>} : memref<1x1x256xf32, #tpu.memory_space<vmem>>, vector<1x1x256xf32>,
    } else {
    }
    return
  }
  func.func @transform_0(%arg0: i32, %arg1: i32) -> (i32, i32, i32) {
    %c0_i32 = arith.constant 0 : i32
    %c0_i32_0 = arith.constant 0 : i32
    return %arg0, %c0_i32, %arg1 : i32, i32, i32
  }
  func.func @transform_1(%arg0: i32, %arg1: i32) -> (i32, i32) {
    %c0_i32 = arith.constant 0 : i32
    %c0_i32_0 = arith.constant 0 : i32
    %c0_i32_1 = arith.constant 0 : i32
    return %c0_i32, %c0_i32_0 : i32, i32
  }
  func.func @transform_2(%arg0: i32, %arg1: i32) -> (i32, i32) {
    %c0_i32 = arith.constant 0 : i32
    %c0_i32_0 = arith.constant 0 : i32
    %c0_i32_1 = arith.constant 0 : i32
    return %c0_i32, %c0_i32_0 : i32, i32
  }
  func.func @transform_3(%arg0: i32, %arg1: i32) -> (i32, i32) {
    %c0_i32 = arith.constant 0 : i32
    %c0_i32_0 = arith.constant 0 : i32
    %c0_i32_1 = arith.constant 0 : i32
    return %c0_i32, %c0_i32_0 : i32, i32
  }
  func.func @transform_4(%arg0: i32, %arg1: i32) -> (i32, i32) {
    %c0_i32 = arith.constant 0 : i32
    %c0_i32_0 = arith.constant 0 : i32
    %c0_i32_1 = arith.constant 0 : i32
    return %c0_i32, %c0_i32_0 : i32, i32
  }
  func.func @transform_5(%arg0: i32, %arg1: i32) -> (i32, i32) {
    %c0_i32 = arith.constant 0 : i32
    %c0_i32_0 = arith.constant 0 : i32
    %c0_i32_1 = arith.constant 0 : i32
    return %c0_i32, %c0_i32_0 : i32, i32
  }
  func.func @transform_6(%arg0: i32, %arg1: i32) -> (i32, i32) {
    %c0_i32 = arith.constant 0 : i32
    %c0_i32_0 = arith.constant 0 : i32
    %c0_i32_1 = arith.constant 0 : i32
    return %c0_i32, %c0_i32_0 : i32, i32
  }
  func.func @transform_7(%arg0: i32, %arg1: i32) -> (i32, i32) {
    %c0_i32 = arith.constant 0 : i32
    %c0_i32_0 = arith.constant 0 : i32
    %c0_i32_1 = arith.constant 0 : i32
    return %c0_i32, %c0_i32_0 : i32, i32
  }
  func.func @transform_8(%arg0: i32, %arg1: i32) -> (i32, i32) {
    %c0_i32 = arith.constant 0 : i32
    %c0_i32_0 = arith.constant 0 : i32
    %c0_i32_1 = arith.constant 0 : i32
    return %c0_i32, %c0_i32_0 : i32, i32
  }
  func.func @transform_9(%arg0: i32, %arg1: i32) -> (i32, i32) {
    %c0_i32 = arith.constant 0 : i32
    %c0_i32_0 = arith.constant 0 : i32
    %c0_i32_1 = arith.constant 0 : i32
    return %c0_i32, %c0_i32_0 : i32, i32
  }
  func.func @transform_10(%arg0: i32, %arg1: i32) -> (i32, i32) {
    %c0_i32 = arith.constant 0 : i32
    %c0_i32_0 = arith.constant 0 : i32
    %c0_i32_1 = arith.constant 0 : i32
    return %c0_i32, %c0_i32_0 : i32, i32
  }
  func.func @transform_11(%arg0: i32, %arg1: i32) -> (i32, i32, i32) {
    %c0_i32 = arith.constant 0 : i32
    %c0_i32_0 = arith.constant 0 : i32
    %c0_i32_1 = arith.constant 0 : i32
    return %arg0, %c0_i32, %c0_i32_0 : i32, i32, i32
  }
}

</mosaic_0001>

<bundles_post_ra>
// kernel: tpu_custom_call.1
= control target key start
LH: loop header
LB: loop body
LE: loop exit
PB: predicated region body
PF: predicated region fallthrough
CT: control target
= control target key end

     0   :  { %s3497_s0 = inlined_call_operand.vmem [shape: f32[2,3,256], index: 0, kind: input, shape index: {}]   ;;  %s3498_s1 = inlined_call_operand.vmem [shape: f32[64,3], index: 1, kind: input, shape index: {}]   ;;  %s3499_s2 = inlined_call_operand.vmem [shape: f32[64,1], index: 2, kind: input, shape index: {}]   ;;  %s3500_s3 = inlined_call_operand.vmem [shape: bf16[64,64], index: 3, kind: input, shape index: {}]   ;;  %s3501_s4 = inlined_call_operand.vmem [shape: f32[64,1], index: 4, kind: input, shape index: {}]   ;;  %s3502_s5 = inlined_call_operand.vmem [shape: bf16[64,64], index: 5, kind: input, shape index: {}]   ;;  %s3503_s6 = inlined_call_operand.vmem [shape: f32[64,1], index: 6, kind: input, shape index: {}]   ;;  %s3504_s7 = inlined_call_operand.vmem [shape: bf16[128,64], index: 7, kind: input, shape index: {}]   ;;  %s3505_s8 = inlined_call_operand.vmem [shape: f32[128,1], index: 8, kind: input, shape index: {}]   ;;  %s3506_s9 = inlined_call_operand.vmem [shape: bf16[256,128], index: 9, kind: input, shape index: {}]   ;;  %s3507_s10 = inlined_call_operand.vmem [shape: f32[256,1], index: 10, kind: input, shape index: {}]   ;;  %s3508_s11 = inlined_call_operand.hbm [shape: f32[2,1,256], index: 11, kind: output, shape index: {}]  }
   0x1   :  { %3512 = sst [smem:[#allocation9_spill]] %s3497_s0 }
   0x2   :  { %3513 = sst [smem:[#allocation10_spill]] %s3498_s1 }
   0x3   :  { %3514 = sst [smem:[#allocation11_spill]] %s3499_s2 }
   0x4   :  { %16 = vsyncpa [#allocation4], 0 }
   0x5   :  { %18 = vsyncpa [#allocation4 + $0x1], 0  ;;  %s2724_s17 = smov 0   ;;  %s2726_s18 = smov 0  }
   0x6   :  { %s2728_s19 = smov 0   ;;  %s2730_s20 = smov 0  }
   0x7   :  { %s2732_s21 = smov 0   ;;  %s2734_s22 = smov 0  }
   0x8   :  { %s2736_s23 = smov 0   ;;  %s2738_s24 = smov 0  }
   0x9 LB: > { %3515 = sst [smem:[#allocation6_spill]] %s2653_s23  ;;  %s2199_s25 = sadd.s32 4294967295, %s2657_s24   ;;  %s2657_s24 = sphi %s2738_s24, %s24_s24   ;;  %s2653_s23 = sphi %s2736_s23, %s3526_s23   ;;  %s2649_s22 = sphi %s2734_s22, %s3531_s22   ;;  %s2645_s21 = sphi %s2732_s21, %s3524_s21   ;;  %s2641_s20 = sphi %s2730_s20, %s3530_s20   ;;  %s2637_s19 = sphi %s2728_s19, %s3529_s19   ;;  %s2633_s18 = sphi %s2726_s18, %s3528_s18   ;;  %s2629_s17 = sphi %s2724_s17, %s3527_s17  }
   0xa   : > { %s2200_s26 = sadd.s32 4294967294, %s2657_s24   ;;  %s33_s27 = sadd.s32 1, %s2649_s22 }
   0xb   : > { %p34_p0 = scmp.ge.s32.totalorder %s33_s27, 2  ;;  %s36_s28 = sadd.s32 1, %s2653_s23 }
   0xc   : > { %p291_p1 = scmp.ne.s32.totalorder %s2637_s19, %s2633_s18  ;;  %p292_p2 = scmp.eq.s32.totalorder %s2199_s25, 3 }
   0xd   : > { %s3533_s27 = smov (%p34_p0, %s33_s27), 0  ;;  %s3535_s28 = smov (!%p34_p0, %s36_s28), %s2653_s23 }
   0xe   : > { %3516 = sst [smem:[#allocation7_spill]] %s3533_s27  ;;  %p2773_p3 = por %p292_p2, %p291_p1 }
   0xf   : > { %p297_p4 = scmp.ne.s32.totalorder %s2633_s18, %s2629_s17  ;;  %p38_p5 = scmp.ge.s32.totalorder %s3535_s28, 2 }
  0x10   : > { %p298_p6 = scmp.eq.s32.totalorder %s2200_s26, 3  ;;  %p2203_p7 = scmp.ge.s32.totalorder %s2657_s24, 1 }
  0x11   : > { %p357_p8 = scmp.lt.s32.totalorder %s2657_s24, 5  ;;  %s3537_s28 = smov (%p38_p5, %s3535_s28), 0 }
  0x12   : > { %3518 = sst [smem:[#allocation8_spill]] %s3537_s28  ;;  %p2783_p9 = por %p298_p6, %p297_p4 }
  0x13   : > { %p358_p10 = pnand %p2203_p7, %p357_p8  ;;  %s278_s12 = ssub.s32 %s2653_s23, %s3537_s28 }
  0x14   : > { %s281_s13 = sadd.s32 1, %s2637_s19  ;;  %p279_p11 = scmp.eq.s32.totalorder %s278_s12, 0  ;;  %v2659_v2 = vmov (!%p358_p10), 0   ;;  %v2660_v7 = vmov (!%p358_p10), 1   ;;  %v2661_v11 = vmov (!%p358_p10), 2   ;;  %v652_v18 = vld [vmem:[%s3501_s4 + $0x10] sm:$0xff] (!%p358_p10)  ;;  %v466_v60 = vlaneseq (!%p358_p10) }
  0x15   : > { %361 = sbr.rel (%p358_p10) target bundleno = 1585 (0x631), region = 64  ;;  %s3520_s2 = sld [smem:[#allocation11_spill]] (!%p358_p10)  ;;  %2512 = vset.pattern.permute.xlu1 (!%p358_p10), %v2659_v2  ;;  %2511 = vset.pattern.permute.xlu0 (!%p358_p10), %v2659_v2  ;;  %v655_v19 = vld [vmem:[%s3501_s4 + $0x28] sm:$0xff] (!%p358_p10)  ;;  %v657_v21 = vld [vmem:[%s3501_s4 + $0x38] sm:$0xff] (!%p358_p10)  ;;  %v650_v24 = vld [vmem:[%s3501_s4] sm:$0xff] (!%p358_p10)  ;;  %vm718_vm0 = vcmask (!%p358_p10), 523264  }
  0x16   : > { %s2791_s14 = scalar_select %p279_p11, %s2637_s19, %s281_s13  }
  0x17   : > { %s3521_s1 = sld [smem:[#allocation10_spill]] (!%p358_p10)  ;;  %s3510_s28 = sand.u32 (!%p358_p10), 1, %s2633_s18   ;;  %v817_v22 = vld [vmem:[%s3503_s6 + $0x8] sm:$0xff] (!%p358_p10)  ;;  %v819_v23 = vld [vmem:[%s3503_s6 + $0x18] sm:$0xff] (!%p358_p10)  ;;  %v2531_v28 = vld [vmem:[%s3500_s3] sm:$0xff] (!%p358_p10)  }
  0x18   : > { %s2843_s12 = sshll.u32 (!%p358_p10), %s3510_s28, 1  ;;  %v821_v25 = vld [vmem:[%s3503_s6 + $0x28] sm:$0xff] (!%p358_p10)  ;;  %v823_v26 = vld [vmem:[%s3503_s6 + $0x38] sm:$0xff] (!%p358_p10)  ;;  %2324 = vmatprep.mubr.msk.bf16.mxu0 (!%p358_p10), %vm718_vm0, %v2531_v28  ;;  %v654_v32 = vld [vmem:[%s3501_s4 + $0x20] sm:$0xff] (!%p358_p10)  ;;  %p400_p12 = scmp.lt.s32.totalorder (!%p358_p10), %s2645_s21, 1 }
  0x19   : > { %v651_v27 = vld [vmem:[%s3501_s4 + $0x8] sm:$0xff] (!%p358_p10)  ;;  %v653_v30 = vld [vmem:[%s3501_s4 + $0x18] sm:$0xff] (!%p358_p10)  ;;  %v656_v34 = vld [vmem:[%s3501_s4 + $0x30] sm:$0xff] (!%p358_p10)  ;;  %p402_p13 = scmp.lt.s32.totalorder (!%p358_p10), %s2641_s20, 1  ;;  %s3522_s0 = sld [smem:[#allocation9_spill]] (!%p358_p10) }
  0x1a   : > { %v990_v29 = vld [vmem:[%s3505_s8 + $0x8] sm:$0xff] (!%p358_p10)  ;;  %v992_v31 = vld [vmem:[%s3505_s8 + $0x18] sm:$0xff] (!%p358_p10)  ;;  %v816_v36 = vld [vmem:[%s3503_s6] sm:$0xff] (!%p358_p10)  ;;  %s399_s23 = scalar_lea.vmem (!%p358_p10), [#allocation3], %s2843_s12  ;;  %p2255_p0 = scmp.ne.s32.totalorder (!%p358_p10), %s2641_s20, 0 }
  0x1b   : > { %v418_v0 = vld [vmem:[%s3520_s2] sm:$0xff] (!%p358_p10)  ;;  %v419_v3 = vld [vmem:[%s3520_s2 + $0x8] sm:$0xff] (!%p358_p10)  ;;  %v420_v6 = vld [vmem:[%s3520_s2 + $0x10] sm:$0xff] (!%p358_p10) }
  0x1c   : > { %480 = vperm.xlu1 %2512, %v418_v0   ;;  %v422_v10 = vld [vmem:[%s3520_s2 + $0x20] sm:$0xff]  ;;  %v421_v13 = vld [vmem:[%s3520_s2 + $0x18] sm:$0xff]  ;;  %v424_v14 = vld [vmem:[%s3520_s2 + $0x30] sm:$0xff]  ;;  %s403_s16 = scalar_select %p402_p13, %s2641_s20, 1 }
  0x1d   : > { %v410_v1 = vld [vmem:[%s3521_s1] sm:$0xff]  ;;  %v411_v4 = vld [vmem:[%s3521_s1 + $0x8] sm:$0xff]  ;;  %v413_v5 = vld [vmem:[%s3521_s1 + $0x18] sm:$0xff]  ;;  %vm1851_vm1 = vcmask (!%p2255_p0), 7168  }
  0x1e   : > { %428 = vperm.xlu0 %2511, %v410_v1   ;;  %v412_v8 = vld [vmem:[%s3521_s1 + $0x10] sm:$0xff]  ;;  %v415_v9 = vld [vmem:[%s3521_s1 + $0x28] sm:$0xff]  ;;  %v417_v12 = vld [vmem:[%s3521_s1 + $0x38] sm:$0xff] }
  0x1f   : > { %v414_v15 = vld [vmem:[%s3521_s1 + $0x20] sm:$0xff]  ;;  %v416_v16 = vld [vmem:[%s3521_s1 + $0x30] sm:$0xff]  ;;  %v423_v17 = vld [vmem:[%s3520_s2 + $0x28] sm:$0xff] }
  0x20   : > { %485 = vperm.xlu1 %2512, %v419_v3   ;;  %v425_v20 = vld [vmem:[%s3520_s2 + $0x38] sm:$0xff]  ;;  %v994_v33 = vld [vmem:[%s3505_s8 + $0x28] sm:$0xff]  ;;  %v818_v38 = vld [vmem:[%s3503_s6 + $0x10] sm:$0xff]  ;;  %s401_s2 = scalar_select %p400_p12, %s2645_s21, 1 }
  0x21   : > { %v996_v35 = vld [vmem:[%s3505_s8 + $0x38] sm:$0xff]  ;;  %v998_v37 = vld [vmem:[%s3505_s8 + $0x48] sm:$0xff]  ;;  %v820_v40 = vld [vmem:[%s3503_s6 + $0x20] sm:$0xff] }
  0x22   : > { %433 = vperm.xlu0 %2511, %v411_v4   ;;  %v1000_v39 = vld [vmem:[%s3505_s8 + $0x58] sm:$0xff]  ;;  %v1002_v41 = vld [vmem:[%s3505_s8 + $0x68] sm:$0xff]  ;;  %v822_v42 = vld [vmem:[%s3503_s6 + $0x30] sm:$0xff]  ;;  %s2205_s25 = sshll.u32 %s401_s2, 1 }
  0x23   : > { %v1004_v43 = vld [vmem:[%s3505_s8 + $0x78] sm:$0xff]  ;;  %v989_v44 = vld [vmem:[%s3505_s8] sm:$0xff]  ;;  %v1303_v45 = vld [vmem:[%s3507_s10 + $0x8] sm:$0xff]  ;;  %s405_s1 = sadd.s32 %s2205_s25, %s403_s16 }
  0x24   : > { %2513 = vset.pattern.permute.xlu1 %v2660_v7  ;;  %v991_v48 = vld [vmem:[%s3505_s8 + $0x10] sm:$0xff]  ;;  %v1305_v49 = vld [vmem:[%s3507_s10 + $0x18] sm:$0xff]  ;;  %v993_v52 = vld [vmem:[%s3505_s8 + $0x20] sm:$0xff]  ;;  %s2206_s2 = sshll.u32 %s405_s1, 2 }
  0x25   : > { %531 = vperm.xlu1 %2513, %v411_v4   ;;  %v1307_v53 = vld [vmem:[%s3507_s10 + $0x28] sm:$0xff]  ;;  %v995_v56 = vld [vmem:[%s3505_s8 + $0x30] sm:$0xff]  ;;  %v1309_v57 = vld [vmem:[%s3507_s10 + $0x38] sm:$0xff]  ;;  %s407_s28 = scalar_lea.vmem %s3522_s0, %s2206_s2 }
  0x26   : > { %443 = vperm.xlu0 %2511, %v413_v5   ;;  %v997_v59 = vld [vmem:[%s3505_s8 + $0x40] sm:$0xff]  ;;  %v1311_v62 = vld [vmem:[%s3507_s10 + $0x48] sm:$0xff]  ;;  %v999_v0 = vld [vmem:[%s3505_s8 + $0x50] sm:$0xff] }
  0x27   : > { %v1313_v3 = vld [vmem:[%s3507_s10 + $0x58] sm:$0xff] }
  0x29   : > { %2514 = vset.pattern.permute.xlu1 %v2659_v2 }
  0x2a   : > { %490 = vperm.xlu0 %2511, %v420_v6   ;;  %438 = vperm.xlu1 %2514, %v412_v8  }
  0x2e   : > { %453 = vperm.xlu0 %2511, %v415_v9   ;;  %2515 = vset.pattern.permute.xlu1 %v2661_v11 }
  0x2f   : > { %579 = vperm.xlu1 %2515, %v410_v1  }
  0x32   : > { %500 = vperm.xlu0 %2511, %v422_v10   ;;  %v1315_v10 = vld [vmem:[%s3507_s10 + $0x68] sm:$0xff] }
  0x33   : > { %583 = vperm.xlu1 %2515, %v411_v4  }
  0x36   : > { %463 = vperm.xlu0 %2511, %v417_v12  }
  0x37   : > { %2516 = vset.pattern.permute.xlu1 %v2659_v2 }
  0x38   : > { %495 = vperm.xlu1 %2516, %v421_v13  }
  0x3a   : > { %510 = vperm.xlu0 %2511, %v424_v14  }
  0x3c   : > { %2517 = vset.pattern.permute.xlu1 %v2660_v7 }
  0x3d   : > { %539 = vperm.xlu1 %2517, %v413_v5  }
  0x3e   : > { %2524 = vset.pattern.permute.xlu0 %v2660_v7 }
  0x3f   : > { %527 = vperm.xlu0 %2524, %v410_v1   ;;  %v2978_v1 = vshrl.u32 %v466_v60, 7 }
  0x41   : > { %2518 = vset.pattern.permute.xlu1 %v2659_v2  ;;  %v468_v6 = vsub.s32 0, %v2978_v1 }
  0x42   : > { %448 = vperm.xlu1 %2518, %v414_v15  }
  0x43   : > { %535 = vperm.xlu0 %2524, %v412_v8  }
  0x46   : > { %2519 = vset.pattern.permute.xlu1 %v2661_v11 }
  0x47   : > { %543 = vperm.xlu0 %2524, %v414_v15   ;;  %587 = vperm.xlu1 %2519, %v412_v8   ;;  %v409_v8 = vld [vmem:[%s407_s28] sm:$0x7] }
  0x48   : > { %v3001_v13 = vrot.slane %v409_v8, %v468_v6 }
  0x4b   : > { %551 = vperm.xlu0 %2524, %v416_v16   ;;  %591 = vperm.xlu1 %2519, %v413_v5   ;;  %v1001_v5 = vld [vmem:[%s3505_s8 + $0x60] sm:$0xff] }
  0x4f   : > { %2528 = vset.pattern.permute.xlu0 %v2661_v11  ;;  %2520 = vset.pattern.permute.xlu1 %v2659_v2 }
  0x50   : > { %607 = vperm.xlu0 %2528, %v417_v12   ;;  %505 = vperm.xlu1 %2520, %v423_v17  }
  0x54   : > { %2530 = vset.pattern.permute.xlu0 %v2659_v2  ;;  %2521 = vset.pattern.permute.xlu1 %v2660_v7 }
  0x55   : > { %547 = vperm.xlu1 %2521, %v415_v9   ;;  %670 = vperm.xlu0 %2530, %v652_v18  }
  0x59   : > { %2522 = vset.pattern.permute.xlu1 %v2659_v2  ;;  %685 = vperm.xlu0 %2530, %v655_v19  }
  0x5a   : > { %458 = vperm.xlu1 %2522, %v416_v16  }
  0x5d   : > { %695 = vperm.xlu0 %2530, %v657_v21  }
  0x5e   : > { %2523 = vset.pattern.permute.xlu1 %v2661_v11 }
  0x5f   : > { %595 = vperm.xlu1 %2523, %v414_v15   ;;  %v612_v15 = vsub.s32 2, %v2978_v1 }
  0x61   : > { %831 = vperm.xlu0 %2530, %v817_v22  }
  0x63   : > { %599 = vperm.xlu1 %2523, %v415_v9  }
  0x65   : > { %841 = vperm.xlu0 %2530, %v819_v23   ;;  %v3017_v23 = vrot.slane %v409_v8, %v612_v15  ;;  %v1316_v15 = vld [vmem:[%s3507_s10 + $0x70] sm:$0xff] }
  0x67   : > { %2525 = vset.pattern.permute.xlu1 %v2659_v2 }
  0x68   : > { %515 = vperm.xlu1 %2525, %v425_v20   ;;  %v1302_v20 = vld [vmem:[%s3507_s10] sm:$0xff] }
  0x69   : > { %851 = vperm.xlu0 %2530, %v821_v25  }
  0x6c   : > { %2526 = vset.pattern.permute.xlu1 %v2660_v7  ;;  %v560_v7 = vsub.s32 1, %v2978_v1 }
  0x6d   : > { %555 = vperm.xlu1 %2526, %v417_v12   ;;  %861 = vperm.xlu0 %2530, %v823_v26   ;;  %v1003_v12 = vld [vmem:[%s3505_s8 + $0x70] sm:$0xff] }
  0x6e   : > { %v3003_v14 = vrot.slane %v409_v8, %v560_v7  ;;  %v1314_v8 = vld [vmem:[%s3507_s10 + $0x60] sm:$0xff] }
  0x71   : > { %2527 = vset.pattern.permute.xlu1 %v2661_v11  ;;  %1012 = vperm.xlu0 %2530, %v990_v29   ;;  %v1304_v29 = vld [vmem:[%s3507_s10 + $0x10] sm:$0xff] }
  0x72   : > { %603 = vperm.xlu1 %2527, %v416_v16   ;;  %v1317_v16 = vld [vmem:[%s3507_s10 + $0x78] sm:$0xff] }
  0x75   : > { %1022 = vperm.xlu0 %2530, %v992_v31  }
  0x76   : > { %2529 = vset.pattern.permute.xlu1 %v2659_v2 }
  0x77   : > { %660 = vperm.xlu1 %2529, %v650_v24   ;;  %v1319_v24 = vld [vmem:[%s3507_s10 + $0x88] sm:$0xff] }
  0x79   : > { %1032 = vperm.xlu0 %2530, %v994_v33   ;;  %v1321_v33 = vld [vmem:[%s3507_s10 + $0x98] sm:$0xff] }
  0x7b   : > { %665 = vperm.xlu1 %2529, %v651_v27  }
  0x7d   : > { %1042 = vperm.xlu0 %2530, %v996_v35  }
  0x7f   : > { %675 = vperm.xlu1 %2529, %v653_v30  }
  0x81   : > { %1052 = vperm.xlu0 %2530, %v998_v37   ;;  %v1306_v37 = vld [vmem:[%s3507_s10 + $0x20] sm:$0xff] }
  0x83   : > { %680 = vperm.xlu1 %2529, %v654_v32  }
  0x85   : > { %1062 = vperm.xlu0 %2530, %v1000_v39  }
  0x87   : > { %690 = vperm.xlu1 %2529, %v656_v34  }
  0x89   : > { %1072 = vperm.xlu0 %2530, %v1002_v41   ;;  %v1323_v41 = vld [vmem:[%s3507_s10 + $0xa8] sm:$0xff] }
  0x8b   : > { %826 = vperm.xlu1 %2529, %v816_v36  }
  0x8d   : > { %1082 = vperm.xlu0 %2530, %v1004_v43  }
  0x8f   : > { %836 = vperm.xlu1 %2529, %v818_v38  }
  0x91   : > { %1341 = vperm.xlu0 %2530, %v1303_v45   ;;  %v1308_v45 = vld [vmem:[%s3507_s10 + $0x30] sm:$0xff] }
  0x93   : > { %846 = vperm.xlu1 %2529, %v820_v40  }
  0x95   : > { %1351 = vperm.xlu0 %2530, %v1305_v49  }
  0x97   : > { %856 = vperm.xlu1 %2529, %v822_v42  }
  0x99   : > { %1361 = vperm.xlu0 %2530, %v1307_v53  }
  0x9b   : > { %v2938_v46 = vpop.permute.xlu1 %480  ;;  %1007 = vperm.xlu1 %2529, %v989_v44  }
  0x9d   : > { %v429_v47 = vpop.permute.xlu0 %428  ;;  %1371 = vperm.xlu0 %2530, %v1309_v57  }
  0x9e   : > { %v470_v21 = vmul.f32 %v3001_v13, %v429_v47 }
  0x9f   : > { %v486_v50 = vpop.permute.xlu1 %485  ;;  %1017 = vperm.xlu1 %2529, %v991_v48  }
  0xa0   : > { %v518_v30 = vadd.f32 %v2938_v46, %v470_v21 }
  0xa1   : > { %v434_v51 = vpop.permute.xlu0 %433  ;;  %1381 = vperm.xlu0 %2530, %v1311_v62  }
  0xa2   : > { %v471_v17 = vmul.f32 %v3001_v13, %v434_v51 }
  0xa3   : > { %1027 = vperm.xlu1 %2529, %v993_v52  }
  0xa4   : > { %v532_v55 = vpop.permute.xlu1 %531  ;;  %v519_v25 = vadd.f32 %v486_v50, %v471_v17  ;;  %v1325_v50 = vld [vmem:[%s3507_s10 + $0xb8] sm:$0xff]  ;;  %v1318_v17 = vld [vmem:[%s3507_s10 + $0x80] sm:$0xff] }
  0xa5   : > { %v2955_v54 = vpop.permute.xlu0 %443  ;;  %1391 = vperm.xlu0 %2530, %v1313_v3   ;;  %v563_v22 = vmul.f32 %v3003_v14, %v532_v55  ;;  %v1329_v3 = vld [vmem:[%s3507_s10 + $0xd8] sm:$0xff] }
  0xa6   : > { %v473_v46 = vmul.f32 %v3001_v13, %v2955_v54  ;;  %v1310_v54 = vld [vmem:[%s3507_s10 + $0x40] sm:$0xff] }
  0xa7   : > { %1037 = vperm.xlu1 %2529, %v995_v56   ;;  %v571_v31 = vadd.f32 %v563_v22, %v519_v25  ;;  %v1320_v22 = vld [vmem:[%s3507_s10 + $0x90] sm:$0xff] }
  0xa9   : > { %v2964_v58 = vpop.permute.xlu0 %490  ;;  %v439_v61 = vpop.permute.xlu1 %438  ;;  %1401 = vperm.xlu0 %2530, %v1315_v10   ;;  %v1331_v10 = vld [vmem:[%s3507_s10 + $0xe8] sm:$0xff] }
  0xaa   : > { %v472_v42 = vmul.f32 %v3001_v13, %v439_v61 }
  0xab   : > { %1047 = vperm.xlu1 %2529, %v997_v59   ;;  %v1327_v59 = vld [vmem:[%s3507_s10 + $0xc8] sm:$0xff] }
  0xac   : > { %v520_v51 = vadd.f32 %v2964_v58, %v472_v42 }
  0xad   : > { %v2972_v63 = vpop.permute.xlu0 %453  ;;  %1411 = vperm.xlu0 %2530, %v1317_v16   ;;  %v1333_v16 = vld [vmem:[%s3507_s10 + $0xf8] sm:$0xff] }
  0xae   : > { %v580_v2 = vpop.permute.xlu1 %579 }
  0xaf   : > { %1057 = vperm.xlu1 %2529, %v999_v0   ;;  %v614_v34 = vmul.f32 %v3017_v23, %v580_v2  ;;  %v1312_v0 = vld [vmem:[%s3507_s10 + $0x50] sm:$0xff] }
  0xb1   : > { %v2986_v4 = vpop.permute.xlu0 %500  ;;  %1421 = vperm.xlu0 %2530, %v1319_v24  }
  0xb2   : > { %v584_v9 = vpop.permute.xlu1 %583 }
  0xb3   : > { %1067 = vperm.xlu1 %2529, %v1001_v5   ;;  %v615_v26 = vmul.f32 %v3017_v23, %v584_v9 }
  0xb5   : > { %v2996_v11 = vpop.permute.xlu0 %463  ;;  %v623_v35 = vadd.f32 %v615_v26, %v571_v31  ;;  %1431 = vperm.xlu0 %2530, %v1321_v33  }
  0xb7   : > { %v496_v18 = vpop.permute.xlu1 %495  ;;  %1077 = vperm.xlu1 %2529, %v1003_v12   ;;  %v631_v44 = vmax.f32 %v623_v35, 0.0 }
  0xb8   : > { %v521_v55 = vadd.f32 %v496_v18, %v473_v46 }
  0xb9   : > { %v3010_v19 = vpop.permute.xlu0 %510  ;;  %1441 = vperm.xlu0 %2530, %v1323_v41   ;;  %v1326_v41 = vld [vmem:[%s3507_s10 + $0xc0] sm:$0xff] }
  0xbb   : > { %1336 = vperm.xlu1 %2529, %v1302_v20  }
  0xbc   : > { %v540_v27 = vpop.permute.xlu1 %539 }
  0xbd   : > { %v565_v52 = vmul.f32 %v3003_v14, %v540_v27  ;;  %1451 = vperm.xlu0 %2530, %v1325_v50   ;;  %v475_v27 = vmul.f32 %v3001_v13, %v2972_v63  ;;  %v1324_v63 = vld [vmem:[%s3507_s10 + $0xb0] sm:$0xff] }
  0xbe   : > { %v528_v28 = vpop.permute.xlu0 %527 }
  0xbf   : > { %v562_v32 = vmul.f32 %v3003_v14, %v528_v28  ;;  %1346 = vperm.xlu1 %2529, %v1304_v29   ;;  %v573_v58 = vadd.f32 %v565_v52, %v521_v55 }
  0xc1   : > { %v570_v36 = vadd.f32 %v562_v32, %v518_v30  ;;  %v449_v38 = vpop.permute.xlu1 %448  ;;  %1461 = vperm.xlu0 %2530, %v1327_v59   ;;  %v1322_v30 = vld [vmem:[%s3507_s10 + $0xa0] sm:$0xff] }
  0xc2   : > { %v536_v40 = vpop.permute.xlu0 %535  ;;  %v474_v18 = vmul.f32 %v3001_v13, %v449_v38 }
  0xc3   : > { %v622_v39 = vadd.f32 %v614_v34, %v570_v36  ;;  %1356 = vperm.xlu1 %2529, %v1306_v37   ;;  %v564_v47 = vmul.f32 %v3003_v14, %v536_v40 }
  0xc4   : > { %v522_v24 = vadd.f32 %v2986_v4, %v474_v18 }
  0xc5   : > { %v630_v43 = vmax.f32 %v622_v39, 0.0  ;;  %v572_v56 = vadd.f32 %v564_v47, %v520_v51  ;;  %1471 = vperm.xlu0 %2530, %v1329_v3   ;;  %v1328_v47 = vld [vmem:[%s3507_s10 + $0xd0] sm:$0xff] }
  0xc6   : > { %v588_v49 = vpop.permute.xlu1 %587  ;;  %v544_v21 = vpop.permute.xlu0 %543 }
  0xc7   : > { %v646_v48 = vpack.c.bf16 %v631_v44, %v630_v43  ;;  %v616_v53 = vmul.f32 %v3017_v23, %v588_v49  ;;  %1366 = vperm.xlu1 %2529, %v1308_v45   ;;  %v566_v25 = vmul.f32 %v3003_v14, %v544_v21  ;;  %v477_v44 = vmul.f32 %v3001_v13, %v2996_v11  ;;  %v1330_v11 = vld [vmem:[%s3507_s10 + $0xe0] sm:$0xff] }
  0xc9   : > { %2316 = vmatprep.subr.bf16.mxu0 %v646_v48  ;;  %v624_v61 = vadd.f32 %v616_v53, %v572_v56  ;;  %1481 = vperm.xlu0 %2530, %v1331_v10   ;;  %v574_v31 = vadd.f32 %v566_v25, %v522_v24 }
  0xca   : > { %2317 = vmatpush3.bf16.msra.mxu0 %v646_v48  ;;  %v592_v57 = vpop.permute.xlu1 %591  ;;  %v552_v37 = vpop.permute.xlu0 %551 }
  0xcb   : > { %v617_v62 = vmul.f32 %v3017_v23, %v592_v57  ;;  %1376 = vperm.xlu1 %2529, %v1310_v54   ;;  %v632_v5 = vmax.f32 %v624_v61, 0.0  ;;  %v568_v51 = vmul.f32 %v3003_v14, %v552_v37  ;;  %v2532_v61 = vld [vmem:[%s3500_s3 + $0x8] sm:$0xff]  }
  0xcd   : > { %v625_v2 = vadd.f32 %v617_v62, %v573_v58  ;;  %1491 = vperm.xlu0 %2530, %v1333_v16   ;;  %v2534_v62 = vld [vmem:[%s3500_s3 + $0x18] sm:$0xff]  }
  0xcf   : > { %v633_v6 = vmax.f32 %v625_v2, 0.0  ;;  %v506_v7 = vpop.permute.xlu1 %505  ;;  %1386 = vperm.xlu1 %2529, %v1312_v0   ;;  %v608_v45 = vpop.permute.xlu0 %607  ;;  %v2535_v0 = vld [vmem:[%s3502_s5] sm:$0xff]  }
  0xd0   : > { %v523_v32 = vadd.f32 %v506_v7, %v475_v27  ;;  %v621_v52 = vmul.f32 %v3017_v23, %v608_v45  ;;  %2340 = vmatprep.mubr.msk.bf16.mxu1 %vm718_vm0, %v2535_v0  ;;  %v2539_v45 = vld [vmem:[%s3504_s7] sm:$0xff]  }
  0xd1   : > { %v647_v9 = vpack.c.bf16 %v633_v6, %v632_v5 }
  0xd3   : > { %2318 = vmatprep.subr.bf16.mxu0 %v647_v9  ;;  %1396 = vperm.xlu1 %2529, %v1314_v8  }
  0xd4   : > { %v548_v12 = vpop.permute.xlu1 %547  ;;  %2319 = vmatpush3.bf16.msra.mxu0 %v647_v9  ;;  %v671_v6 = vpop.permute.xlu0 %670 }
  0xd5   : > { %v567_v28 = vmul.f32 %v3003_v14, %v548_v12 }
  0xd7   : > { %1406 = vperm.xlu1 %2529, %v1316_v15   ;;  %v575_v34 = vadd.f32 %v567_v28, %v523_v32 }
  0xd8   : > { %v686_v18 = vpop.permute.xlu0 %685 }
  0xd9   : > { %v459_v20 = vpop.permute.xlu1 %458 }
  0xda   : > { %v476_v43 = vmul.f32 %v3001_v13, %v459_v20 }
  0xdb   : > { %1416 = vperm.xlu1 %2529, %v1318_v17  }
  0xdc   : > { %v524_v50 = vadd.f32 %v3010_v19, %v476_v43  ;;  %v1332_v19 = vld [vmem:[%s3507_s10 + $0xf0] sm:$0xff]  ;;  %v696_v32 = vpop.permute.xlu0 %695 }
  0xdd   : > { %v2537_v43 = vld [vmem:[%s3502_s5 + $0x10] sm:$0xff]  }
  0xde   : > { %v596_v26 = vpop.permute.xlu1 %595  ;;  %v576_v54 = vadd.f32 %v568_v51, %v524_v50 }
  0xdf   : > { %v618_v29 = vmul.f32 %v3017_v23, %v596_v26  ;;  %1426 = vperm.xlu1 %2529, %v1320_v22  }
  0xe1   : > { %v626_v4 = vadd.f32 %v618_v29, %v574_v31 }
  0xe2   : > { %v600_v33 = vpop.permute.xlu1 %599 }
  0xe3   : > { %v619_v35 = vmul.f32 %v3017_v23, %v600_v33  ;;  %1436 = vperm.xlu1 %2529, %v1322_v30   ;;  %v634_v38 = vmax.f32 %v626_v4, 0.0 }
  0xe5   : > { %v627_v36 = vadd.f32 %v619_v35, %v575_v34 }
  0xe7   : > { %v635_v39 = vmax.f32 %v627_v36, 0.0  ;;  %v516_v40 = vpop.permute.xlu1 %515  ;;  %1446 = vperm.xlu1 %2529, %v1324_v63  }
  0xe8   : > { %v525_v48 = vadd.f32 %v516_v40, %v477_v44  ;;  %v2538_v44 = vld [vmem:[%s3502_s5 + $0x18] sm:$0xff]  }
  0xe9   : > { %v648_v42 = vpack.c.bf16 %v635_v39, %v634_v38 }
  0xeb   : > { %2320 = vmatprep.subr.bf16.mxu0 %v648_v42  ;;  %1456 = vperm.xlu1 %2529, %v1326_v41  }
  0xec   : > { %v556_v46 = vpop.permute.xlu1 %555  ;;  %2321 = vmatpush3.bf16.msra.mxu0 %v648_v42  ;;  %v2536_v42 = vld [vmem:[%s3502_s5 + $0x8] sm:$0xff]  }
  0xed   : > { %v569_v49 = vmul.f32 %v3003_v14, %v556_v46 }
  0xef   : > { %v577_v53 = vadd.f32 %v569_v49, %v525_v48  ;;  %1466 = vperm.xlu1 %2529, %v1328_v47   ;;  %v832_v47 = vpop.permute.xlu0 %831 }
  0xf1   : > { %v604_v13 = vpop.permute.xlu1 %603  ;;  %v629_v55 = vadd.f32 %v621_v52, %v577_v53 }
  0xf2   : > { %v620_v56 = vmul.f32 %v3017_v23, %v604_v13  ;;  %v2533_v23 = vld [vmem:[%s3500_s3 + $0x10] sm:$0xff]  }
  0xf3   : > { %1476 = vperm.xlu1 %2529, %v1330_v11   ;;  %v637_v14 = vmax.f32 %v629_v55, 0.0  ;;  %v842_v49 = vpop.permute.xlu0 %841 }
  0xf4   : > { %v628_v57 = vadd.f32 %v620_v56, %v576_v54 }
  0xf6   : > { %v636_v59 = vmax.f32 %v628_v57, 0.0  ;;  %v661_v2 = vpop.permute.xlu1 %660 }
  0xf7   : > { %1486 = vperm.xlu1 %2529, %v1332_v19   ;;  %v852_v56 = vpop.permute.xlu0 %851 }
  0xf8   : > { %v649_v58 = vpack.c.bf16 %v637_v14, %v636_v59 }
  0xfa   : > { %2322 = vmatprep.subr.bf16.mxu0 %v649_v58  ;;  %v666_v3 = vpop.permute.xlu1 %665 }
  0xfb   : > { %2323 = vmatpush3.bf16.msra.mxu0 %v649_v58 }
  0xfe   : > { %2325 = vmatmul.mubr.msk.bf16.vlgmr.msra.gmra.mrb[0].mxu0 %vm718_vm0, %v2532_v61  ;;  %v676_v5 = vpop.permute.xlu1 %675 }
  0xff   : > { %2328 = vmatprep.mubr.msk.bf16.mxu0 %vm718_vm0, %v2533_v23 }
 0x102   : > { %v681_v10 = vpop.permute.xlu1 %680 }
 0x106   : > { %2329 = vmatmul.mubr.msk.bf16.gmra.mrb[4].mxu0 %vm718_vm0, %v2534_v62  ;;  %v691_v27 = vpop.permute.xlu1 %690 }
 0x107   : > { %2356 = vmatprep.mubr.msk.bf16.mxu0 %vm718_vm0, %v2539_v45 }
 0x10a   : > { %v827_v46 = vpop.permute.xlu1 %826 }
 0x10e   : > { %v837_v48 = vpop.permute.xlu1 %836 }
 0x112   : > { %v847_v53 = vpop.permute.xlu1 %846 }
 0x116   : > { %v857_v23 = vpop.permute.xlu1 %856 }
 0x1d1   : > { %v2326_v7 = vpop.f32.mrb[0].mxu0 }
 0x1d2   : > { %v774_v8 = vadd.f32 %v2326_v7, %v671_v6  ;;  %v765_v9 = vpop.f32.mrb[1].mxu0 }
 0x1d3   : > { %v766_v12 = vadd.f32 %v765_v9, %v661_v2  ;;  %v2327_v15 = vpop.f32.mrb[2].mxu0 }
 0x1d4   : > { %v777_v16 = vadd.f32 %v2327_v15, %v676_v5  ;;  %v768_v17 = vpop.f32.mrb[3].mxu0  ;;  %v798_v21 = vmax.f32 %v774_v8, 0.0  ;;  %v862_v5 = vpop.permute.xlu0 %861 }
 0x1d5   : > { %v769_v20 = vadd.f32 %v768_v17, %v666_v3  ;;  %v796_v24 = vmax.f32 %v766_v12, 0.0 }
 0x1d6   : > { %v799_v22 = vmax.f32 %v777_v16, 0.0 }
 0x1d7   : > { %v797_v25 = vmax.f32 %v769_v20, 0.0 }
 0x1d8   : > { %v813_v26 = vpack.c.bf16 %v799_v22, %v798_v21  ;;  %v2540_v21 = vld [vmem:[%s3504_s7 + $0x8] sm:$0xff]   ;;  %v2541_v22 = vld [vmem:[%s3504_s7 + $0x10] sm:$0xff]  }
 0x1d9   : > { %v2330_v28 = vpop.f32.mrb[4].mxu0  ;;  %v812_v29 = vpack.c.bf16 %v797_v25, %v796_v24  ;;  %v2542_v24 = vld [vmem:[%s3504_s7 + $0x18] sm:$0xff]   ;;  %v2543_v25 = vld [vmem:[%s3504_s7 + $0x20] sm:$0xff]  }
 0x1da   : > { %v790_v30 = vadd.f32 %v2330_v28, %v691_v27  ;;  %v781_v31 = vpop.f32.mrb[5].mxu0  ;;  %v2545_v27 = vld [vmem:[%s3504_s7 + $0x30] sm:$0xff]   ;;  %v2546_v28 = vld [vmem:[%s3504_s7 + $0x38] sm:$0xff]  }
 0x1db   : > { %v782_v33 = vadd.f32 %v781_v31, %v681_v10  ;;  %v2331_v34 = vpop.f32.mrb[6].mxu0  ;;  %2332 = vmatprep.subr.bf16.mxu1 %v812_v29  ;;  %v1008_v31 = vpop.permute.xlu1 %1007 }
 0x1dc   : > { %v793_v4 = vadd.f32 %v2331_v34, %v696_v32  ;;  %v784_v35 = vpop.f32.mrb[7].mxu0  ;;  %2333 = vmatpush3.bf16.msra.mxu1 %v812_v29  ;;  %v802_v36 = vmax.f32 %v790_v30, 0.0  ;;  %v2547_v29 = vld [vmem:[%s3506_s9] sm:$0xff]   ;;  %v2548_v30 = vld [vmem:[%s3506_s9 + $0x30] sm:$0xff]   ;;  %v1013_v32 = vpop.permute.xlu0 %1012 }
 0x1dd   : > { %v785_v63 = vadd.f32 %v784_v35, %v686_v18  ;;  %2334 = vmatprep.subr.bf16.mxu1 %v813_v26  ;;  %v800_v38 = vmax.f32 %v782_v33, 0.0 }
 0x1de   : > { %v803_v37 = vmax.f32 %v793_v4, 0.0 }
 0x1df   : > { %v801_v39 = vmax.f32 %v785_v63, 0.0  ;;  %v1018_v33 = vpop.permute.xlu1 %1017 }
 0x1e0   : > { %v815_v40 = vpack.c.bf16 %v803_v37, %v802_v36  ;;  %2335 = vmatpush3.bf16.msra.mxu1 %v813_v26  ;;  %v2544_v26 = vld [vmem:[%s3504_s7 + $0x28] sm:$0xff]   ;;  %v1023_v34 = vpop.permute.xlu0 %1022 }
 0x1e1   : > { %v814_v41 = vpack.c.bf16 %v801_v39, %v800_v38 }
 0x1e3   : > { %2336 = vmatprep.subr.bf16.mxu1 %v814_v41  ;;  %v1028_v4 = vpop.permute.xlu1 %1027 }
 0x1e4   : > { %2337 = vmatpush3.bf16.msra.mxu1 %v814_v41  ;;  %v1033_v35 = vpop.permute.xlu0 %1032 }
 0x1e5   : > { %2338 = vmatprep.subr.bf16.mxu1 %v815_v40 }
 0x1e7   : > { %v1038_v63 = vpop.permute.xlu1 %1037 }
 0x1e8   : > { %2339 = vmatpush3.bf16.msra.mxu1 %v815_v40  ;;  %v1043_v39 = vpop.permute.xlu0 %1042 }
 0x1eb   : > { %2341 = vmatmul.mubr.msk.bf16.vlgmr.msra.gmra.mrb[0].mxu1 %vm718_vm0, %v2536_v42 }
 0x1ec   : > { %2344 = vmatprep.mubr.msk.bf16.mxu1 %vm718_vm0, %v2537_v43 }
 0x1f3   : > { %2345 = vmatmul.mubr.msk.bf16.gmra.mrb[4].mxu1 %vm718_vm0, %v2538_v44 }
 0x1f4   : > { %2400 = vmatprep.mubr.bf16.mxu1 %v2548_v30 }
 0x2be   : > { %v2342_v50 = vpop.f32.mrb[0].mxu1 }
 0x2bf   : > { %v939_v51 = vadd.f32 %v2342_v50, %v837_v48  ;;  %v930_v52 = vpop.f32.mrb[1].mxu1 }
 0x2c0   : > { %v931_v11 = vadd.f32 %v930_v52, %v827_v46  ;;  %v2343_v13 = vpop.f32.mrb[2].mxu1 }
 0x2c1   : > { %v942_v54 = vadd.f32 %v2343_v13, %v842_v49  ;;  %v933_v55 = vpop.f32.mrb[3].mxu1  ;;  %v963_v19 = vmax.f32 %v939_v51, 0.0  ;;  %v1053_v51 = vpop.permute.xlu0 %1052 }
 0x2c2   : > { %v934_v57 = vadd.f32 %v933_v55, %v832_v47  ;;  %v961_v59 = vmax.f32 %v931_v11, 0.0  ;;  %v1048_v47 = vpop.permute.xlu1 %1047 }
 0x2c3   : > { %v964_v14 = vmax.f32 %v942_v54, 0.0 }
 0x2c4   : > { %v962_v58 = vmax.f32 %v934_v57, 0.0 }
 0x2c5   : > { %v986_v61 = vpack.c.bf16 %v964_v14, %v963_v19 }
 0x2c6   : > { %v985_v62 = vpack.c.bf16 %v962_v58, %v961_v59  ;;  %v2346_v0 = vpop.f32.mrb[4].mxu1  ;;  %v1058_v19 = vpop.permute.xlu1 %1057 }
 0x2c7   : > { %v955_v2 = vadd.f32 %v2346_v0, %v857_v23  ;;  %v946_v3 = vpop.f32.mrb[5].mxu1 }
 0x2c8   : > { %v947_v6 = vadd.f32 %v946_v3, %v847_v53  ;;  %v2347_v7 = vpop.f32.mrb[6].mxu1  ;;  %2348 = vmatprep.subr.bf16.mxu0 %v985_v62 }
 0x2c9   : > { %v958_v8 = vadd.f32 %v2347_v7, %v862_v5  ;;  %v949_v9 = vpop.f32.mrb[7].mxu1  ;;  %2349 = vmatpush3.bf16.msra.mxu0 %v985_v62  ;;  %v967_v12 = vmax.f32 %v955_v2, 0.0 }
 0x2ca   : > { %v950_v10 = vadd.f32 %v949_v9, %v852_v56  ;;  %2350 = vmatprep.subr.bf16.mxu0 %v986_v61  ;;  %v965_v16 = vmax.f32 %v947_v6, 0.0  ;;  %v1068_v7 = vpop.permute.xlu1 %1067 }
 0x2cb   : > { %v968_v15 = vmax.f32 %v958_v8, 0.0 }
 0x2cc   : > { %v966_v17 = vmax.f32 %v950_v10, 0.0 }
 0x2cd   : > { %v988_v18 = vpack.c.bf16 %v968_v15, %v967_v12  ;;  %2351 = vmatpush3.bf16.msra.mxu0 %v986_v61  ;;  %v1063_v61 = vpop.permute.xlu0 %1062 }
 0x2ce   : > { %v987_v20 = vpack.c.bf16 %v966_v17, %v965_v16 }
 0x2d0   : > { %2352 = vmatprep.subr.bf16.mxu0 %v987_v20 }
 0x2d1   : > { %2353 = vmatpush3.bf16.msra.mxu0 %v987_v20  ;;  %v1073_v15 = vpop.permute.xlu0 %1072 }
 0x2d2   : > { %2354 = vmatprep.subr.bf16.mxu0 %v988_v18 }
 0x2d5   : > { %2355 = vmatpush3.bf16.msra.mxu0 %v988_v18 }
 0x2d8   : > { %2357 = vmatmul.mubr.msk.bf16.vlgmr.msra.gmra.mrb[8].mxu0 %vm718_vm0, %v2540_v21 }
 0x2d9   : > { %2360 = vmatprep.mubr.msk.bf16.mxu0 %vm718_vm0, %v2541_v22 }
 0x2e0   : > { %2361 = vmatmul.mubr.msk.bf16.gmra.mrb[12].mxu0 %vm718_vm0, %v2542_v24  ;;  %v1078_v24 = vpop.permute.xlu1 %1077 }
 0x2e1   : > { %2364 = vmatprep.mubr.msk.bf16.mxu0 %vm718_vm0, %v2543_v25 }
 0x2e8   : > { %2365 = vmatmul.mubr.msk.bf16.gmra.mrb[16].mxu0 %vm718_vm0, %v2544_v26 }
 0x2e9   : > { %2368 = vmatprep.mubr.msk.bf16.mxu0 %vm718_vm0, %v2545_v27 }
 0x2f0   : > { %2369 = vmatmul.mubr.msk.bf16.gmra.mrb[20].mxu0 %vm718_vm0, %v2546_v28 }
 0x2f1   : > { %2388 = vmatprep.mubr.bf16.mxu0 %v2547_v29  ;;  %v1083_v29 = vpop.permute.xlu0 %1082 }
 0x3ab   : > { %v2358_v36 = vpop.f32.mrb[8].mxu0 }
 0x3ac   : > { %v1192_v37 = vadd.f32 %v2358_v36, %v1018_v33  ;;  %v1183_v38 = vpop.f32.mrb[9].mxu0 }
 0x3ad   : > { %v1184_v40 = vadd.f32 %v1183_v38, %v1008_v31  ;;  %v2359_v41 = vpop.f32.mrb[10].mxu0 }
 0x3ae   : > { %v1195_v42 = vadd.f32 %v2359_v41, %v1023_v34  ;;  %v1186_v43 = vpop.f32.mrb[11].mxu0  ;;  %v1248_v45 = vmax.f32 %v1192_v37, 0.0  ;;  %v2551_v41 = vld [vmem:[%s3506_s9 + $0x10] sm:$0xff]  }
 0x3af   : > { %v1187_v44 = vadd.f32 %v1186_v43, %v1013_v32  ;;  %v1246_v48 = vmax.f32 %v1184_v40, 0.0  ;;  %v2550_v40 = vld [vmem:[%s3506_s9 + $0x38] sm:$0xff]  }
 0x3b0   : > { %v1249_v46 = vmax.f32 %v1195_v42, 0.0  ;;  %v2552_v42 = vld [vmem:[%s3506_s9 + $0x40] sm:$0xff]   ;;  %v2553_v43 = vld [vmem:[%s3506_s9 + $0x18] sm:$0xff]  }
 0x3b1   : > { %v1247_v49 = vmax.f32 %v1187_v44, 0.0  ;;  %v2554_v44 = vld [vmem:[%s3506_s9 + $0x48] sm:$0xff]  }
 0x3b2   : > { %v1295_v50 = vpack.c.bf16 %v1249_v46, %v1248_v45  ;;  %v2555_v45 = vld [vmem:[%s3506_s9 + $0x20] sm:$0xff]   ;;  %v2556_v46 = vld [vmem:[%s3506_s9 + $0x50] sm:$0xff]  }
 0x3b3   : > { %v1294_v52 = vpack.c.bf16 %v1247_v49, %v1246_v48  ;;  %v2362_v53 = vpop.f32.mrb[12].mxu0  ;;  %v2558_v48 = vld [vmem:[%s3506_s9 + $0x58] sm:$0xff]   ;;  %v2559_v49 = vld [vmem:[%s3506_s9 + $0x60] sm:$0xff]  }
 0x3b4   : > { %v1208_v11 = vadd.f32 %v2362_v53, %v1038_v63  ;;  %v1199_v13 = vpop.f32.mrb[13].mxu0  ;;  %v1337_v53 = vpop.permute.xlu1 %1336 }
 0x3b5   : > { %v1200_v54 = vadd.f32 %v1199_v13, %v1028_v4  ;;  %v2363_v55 = vpop.f32.mrb[14].mxu0  ;;  %2372 = vmatprep.subr.bf16.mxu0 %v1294_v52  ;;  %2420 = vmatprep.subr.bf16.mxu1 %v1294_v52 }
 0x3b6   : > { %v1211_v56 = vadd.f32 %v2363_v55, %v1043_v39  ;;  %v1202_v57 = vpop.f32.mrb[15].mxu0  ;;  %2373 = vmatpush3.bf16.msra.mxu0 %v1294_v52  ;;  %2428 = vmatpush3.bf16.msra.mxu1 %v1294_v52  ;;  %v1252_v59 = vmax.f32 %v1208_v11, 0.0  ;;  %v2549_v39 = vld [vmem:[%s3506_s9 + $0x8] sm:$0xff]   ;;  %v2562_v52 = vld [vmem:[%s3506_s9 + $0x78] sm:$0xff]   ;;  %v1342_v11 = vpop.permute.xlu0 %1341 }
 0x3b7   : > { %v1203_v14 = vadd.f32 %v1202_v57, %v1033_v35  ;;  %2374 = vmatprep.subr.bf16.mxu0 %v1295_v50  ;;  %2421 = vmatprep.subr.bf16.mxu1 %v1295_v50  ;;  %v1250_v23 = vmax.f32 %v1200_v54, 0.0 }
 0x3b8   : > { %v1253_v58 = vmax.f32 %v1211_v56, 0.0  ;;  %v1347_v13 = vpop.permute.xlu1 %1346 }
 0x3b9   : > { %v1251_v62 = vmax.f32 %v1203_v14, 0.0 }
 0x3ba   : > { %v1297_v0 = vpack.c.bf16 %v1253_v58, %v1252_v59  ;;  %2375 = vmatpush3.bf16.msra.mxu0 %v1295_v50  ;;  %2429 = vmatpush3.bf16.msra.mxu1 %v1295_v50  ;;  %v2560_v50 = vld [vmem:[%s3506_s9 + $0x68] sm:$0xff]   ;;  %v1352_v54 = vpop.permute.xlu0 %1351 }
 0x3bb   : > { %v1296_v2 = vpack.c.bf16 %v1251_v62, %v1250_v23  ;;  %v2366_v3 = vpop.f32.mrb[16].mxu0 }
 0x3bc   : > { %v1224_v5 = vadd.f32 %v2366_v3, %v1058_v19  ;;  %v1215_v6 = vpop.f32.mrb[17].mxu0  ;;  %v3224_v55 = vpop.permute.xlu1 %1356 }
 0x3bd   : > { %v1216_v8 = vadd.f32 %v1215_v6, %v1048_v47  ;;  %v2367_v9 = vpop.f32.mrb[18].mxu0  ;;  %2376 = vmatprep.subr.bf16.mxu0 %v1296_v2  ;;  %2422 = vmatprep.subr.bf16.mxu1 %v1296_v2  ;;  %v2557_v47 = vld [vmem:[%s3506_s9 + $0x28] sm:$0xff]  }
 0x3be   : > { %v1227_v10 = vadd.f32 %v2367_v9, %v1063_v61  ;;  %v1218_v12 = vpop.f32.mrb[19].mxu0  ;;  %2377 = vmatpush3.bf16.msra.mxu0 %v1296_v2  ;;  %2430 = vmatpush3.bf16.msra.mxu1 %v1296_v2  ;;  %v1256_v17 = vmax.f32 %v1224_v5, 0.0  ;;  %v3226_v56 = vpop.permute.xlu0 %1361 }
 0x3bf   : > { %v1219_v16 = vadd.f32 %v1218_v12, %v1053_v51  ;;  %2378 = vmatprep.subr.bf16.mxu0 %v1297_v0  ;;  %2423 = vmatprep.subr.bf16.mxu1 %v1297_v0  ;;  %v1254_v20 = vmax.f32 %v1216_v8, 0.0  ;;  %v2561_v51 = vld [vmem:[%s3506_s9 + $0x70] sm:$0xff]  }
 0x3c0   : > { %v1257_v18 = vmax.f32 %v1227_v10, 0.0  ;;  %v1367_v57 = vpop.permute.xlu1 %1366 }
 0x3c1   : > { %v1255_v21 = vmax.f32 %v1219_v16, 0.0 }
 0x3c2   : > { %v1299_v22 = vpack.c.bf16 %v1257_v18, %v1256_v17  ;;  %2379 = vmatpush3.bf16.msra.mxu0 %v1297_v0  ;;  %2431 = vmatpush3.bf16.msra.mxu1 %v1297_v0  ;;  %v1372_v19 = vpop.permute.xlu0 %1371 }
 0x3c3   : > { %v1298_v25 = vpack.c.bf16 %v1255_v21, %v1254_v20  ;;  %v2370_v26 = vpop.f32.mrb[20].mxu0 }
 0x3c4   : > { %v1240_v27 = vadd.f32 %v2370_v26, %v1078_v24  ;;  %v1231_v28 = vpop.f32.mrb[21].mxu0  ;;  %v3228_v14 = vpop.permute.xlu1 %1376 }
 0x3c5   : > { %v1232_v30 = vadd.f32 %v1231_v28, %v1068_v7  ;;  %v2371_v31 = vpop.f32.mrb[22].mxu0  ;;  %2380 = vmatprep.subr.bf16.mxu0 %v1298_v25  ;;  %2424 = vmatprep.subr.bf16.mxu1 %v1298_v25 }
 0x3c6   : > { %v1243_v32 = vadd.f32 %v2371_v31, %v1083_v29  ;;  %v1234_v33 = vpop.f32.mrb[23].mxu0  ;;  %2381 = vmatpush3.bf16.msra.mxu0 %v1298_v25  ;;  %2432 = vmatpush3.bf16.msra.mxu1 %v1298_v25  ;;  %v1260_v4 = vmax.f32 %v1240_v27, 0.0  ;;  %v3230_v59 = vpop.permute.xlu0 %1381 }
 0x3c7   : > { %v1235_v34 = vadd.f32 %v1234_v33, %v1073_v15  ;;  %2382 = vmatprep.subr.bf16.mxu0 %v1299_v22  ;;  %2425 = vmatprep.subr.bf16.mxu1 %v1299_v22  ;;  %v1258_v63 = vmax.f32 %v1232_v30, 0.0 }
 0x3c8   : > { %v1261_v35 = vmax.f32 %v1243_v32, 0.0  ;;  %v3232_v58 = vpop.permute.xlu1 %1386 }
 0x3c9   : > { %v1259_v36 = vmax.f32 %v1235_v34, 0.0 }
 0x3ca   : > { %v1301_v37 = vpack.c.bf16 %v1261_v35, %v1260_v4  ;;  %2383 = vmatpush3.bf16.msra.mxu0 %v1299_v22  ;;  %2433 = vmatpush3.bf16.msra.mxu1 %v1299_v22  ;;  %v3234_v61 = vpop.permute.xlu0 %1391 }
 0x3cb   : > { %v1300_v38 = vpack.c.bf16 %v1259_v36, %v1258_v63 }
 0x3cc   : > { %v1397_v23 = vpop.permute.xlu1 %1396 }
 0x3cd   : > { %2384 = vmatprep.subr.bf16.mxu0 %v1300_v38  ;;  %2426 = vmatprep.subr.bf16.mxu1 %v1300_v38 }
 0x3ce   : > { %2385 = vmatpush3.bf16.msra.mxu0 %v1300_v38  ;;  %2434 = vmatpush3.bf16.msra.mxu1 %v1300_v38  ;;  %v1402_v62 = vpop.permute.xlu0 %1401 }
 0x3cf   : > { %2386 = vmatprep.subr.bf16.mxu0 %v1301_v37  ;;  %2427 = vmatprep.subr.bf16.mxu1 %v1301_v37 }
 0x3d0   : > { %v1407_v0 = vpop.permute.xlu1 %1406 }
 0x3d2   : > { %2387 = vmatpush3.bf16.msra.mxu0 %v1301_v37  ;;  %2435 = vmatpush3.bf16.msra.mxu1 %v1301_v37  ;;  %v1412_v2 = vpop.permute.xlu0 %1411 }
 0x3d4   : > { %v1417_v22 = vpop.permute.xlu1 %1416 }
 0x3d5   : > { %2389 = vmatmul.mubr.bf16.vlgmr.msra.gmra.mrb[24].mxu0 %v2549_v39  ;;  %2401 = vmatmul.mubr.bf16.vlgmr.msra.gmra.mrb[8].mxu1 %v2550_v40 }
 0x3d6   : > { %2392 = vmatprep.mubr.bf16.mxu0 %v2551_v41  ;;  %2404 = vmatprep.mubr.bf16.mxu1 %v2552_v42  ;;  %v1422_v24 = vpop.permute.xlu0 %1421 }
 0x3d8   : > { %v1427_v39 = vpop.permute.xlu1 %1426 }
 0x3da   : > { %v1432_v40 = vpop.permute.xlu0 %1431 }
 0x3dd   : > { %2393 = vmatmul.mubr.bf16.gmra.mrb[28].mxu0 %v2553_v43  ;;  %2405 = vmatmul.mubr.bf16.gmra.mrb[12].mxu1 %v2554_v44 }
 0x3de   : > { %2396 = vmatprep.mubr.bf16.mxu0 %v2555_v45  ;;  %2408 = vmatprep.mubr.bf16.mxu1 %v2556_v46 }
 0x3e5   : > { %2397 = vmatmul.mubr.bf16.gmra.mrb[32].mxu0 %v2557_v47  ;;  %2409 = vmatmul.mubr.bf16.gmra.mrb[16].mxu1 %v2558_v48 }
 0x3e6   : > { %2412 = vmatprep.mubr.bf16.mxu1 %v2559_v49 }
 0x3ed   : > { %2413 = vmatmul.mubr.bf16.gmra.mrb[20].mxu1 %v2560_v50 }
 0x3ee   : > { %2416 = vmatprep.mubr.bf16.mxu1 %v2561_v51 }
 0x3f5   : > { %2417 = vmatmul.mubr.bf16.gmra.mrb[24].mxu1 %v2562_v52 }
 0x4a8   : > { %v2390_v3 = vpop.f32.mrb[24].mxu0  ;;  %v2402_v5 = vpop.f32.mrb[8].mxu1 }
 0x4a9   : > { %v1633_v6 = vadd.f32 %v2390_v3, %v1347_v13  ;;  %v1624_v7 = vpop.f32.mrb[25].mxu0  ;;  %v1672_v8 = vpop.f32.mrb[9].mxu1  ;;  %v1681_v16 = vadd.f32 %v2402_v5, %v1407_v0 }
 0x4aa   : > { %v1625_v9 = vadd.f32 %v1624_v7, %v1337_v53  ;;  %v2391_v10 = vpop.f32.mrb[26].mxu0  ;;  %v2403_v12 = vpop.f32.mrb[10].mxu1  ;;  %v1673_v26 = vadd.f32 %v1672_v8, %v1397_v23 }
 0x4ab   : > { %v1753_v15 = vmax.f32 %v1633_v6, 0.0  ;;  %v1627_v17 = vpop.f32.mrb[27].mxu0  ;;  %v1675_v18 = vpop.f32.mrb[11].mxu1  ;;  %v1636_v21 = vadd.f32 %v2391_v10, %v1352_v54  ;;  %v1765_v25 = vmax.f32 %v1681_v16, 0.0  ;;  %v1684_v28 = vadd.f32 %v2403_v12, %v1412_v2 }
 0x4ac   : > { %v1751_v20 = vmax.f32 %v1625_v9, 0.0  ;;  %v1763_v4 = vmax.f32 %v1673_v26, 0.0  ;;  %v1628_v35 = vadd.f32 %v1627_v17, %v1342_v11  ;;  %v1676_v38 = vadd.f32 %v1675_v18, %v1402_v62  ;;  %v1437_v8 = vpop.permute.xlu1 %1436  ;;  %v1442_v12 = vpop.permute.xlu0 %1441 }
 0x4ad   : > { %1787 = vmax.xlane.f32.xlu0 %v1753_v15  ;;  %v1754_v27 = vmax.f32 %v1636_v21, 0.0  ;;  %v1766_v37 = vmax.f32 %v1684_v28, 0.0 }
 0x4ae   : > { %1783 = vmax.xlane.f32.xlu1 %v1751_v20  ;;  %v1752_v41 = vmax.f32 %v1628_v35, 0.0  ;;  %v1764_v43 = vmax.f32 %v1676_v38, 0.0 }
 0x4b0   : > { %v2394_v29 = vpop.f32.mrb[28].mxu0  ;;  %v2406_v30 = vpop.f32.mrb[12].mxu1 }
 0x4b1   : > { %v1688_v31 = vpop.f32.mrb[13].mxu1  ;;  %1811 = vmax.xlane.f32.xlu0 %v1765_v25  ;;  %v1640_v32 = vpop.f32.mrb[29].mxu0  ;;  %v1649_v42 = vadd.f32 %v2394_v29, %v1367_v57  ;;  %v1697_v52 = vadd.f32 %v2406_v30, %v1427_v39 }
 0x4b2   : > { %v2395_v33 = vpop.f32.mrb[30].mxu0  ;;  %v2407_v34 = vpop.f32.mrb[14].mxu1  ;;  %1789 = vmax.xlane.f32.xlu1 %v1754_v27  ;;  %v1641_v57 = vadd.f32 %v1640_v32, %v3224_v55  ;;  %v1689_v5 = vadd.f32 %v1688_v31, %v1417_v22 }
 0x4b3   : > { %v1643_v63 = vpop.f32.mrb[31].mxu0  ;;  %v1691_v36 = vpop.f32.mrb[15].mxu1  ;;  %v1652_v44 = vadd.f32 %v2395_v33, %v1372_v19  ;;  %v1757_v51 = vmax.f32 %v1649_v42, 0.0  ;;  %v1700_v54 = vadd.f32 %v2407_v34, %v1432_v40  ;;  %v1769_v23 = vmax.f32 %v1697_v52, 0.0 }
 0x4b4   : > { %v1644_v62 = vadd.f32 %v1643_v63, %v3226_v56  ;;  %v1755_v6 = vmax.f32 %v1641_v57, 0.0  ;;  %v1692_v10 = vadd.f32 %v1691_v36, %v1422_v24  ;;  %v1767_v15 = vmax.f32 %v1689_v5, 0.0  ;;  %v1447_v20 = vpop.permute.xlu1 %1446  ;;  %v1452_v22 = vpop.permute.xlu0 %1451 }
 0x4b5   : > { %1807 = vmax.xlane.f32.xlu0 %v1763_v4  ;;  %v1758_v13 = vmax.f32 %v1652_v44, 0.0  ;;  %v1770_v19 = vmax.f32 %v1700_v54, 0.0 }
 0x4b6   : > { %1813 = vmax.xlane.f32.xlu1 %v1766_v37  ;;  %v1756_v9 = vmax.f32 %v1644_v62, 0.0  ;;  %v1768_v16 = vmax.f32 %v1692_v10, 0.0 }
 0x4b8   : > { %v2398_v45 = vpop.f32.mrb[32].mxu0  ;;  %v2410_v46 = vpop.f32.mrb[16].mxu1 }
 0x4b9   : > { %v1656_v47 = vpop.f32.mrb[33].mxu0  ;;  %v1704_v48 = vpop.f32.mrb[17].mxu1  ;;  %1785 = vmax.xlane.f32.xlu0 %v1752_v41  ;;  %v1665_v55 = vadd.f32 %v2398_v45, %v3232_v58  ;;  %v1713_v26 = vadd.f32 %v2410_v46, %v1447_v20 }
 0x4ba   : > { %v2399_v49 = vpop.f32.mrb[34].mxu0  ;;  %v2411_v50 = vpop.f32.mrb[18].mxu1  ;;  %1809 = vmax.xlane.f32.xlu1 %v1764_v43  ;;  %v1657_v58 = vadd.f32 %v1656_v47, %v3228_v14  ;;  %v1705_v34 = vadd.f32 %v1704_v48, %v1437_v8 }
 0x4bb   : > { %v1659_v53 = vpop.f32.mrb[35].mxu0  ;;  %v1707_v11 = vpop.f32.mrb[19].mxu1  ;;  %v1668_v56 = vadd.f32 %v2399_v49, %v3234_v61  ;;  %v1761_v25 = vmax.f32 %v1665_v55, 0.0  ;;  %v1716_v28 = vadd.f32 %v2411_v50, %v1452_v22  ;;  %v1773_v29 = vmax.f32 %v1713_v26, 0.0 }
 0x4bc   : > { %v1457_v30 = vpop.permute.xlu1 %1456  ;;  %v1660_v61 = vadd.f32 %v1659_v53, %v3230_v59  ;;  %v1462_v32 = vpop.permute.xlu0 %1461  ;;  %v1759_v33 = vmax.f32 %v1657_v58, 0.0  ;;  %v1708_v35 = vadd.f32 %v1707_v11, %v1442_v12  ;;  %v1771_v37 = vmax.f32 %v1705_v34, 0.0 }
 0x4bd   : > { %1795 = vmax.xlane.f32.xlu0 %v1757_v51  ;;  %v1762_v24 = vmax.f32 %v1668_v56, 0.0  ;;  %v1774_v31 = vmax.f32 %v1716_v28, 0.0 }
 0x4be   : > { %1797 = vmax.xlane.f32.xlu1 %v1758_v13  ;;  %v1760_v4 = vmax.f32 %v1660_v61, 0.0  ;;  %v1772_v39 = vmax.f32 %v1708_v35, 0.0 }
 0x4c0   : > { %v2414_v0 = vpop.f32.mrb[20].mxu1  ;;  %v1467_v63 = vpop.permute.xlu1 %1466 }
 0x4c1   : > { %v1720_v2 = vpop.f32.mrb[21].mxu1  ;;  %1819 = vmax.xlane.f32.xlu0 %v1769_v23  ;;  %v1472_v36 = vpop.permute.xlu0 %1471  ;;  %v1729_v38 = vadd.f32 %v2414_v0, %v1467_v63 }
 0x4c2   : > { %v2415_v3 = vpop.f32.mrb[22].mxu1  ;;  %1821 = vmax.xlane.f32.xlu1 %v1770_v19  ;;  %v1721_v41 = vadd.f32 %v1720_v2, %v1457_v30 }
 0x4c3   : > { %v1723_v7 = vpop.f32.mrb[23].mxu1  ;;  %v1732_v40 = vadd.f32 %v2415_v3, %v1472_v36  ;;  %v1777_v14 = vmax.f32 %v1729_v38, 0.0 }
 0x4c4   : > { %v1477_v59 = vpop.permute.xlu1 %1476  ;;  %v1724_v43 = vadd.f32 %v1723_v7, %v1462_v32  ;;  %v1775_v45 = vmax.f32 %v1721_v41, 0.0 }
 0x4c5   : > { %1791 = vmax.xlane.f32.xlu0 %v1755_v6  ;;  %v1778_v42 = vmax.f32 %v1732_v40, 0.0  ;;  %v1482_v44 = vpop.permute.xlu0 %1481 }
 0x4c6   : > { %1793 = vmax.xlane.f32.xlu1 %v1756_v9  ;;  %v1776_v47 = vmax.f32 %v1724_v43, 0.0 }
 0x4c8   : > { %v2418_v17 = vpop.f32.mrb[24].mxu1  ;;  %v1487_v49 = vpop.permute.xlu1 %1486 }
 0x4c9   : > { %v1736_v18 = vpop.f32.mrb[25].mxu1  ;;  %1815 = vmax.xlane.f32.xlu0 %v1767_v15  ;;  %v1492_v50 = vpop.permute.xlu0 %1491  ;;  %v1745_v51 = vadd.f32 %v2418_v17, %v1487_v49 }
 0x4ca   : > { %v2419_v21 = vpop.f32.mrb[26].mxu1  ;;  %1817 = vmax.xlane.f32.xlu1 %v1768_v16  ;;  %v1737_v46 = vadd.f32 %v1736_v18, %v1477_v59 }
 0x4cb   : > { %v1739_v27 = vpop.f32.mrb[27].mxu1  ;;  %v1748_v53 = vadd.f32 %v2419_v21, %v1492_v50  ;;  %v1781_v13 = vmax.f32 %v1745_v51, 0.0 }
 0x4cc   : > { %v1740_v48 = vadd.f32 %v1739_v27, %v1482_v44  ;;  %v1779_v52 = vmax.f32 %v1737_v46, 0.0 }
 0x4cd   : > { %1803 = vmax.xlane.f32.xlu0 %v1761_v25  ;;  %v1782_v54 = vmax.f32 %v1748_v53, 0.0 }
 0x4ce   : > { %1805 = vmax.xlane.f32.xlu1 %v1762_v24  ;;  %v1780_v11 = vmax.f32 %v1740_v48, 0.0 }
 0x4d1   : > { %1827 = vmax.xlane.f32.xlu0 %v1773_v29 }
 0x4d2   : > { %1829 = vmax.xlane.f32.xlu1 %v1774_v31 }
 0x4d5   : > { %1799 = vmax.xlane.f32.xlu0 %v1759_v33 }
 0x4d6   : > { %1801 = vmax.xlane.f32.xlu1 %v1760_v4 }
 0x4d9   : > { %1823 = vmax.xlane.f32.xlu0 %v1771_v37 }
 0x4da   : > { %1825 = vmax.xlane.f32.xlu1 %v1772_v39 }
 0x4dd   : > { %1835 = vmax.xlane.f32.xlu0 %v1777_v14 }
 0x4de   : > { %1837 = vmax.xlane.f32.xlu1 %v1778_v42 }
 0x4e1   : > { %1831 = vmax.xlane.f32.xlu0 %v1775_v45 }
 0x4e2   : > { %1833 = vmax.xlane.f32.xlu1 %v1776_v47 }
 0x4e5   : > { %1839 = vmax.xlane.f32.xlu0 %v1779_v52 }
 0x4e6   : > { %1841 = vmax.xlane.f32.xlu1 %v1780_v11 }
 0x4e9   : > { %1843 = vmax.xlane.f32.xlu0 %v1781_v13 }
 0x4ea   : > { %1845 = vmax.xlane.f32.xlu1 %v1782_v54 }
 0x53a   : > { %v3242_v23 = vpop.xlane.xlu0 %1787 }
 0x53b   : > { %v3244_v57 = vpop.xlane.xlu1 %1783  ;;  %1854 = vst.msk [vmem:[#allocation2 + $0x10] sm:$0xff] (!%p2255_p0), %vm1851_vm1, %v3242_v23 }
 0x53c   : > { %1852 = vst.msk [vmem:[#allocation2] sm:$0xff] (!%p2255_p0), %vm1851_vm1, %v3244_v57 }
 0x53e   : > { %v3246_v19 = vpop.xlane.xlu0 %1811 }
 0x53f   : > { %v3248_v62 = vpop.xlane.xlu1 %1789  ;;  %1866 = vst.msk [vmem:[#allocation2 + $0x70] sm:$0xff] (!%p2255_p0), %vm1851_vm1, %v3246_v19 }
 0x540   : > { %1855 = vst.msk [vmem:[#allocation2 + $0x18] sm:$0xff] (!%p2255_p0), %vm1851_vm1, %v3248_v62 }
 0x542   : > { %v3250_v0 = vpop.xlane.xlu0 %1807 }
 0x543   : > { %v3252_v2 = vpop.xlane.xlu1 %1813  ;;  %1864 = vst.msk [vmem:[#allocation2 + $0x60] sm:$0xff] (!%p2255_p0), %vm1851_vm1, %v3250_v0 }
 0x544   : > { %1867 = vst.msk [vmem:[#allocation2 + $0x78] sm:$0xff] (!%p2255_p0), %vm1851_vm1, %v3252_v2 }
 0x546   : > { %v3254_v3 = vpop.xlane.xlu0 %1785 }
 0x547   : > { %v3256_v5 = vpop.xlane.xlu1 %1809  ;;  %1853 = vst.msk [vmem:[#allocation2 + $0x8] sm:$0xff] (!%p2255_p0), %vm1851_vm1, %v3254_v3 }
 0x548   : > { %1865 = vst.msk [vmem:[#allocation2 + $0x68] sm:$0xff] (!%p2255_p0), %vm1851_vm1, %v3256_v5 }
 0x54a   : > { %v3258_v6 = vpop.xlane.xlu0 %1795 }
 0x54b   : > { %v3260_v7 = vpop.xlane.xlu1 %1797  ;;  %1858 = vst.msk [vmem:[#allocation2 + $0x30] sm:$0xff] (!%p2255_p0), %vm1851_vm1, %v3258_v6 }
 0x54c   : > { %1859 = vst.msk [vmem:[#allocation2 + $0x38] sm:$0xff] (!%p2255_p0), %vm1851_vm1, %v3260_v7 }
 0x54e   : > { %v3262_v8 = vpop.xlane.xlu0 %1819 }
 0x54f   : > { %v3264_v9 = vpop.xlane.xlu1 %1821  ;;  %1870 = vst.msk [vmem:[#allocation2 + $0x90] sm:$0xff] (!%p2255_p0), %vm1851_vm1, %v3262_v8 }
 0x550   : > { %1871 = vst.msk [vmem:[#allocation2 + $0x98] sm:$0xff] (!%p2255_p0), %vm1851_vm1, %v3264_v9 }
 0x552   : > { %v3266_v10 = vpop.xlane.xlu0 %1791 }
 0x553   : > { %v3268_v12 = vpop.xlane.xlu1 %1793  ;;  %1856 = vst.msk [vmem:[#allocation2 + $0x20] sm:$0xff] (!%p2255_p0), %vm1851_vm1, %v3266_v10 }
 0x554   : > { %1857 = vst.msk [vmem:[#allocation2 + $0x28] sm:$0xff] (!%p2255_p0), %vm1851_vm1, %v3268_v12 }
 0x556   : > { %v3270_v15 = vpop.xlane.xlu0 %1815 }
 0x557   : > { %v3272_v55 = vpop.xlane.xlu1 %1817  ;;  %1868 = vst.msk [vmem:[#allocation2 + $0x80] sm:$0xff] (!%p2255_p0), %vm1851_vm1, %v3270_v15 }
 0x558   : > { %1869 = vst.msk [vmem:[#allocation2 + $0x88] sm:$0xff] (!%p2255_p0), %vm1851_vm1, %v3272_v55 }
 0x55a   : > { %v3274_v16 = vpop.xlane.xlu0 %1803 }
 0x55b   : > { %v3276_v56 = vpop.xlane.xlu1 %1805  ;;  %1862 = vst.msk [vmem:[#allocation2 + $0x50] sm:$0xff] (!%p2255_p0), %vm1851_vm1, %v3274_v16 }
 0x55c   : > { %1863 = vst.msk [vmem:[#allocation2 + $0x58] sm:$0xff] (!%p2255_p0), %vm1851_vm1, %v3276_v56 }
 0x55e   : > { %v3278_v17 = vpop.xlane.xlu0 %1827 }
 0x55f   : > { %v3280_v18 = vpop.xlane.xlu1 %1829  ;;  %1874 = vst.msk [vmem:[#allocation2 + $0xb0] sm:$0xff] (!%p2255_p0), %vm1851_vm1, %v3278_v17 }
 0x560   : > { %1875 = vst.msk [vmem:[#allocation2 + $0xb8] sm:$0xff] (!%p2255_p0), %vm1851_vm1, %v3280_v18 }
 0x562   : > { %v3282_v20 = vpop.xlane.xlu0 %1799 }
 0x563   : > { %v3284_v21 = vpop.xlane.xlu1 %1801  ;;  %1860 = vst.msk [vmem:[#allocation2 + $0x40] sm:$0xff] (!%p2255_p0), %vm1851_vm1, %v3282_v20 }
 0x564   : > { %1861 = vst.msk [vmem:[#allocation2 + $0x48] sm:$0xff] (!%p2255_p0), %vm1851_vm1, %v3284_v21 }
 0x566   : > { %v3286_v22 = vpop.xlane.xlu0 %1823 }
 0x567   : > { %v3288_v25 = vpop.xlane.xlu1 %1825  ;;  %1872 = vst.msk [vmem:[#allocation2 + $0xa0] sm:$0xff] (!%p2255_p0), %vm1851_vm1, %v3286_v22 }
 0x568   : > { %1873 = vst.msk [vmem:[#allocation2 + $0xa8] sm:$0xff] (!%p2255_p0), %vm1851_vm1, %v3288_v25 }
 0x56a   : > { %v3290_v26 = vpop.xlane.xlu0 %1835 }
 0x56b   : > { %v3292_v27 = vpop.xlane.xlu1 %1837  ;;  %1878 = vst.msk [vmem:[#allocation2 + $0xd0] sm:$0xff] (!%p2255_p0), %vm1851_vm1, %v3290_v26 }
 0x56c   : > { %1879 = vst.msk [vmem:[#allocation2 + $0xd8] sm:$0xff] (!%p2255_p0), %vm1851_vm1, %v3292_v27 }
 0x56e   : > { %v3294_v24 = vpop.xlane.xlu0 %1831 }
 0x56f   : > { %v3296_v28 = vpop.xlane.xlu1 %1833  ;;  %1876 = vst.msk [vmem:[#allocation2 + $0xc0] sm:$0xff] (!%p2255_p0), %vm1851_vm1, %v3294_v24 }
 0x570   : > { %1877 = vst.msk [vmem:[#allocation2 + $0xc8] sm:$0xff] (!%p2255_p0), %vm1851_vm1, %v3296_v28 }
 0x571   : > { %1850 = sbr.rel (%p2255_p0) target bundleno = 1401 (0x579), region = 68 }
 0x572   : > { %v3298_v29 = vpop.xlane.xlu0 %1839 }
 0x573   : > { %v3300_v58 = vpop.xlane.xlu1 %1841  ;;  %1880 = vst.msk [vmem:[#allocation2 + $0xe0] sm:$0xff] (!%p2255_p0), %vm1851_vm1, %v3298_v29 }
 0x574   : > { %1881 = vst.msk [vmem:[#allocation2 + $0xe8] sm:$0xff] (!%p2255_p0), %vm1851_vm1, %v3300_v58 }
 0x576   : > { %v3302_v30 = vpop.xlane.xlu0 %1843 }
 0x577   : > { %v3304_v31 = vpop.xlane.xlu1 %1845  ;;  %1882 = vst.msk [vmem:[#allocation2 + $0xf0] sm:$0xff] (!%p2255_p0), %vm1851_vm1, %v3302_v30 }
 0x578   : > { %1883 = vst.msk [vmem:[#allocation2 + $0xf8] sm:$0xff] %vm1851_vm1, %v3304_v31 }
 0x579 PF: > { %p2256_p1 = scmp.le.s32.totalorder %s2641_s20, 0 }
 0x57a   : > { %v1888_v61 = vld [vmem:[#allocation2] sm:$0xff] (!%p2256_p1)  ;;  %vm1952_vm2 = vcmask (!%p2256_p1), 7168   ;;  %v1889_v32 = vld [vmem:[#allocation2 + $0x8] sm:$0xff] (!%p2256_p1)  ;;  %v1890_v33 = vld [vmem:[#allocation2 + $0x10] sm:$0xff] (!%p2256_p1) }
 0x57b   : > { %1887 = sbr.rel (%p2256_p1) target bundleno = 1421 (0x58d), region = 72  ;;  %v1920_v34 = vmax.f32 (!%p2256_p1), %v1888_v61, %v3244_v57  ;;  %v1921_v4 = vmax.f32 (!%p2256_p1), %v1889_v32, %v3254_v3  ;;  %v1922_v35 = vmax.f32 (!%p2256_p1), %v1890_v33, %v3242_v23  ;;  %v1891_v63 = vld [vmem:[#allocation2 + $0x18] sm:$0xff] (!%p2256_p1)  ;;  %v1892_v36 = vld [vmem:[#allocation2 + $0x20] sm:$0xff] (!%p2256_p1)  ;;  %v1893_v37 = vld [vmem:[#allocation2 + $0x28] sm:$0xff] (!%p2256_p1) }
 0x57c   : > { %v1923_v38 = vmax.f32 (!%p2256_p1), %v1891_v63, %v3248_v62  ;;  %v1924_v39 = vmax.f32 (!%p2256_p1), %v1892_v36, %v3266_v10  ;;  %v1925_v40 = vmax.f32 (!%p2256_p1), %v1893_v37, %v3268_v12  ;;  %v1894_v14 = vld [vmem:[#allocation2 + $0x30] sm:$0xff] (!%p2256_p1)  ;;  %v1895_v41 = vld [vmem:[#allocation2 + $0x38] sm:$0xff] (!%p2256_p1)  ;;  %v1896_v59 = vld [vmem:[#allocation2 + $0x40] sm:$0xff] (!%p2256_p1) }
 0x57d   : > { %1953 = vst.msk [vmem:[#allocation2] sm:$0xff] (!%p2256_p1), %vm1952_vm2, %v1920_v34  ;;  %1954 = vst.msk [vmem:[#allocation2 + $0x8] sm:$0xff] (!%p2256_p1), %vm1952_vm2, %v1921_v4  ;;  %v1926_v42 = vmax.f32 (!%p2256_p1), %v1894_v14, %v3258_v6  ;;  %v1927_v43 = vmax.f32 (!%p2256_p1), %v1895_v41, %v3260_v7  ;;  %v1928_v44 = vmax.f32 (!%p2256_p1), %v1896_v59, %v3282_v20  ;;  %v1897_v45 = vld [vmem:[#allocation2 + $0x48] sm:$0xff] (!%p2256_p1)  ;;  %v1898_v46 = vld [vmem:[#allocation2 + $0x50] sm:$0xff] (!%p2256_p1) }
 0x57e   : > { %1955 = vst.msk [vmem:[#allocation2 + $0x10] sm:$0xff] (!%p2256_p1), %vm1952_vm2, %v1922_v35  ;;  %v1899_v47 = vld [vmem:[#allocation2 + $0x58] sm:$0xff] (!%p2256_p1)  ;;  %1956 = vst.msk [vmem:[#allocation2 + $0x18] sm:$0xff] (!%p2256_p1), %vm1952_vm2, %v1923_v38  ;;  %v1929_v48 = vmax.f32 (!%p2256_p1), %v1897_v45, %v3284_v21  ;;  %v1930_v49 = vmax.f32 (!%p2256_p1), %v1898_v46, %v3274_v16  ;;  %v1900_v51 = vld [vmem:[#allocation2 + $0x60] sm:$0xff] (!%p2256_p1) }
 0x57f   : > { %1957 = vst.msk [vmem:[#allocation2 + $0x20] sm:$0xff] (!%p2256_p1), %vm1952_vm2, %v1924_v39  ;;  %1958 = vst.msk [vmem:[#allocation2 + $0x28] sm:$0xff] (!%p2256_p1), %vm1952_vm2, %v1925_v40  ;;  %v1931_v50 = vmax.f32 (!%p2256_p1), %v1899_v47, %v3276_v56  ;;  %v1901_v52 = vld [vmem:[#allocation2 + $0x68] sm:$0xff] (!%p2256_p1)  ;;  %v1902_v53 = vld [vmem:[#allocation2 + $0x70] sm:$0xff] (!%p2256_p1)  ;;  %v1932_v11 = vmax.f32 (!%p2256_p1), %v1900_v51, %v3250_v0 }
 0x580   : > { %1959 = vst.msk [vmem:[#allocation2 + $0x30] sm:$0xff] (!%p2256_p1), %vm1952_vm2, %v1926_v42  ;;  %1960 = vst.msk [vmem:[#allocation2 + $0x38] sm:$0xff] (!%p2256_p1), %vm1952_vm2, %v1927_v43  ;;  %v1933_v13 = vmax.f32 (!%p2256_p1), %v1901_v52, %v3256_v5  ;;  %v1934_v54 = vmax.f32 (!%p2256_p1), %v1902_v53, %v3246_v19  ;;  %v1903_v23 = vld [vmem:[#allocation2 + $0x78] sm:$0xff] (!%p2256_p1)  ;;  %v1904_v57 = vld [vmem:[#allocation2 + $0x80] sm:$0xff] (!%p2256_p1) }
 0x581   : > { %1961 = vst.msk [vmem:[#allocation2 + $0x40] sm:$0xff] (!%p2256_p1), %vm1952_vm2, %v1928_v44  ;;  %v1905_v62 = vld [vmem:[#allocation2 + $0x88] sm:$0xff] (!%p2256_p1)  ;;  %1962 = vst.msk [vmem:[#allocation2 + $0x48] sm:$0xff] (!%p2256_p1), %vm1952_vm2, %v1929_v48  ;;  %v1935_v3 = vmax.f32 (!%p2256_p1), %v1903_v23, %v3252_v2  ;;  %v1936_v6 = vmax.f32 (!%p2256_p1), %v1904_v57, %v3270_v15  ;;  %v1906_v0 = vld [vmem:[#allocation2 + $0x90] sm:$0xff] (!%p2256_p1) }
 0x582   : > { %1963 = vst.msk [vmem:[#allocation2 + $0x50] sm:$0xff] %vm1952_vm2, %v1930_v49  ;;  %1964 = vst.msk [vmem:[#allocation2 + $0x58] sm:$0xff] %vm1952_vm2, %v1931_v50  ;;  %v1937_v7 = vmax.f32 %v1905_v62, %v3272_v55  ;;  %v1907_v10 = vld [vmem:[#allocation2 + $0x98] sm:$0xff]  ;;  %v1908_v5 = vld [vmem:[#allocation2 + $0xa0] sm:$0xff]  ;;  %v1938_v19 = vmax.f32 %v1906_v0, %v3262_v8 }
 0x583   : > { %1965 = vst.msk [vmem:[#allocation2 + $0x60] sm:$0xff] %vm1952_vm2, %v1932_v11  ;;  %1966 = vst.msk [vmem:[#allocation2 + $0x68] sm:$0xff] %vm1952_vm2, %v1933_v13  ;;  %v1939_v12 = vmax.f32 %v1907_v10, %v3264_v9  ;;  %v1940_v16 = vmax.f32 %v1908_v5, %v3286_v22  ;;  %v1909_v2 = vld [vmem:[#allocation2 + $0xa8] sm:$0xff]  ;;  %v1910_v56 = vld [vmem:[#allocation2 + $0xb0] sm:$0xff] }
 0x584   : > { %1967 = vst.msk [vmem:[#allocation2 + $0x70] sm:$0xff] %vm1952_vm2, %v1934_v54  ;;  %v1911_v15 = vld [vmem:[#allocation2 + $0xb8] sm:$0xff]  ;;  %1968 = vst.msk [vmem:[#allocation2 + $0x78] sm:$0xff] %vm1952_vm2, %v1935_v3  ;;  %v1941_v55 = vmax.f32 %v1909_v2, %v3288_v25  ;;  %v1942_v20 = vmax.f32 %v1910_v56, %v3278_v17  ;;  %v1912_v8 = vld [vmem:[#allocation2 + $0xc0] sm:$0xff] }
 0x585   : > { %1969 = vst.msk [vmem:[#allocation2 + $0x80] sm:$0xff] %vm1952_vm2, %v1936_v6  ;;  %1970 = vst.msk [vmem:[#allocation2 + $0x88] sm:$0xff] %vm1952_vm2, %v1937_v7  ;;  %v1943_v21 = vmax.f32 %v1911_v15, %v3280_v18  ;;  %v1913_v61 = vld [vmem:[#allocation2 + $0xc8] sm:$0xff]  ;;  %v1914_v9 = vld [vmem:[#allocation2 + $0xd0] sm:$0xff]  ;;  %v1944_v22 = vmax.f32 %v1912_v8, %v3294_v24 }
 0x586   : > { %1971 = vst.msk [vmem:[#allocation2 + $0x90] sm:$0xff] %vm1952_vm2, %v1938_v19  ;;  %1972 = vst.msk [vmem:[#allocation2 + $0x98] sm:$0xff] %vm1952_vm2, %v1939_v12  ;;  %v1945_v32 = vmax.f32 %v1913_v61, %v3296_v28  ;;  %v1946_v33 = vmax.f32 %v1914_v9, %v3290_v26  ;;  %v1915_v25 = vld [vmem:[#allocation2 + $0xd8] sm:$0xff]  ;;  %v1916_v34 = vld [vmem:[#allocation2 + $0xe0] sm:$0xff] }
 0x587   : > { %1973 = vst.msk [vmem:[#allocation2 + $0xa0] sm:$0xff] %vm1952_vm2, %v1940_v16  ;;  %v1917_v17 = vld [vmem:[#allocation2 + $0xe8] sm:$0xff]  ;;  %1974 = vst.msk [vmem:[#allocation2 + $0xa8] sm:$0xff] %vm1952_vm2, %v1941_v55  ;;  %v1947_v18 = vmax.f32 %v1915_v25, %v3292_v27  ;;  %v1948_v4 = vmax.f32 %v1916_v34, %v3298_v29  ;;  %v1918_v24 = vld [vmem:[#allocation2 + $0xf0] sm:$0xff] }
 0x588   : > { %1975 = vst.msk [vmem:[#allocation2 + $0xb0] sm:$0xff] %vm1952_vm2, %v1942_v20  ;;  %1976 = vst.msk [vmem:[#allocation2 + $0xb8] sm:$0xff] %vm1952_vm2, %v1943_v21  ;;  %v1949_v35 = vmax.f32 %v1917_v17, %v3300_v58  ;;  %v1919_v63 = vld [vmem:[#allocation2 + $0xf8] sm:$0xff]  ;;  %v1950_v26 = vmax.f32 %v1918_v24, %v3302_v30 }
 0x589   : > { %1977 = vst.msk [vmem:[#allocation2 + $0xc0] sm:$0xff] %vm1952_vm2, %v1944_v22  ;;  %1978 = vst.msk [vmem:[#allocation2 + $0xc8] sm:$0xff] %vm1952_vm2, %v1945_v32  ;;  %v1951_v28 = vmax.f32 %v1919_v63, %v3304_v31 }
 0x58a   : > { %1979 = vst.msk [vmem:[#allocation2 + $0xd0] sm:$0xff] %vm1952_vm2, %v1946_v33  ;;  %1980 = vst.msk [vmem:[#allocation2 + $0xd8] sm:$0xff] %vm1952_vm2, %v1947_v18 }
 0x58b   : > { %1981 = vst.msk [vmem:[#allocation2 + $0xe0] sm:$0xff] %vm1952_vm2, %v1948_v4  ;;  %1982 = vst.msk [vmem:[#allocation2 + $0xe8] sm:$0xff] %vm1952_vm2, %v1949_v35 }
 0x58c   : > { %1983 = vst.msk [vmem:[#allocation2 + $0xf0] sm:$0xff] %vm1952_vm2, %v1950_v26  ;;  %1984 = vst.msk [vmem:[#allocation2 + $0xf8] sm:$0xff] %vm1952_vm2, %v1951_v28 }
 0x58d PF: > { %p2257_p2 = scmp.ne.s32.totalorder %s2641_s20, 1 }
 0x58e   : > { %v2005_v27 = vld [vmem:[#allocation2 + $0x80] sm:$0xff] (!%p2257_p2)  ;;  %v2006_v58 = vld [vmem:[#allocation2 + $0x88] sm:$0xff] (!%p2257_p2)  ;;  %v2007_v31 = vld [vmem:[#allocation2 + $0x90] sm:$0xff] (!%p2257_p2)  ;;  %v2662_v6 = vmov (!%p2257_p2), 1966171168   ;;  %vm2105_vm3 = vcmp.lt.s32.totalorder (!%p2257_p2), %v466_v60, 256 }
 0x58f   : > { %1988 = sbr.rel (%p2257_p2) target bundleno = 1560 (0x618), region = 76  ;;  %v1989_v29 = vld [vmem:[#allocation2] sm:$0xff] (!%p2257_p2)  ;;  %2053 = vxpose.xlu1.b32.start [1/16] (narrow) (!%p2257_p2), %v2005_v27, 8  ;;  %v1990_v30 = vld [vmem:[#allocation2 + $0x8] sm:$0xff] (!%p2257_p2)  ;;  %v2008_v37 = vld [vmem:[#allocation2 + $0x98] sm:$0xff] (!%p2257_p2)  ;;  %v2089_v7 = vunpack.c.l.s4 (!%p2257_p2), %v2662_v6 }
 0x590   : > { %2021 = vxpose.xlu0.b32.start [1/16] (narrow) (!%p2257_p2), %v1989_v29, 8  ;;  %v1991_v36 = vld [vmem:[#allocation2 + $0x10] sm:$0xff] (!%p2257_p2)  ;;  %v1992_v38 = vld [vmem:[#allocation2 + $0x18] sm:$0xff] (!%p2257_p2)  ;;  %v2009_v39 = vld [vmem:[#allocation2 + $0xa0] sm:$0xff] (!%p2257_p2) }
 0x591   : > { %v1993_v40 = vld [vmem:[#allocation2 + $0x20] sm:$0xff] (!%p2257_p2)  ;;  %v2010_v14 = vld [vmem:[#allocation2 + $0xa8] sm:$0xff] (!%p2257_p2)  ;;  %v2011_v59 = vld [vmem:[#allocation2 + $0xb0] sm:$0xff] (!%p2257_p2)  ;;  %v2090_v0 = vunpack.c.0.s8 (!%p2257_p2), %v2089_v7 }
 0x592   : > { %v1994_v41 = vld [vmem:[#allocation2 + $0x28] sm:$0xff] (!%p2257_p2)  ;;  %v1995_v42 = vld [vmem:[#allocation2 + $0x30] sm:$0xff] (!%p2257_p2)  ;;  %v2012_v43 = vld [vmem:[#allocation2 + $0xb8] sm:$0xff] (!%p2257_p2) }
 0x593   : > { %2054 = vxpose.xlu1.b32.cont [2/16] (narrow) (!%p2257_p2), %v2006_v58, 8  ;;  %v1996_v44 = vld [vmem:[#allocation2 + $0x38] sm:$0xff] (!%p2257_p2)  ;;  %v2013_v45 = vld [vmem:[#allocation2 + $0xc0] sm:$0xff] (!%p2257_p2)  ;;  %v2014_v47 = vld [vmem:[#allocation2 + $0xc8] sm:$0xff] (!%p2257_p2)  ;;  %v2093_v10 = vsub.s32 (!%p2257_p2), %v2090_v0, %v2978_v1 }
 0x594   : > { %2022 = vxpose.xlu0.b32.cont [2/16] (narrow) (!%p2257_p2), %v1990_v30, 8  ;;  %v1997_v46 = vld [vmem:[#allocation2 + $0x40] sm:$0xff] (!%p2257_p2)  ;;  %v1998_v48 = vld [vmem:[#allocation2 + $0x48] sm:$0xff] (!%p2257_p2)  ;;  %v2015_v49 = vld [vmem:[#allocation2 + $0xd0] sm:$0xff] (!%p2257_p2) }
 0x595   : > { %v1999_v50 = vld [vmem:[#allocation2 + $0x50] sm:$0xff] (!%p2257_p2)  ;;  %v2016_v51 = vld [vmem:[#allocation2 + $0xd8] sm:$0xff] (!%p2257_p2)  ;;  %v2017_v53 = vld [vmem:[#allocation2 + $0xe0] sm:$0xff] (!%p2257_p2) }
 0x596   : > { %v2000_v52 = vld [vmem:[#allocation2 + $0x58] sm:$0xff]  ;;  %v2001_v11 = vld [vmem:[#allocation2 + $0x60] sm:$0xff]  ;;  %v2018_v13 = vld [vmem:[#allocation2 + $0xe8] sm:$0xff] }
 0x597   : > { %2055 = vxpose.xlu1.b32.cont [3/16] (narrow) %v2007_v31, 8  ;;  %v2002_v54 = vld [vmem:[#allocation2 + $0x68] sm:$0xff]  ;;  %v2019_v23 = vld [vmem:[#allocation2 + $0xf0] sm:$0xff]  ;;  %v2020_v62 = vld [vmem:[#allocation2 + $0xf8] sm:$0xff] }
 0x598   : > { %2023 = vxpose.xlu0.b32.cont [3/16] (narrow) %v1991_v36, 8  ;;  %v2003_v57 = vld [vmem:[#allocation2 + $0x70] sm:$0xff]  ;;  %v2004_v3 = vld [vmem:[#allocation2 + $0x78] sm:$0xff] }
 0x59b   : > { %2056 = vxpose.xlu1.b32.cont [4/16] (narrow) %v2008_v37, 8 }
 0x59c   : > { %2024 = vxpose.xlu0.b32.cont [4/16] (narrow) %v1992_v38, 8 }
 0x59f   : > { %2057 = vxpose.xlu1.b32.cont [5/16] (narrow) %v2009_v39, 8 }
 0x5a0   : > { %2025 = vxpose.xlu0.b32.cont [5/16] (narrow) %v1993_v40, 8 }
 0x5a3   : > { %2058 = vxpose.xlu1.b32.cont [6/16] (narrow) %v2010_v14, 8 }
 0x5a4   : > { %2026 = vxpose.xlu0.b32.cont [6/16] (narrow) %v1994_v41, 8 }
 0x5a7   : > { %2059 = vxpose.xlu1.b32.cont [7/16] (narrow) %v2011_v59, 8 }
 0x5a8   : > { %2027 = vxpose.xlu0.b32.cont [7/16] (narrow) %v1995_v42, 8 }
 0x5ab   : > { %2060 = vxpose.xlu1.b32.cont [8/16] (narrow) %v2012_v43, 8 }
 0x5ac   : > { %2028 = vxpose.xlu0.b32.cont [8/16] (narrow) %v1996_v44, 8 }
 0x5af   : > { %2061 = vxpose.xlu1.b32.cont [9/16] (narrow) %v2013_v45, 8 }
 0x5b0   : > { %2029 = vxpose.xlu0.b32.cont [9/16] (narrow) %v1997_v46, 8 }
 0x5b3   : > { %2062 = vxpose.xlu1.b32.cont [10/16] (narrow) %v2014_v47, 8 }
 0x5b4   : > { %2030 = vxpose.xlu0.b32.cont [10/16] (narrow) %v1998_v48, 8 }
 0x5b7   : > { %2063 = vxpose.xlu1.b32.cont [11/16] (narrow) %v2015_v49, 8 }
 0x5b8   : > { %2031 = vxpose.xlu0.b32.cont [11/16] (narrow) %v1999_v50, 8 }
 0x5bb   : > { %2064 = vxpose.xlu1.b32.cont [12/16] (narrow) %v2016_v51, 8 }
 0x5bc   : > { %2032 = vxpose.xlu0.b32.cont [12/16] (narrow) %v2000_v52, 8 }
 0x5bf   : > { %2065 = vxpose.xlu1.b32.cont [13/16] (narrow) %v2017_v53, 8 }
 0x5c0   : > { %2033 = vxpose.xlu0.b32.cont [13/16] (narrow) %v2001_v11, 8 }
 0x5c3   : > { %2066 = vxpose.xlu1.b32.cont [14/16] (narrow) %v2018_v13, 8 }
 0x5c4   : > { %2034 = vxpose.xlu0.b32.cont [14/16] (narrow) %v2002_v54, 8 }
 0x5c7   : > { %2067 = vxpose.xlu1.b32.cont [15/16] (narrow) %v2019_v23, 8 }
 0x5c8   : > { %2035 = vxpose.xlu0.b32.cont [15/16] (narrow) %v2003_v57, 8 }
 0x5cb   : > { %2068 = vxpose.xlu1.b32.end [16/16] (narrow) %v2020_v62, 8 }
 0x5cc   : > { %2036 = vxpose.xlu0.b32.end [16/16] (narrow) %v2004_v3, 8 }
 0x60f   : > { %v2069_v5 = vpop.trf.xlu1 }
 0x610   : > { %v2037_v19 = vpop.trf.xlu0 }
 0x611   : > { %v2087_v12 = vcombine.low %v2037_v19, %v2069_v5 }
 0x613   : > { %v2094_v16 = vrot.slane %v2087_v12, %v2093_v10 }
 0x615   : > { %v2101_v2 = vrot.slane %v2094_v16, %v2093_v10 }
 0x617   : > { %2107 = vst.msk [vmem:[%s399_s23] sm:$0x3] %vm2105_vm3, %v2101_v2 }
 0x618 PF: > { %s2263_s20 = sshll.u32 %s2645_s21, 5  ;;  %s2123_s26 = sshll.u32 %s399_s23, 4  ;;  %s2124_s26 = int_to_ptr.vmem [resolvable:$true] %s2123_s26 }
 0x619   : > { %s3446_s15 = scalar_lea.hbm %s3508_s11, %s2263_s20  ;;  %s3523_s27 = sand.u32 1, %s2633_s18  }
 0x61a   : > { %s2109_s2 = scalar_lea.sflag [#allocation4], %s3523_s27  ;;  %s2563_s16 = scalar_lea.vmem %s2124_s26, 32 }
 0x61b   : > { %p2564_p4 = scmp.ne.s32.totalorder %s2124_s26, %s2563_s16  ;;  %s2663_s25 = smov [#allocation3]  }
 0x61c   : > { %s2567_s13 = sshll.u32 %s2663_s25, 4  ;;  %s2568_s13 = int_to_ptr.vmem [resolvable:$false] %s2567_s13 }
 0x61d   : > { %p2565_p5 = pnand %p2564_p4, %p2773_p3  ;;  %s2569_s0 = scalar_lea.vmem %s2568_s13, 64 }
 0x61e   : > { %p2570_p7 = scmp.lt.s32.totalorder %s2124_s26, %s2568_s13  ;;  %p2571_p8 = scmp.lt.s32.totalorder %s2569_s0, %s2563_s16 }
 0x61f   : > { %p2566_p6 = pneg %p2565_p5 }
 0x620   : > { %p2572_p10 = por %p2571_p8, %p2570_p7 }
 0x622   : > { %p2573_p11 = pnand %p2572_p10, %p2566_p6 }
 0x624   : > { %2576 = shalt.err (!%p2573_p11)
}
 0x625   : > { %s2577_s21 = scalar_lea.hbm %s3446_s15, 32  ;;  %s2581_s20 = scalar_lea.hbm %s3508_s11, 64 }
 0x626   : > { %p2578_p12 = scmp.ne.s32.totalorder %s3446_s15, %s2577_s21  ;;  %p2582_p1 = scmp.lt.u32.totalorder %s3446_s15, %s3508_s11 }
 0x627   : > { %p2583_p2 = scmp.lt.u32.totalorder %s2581_s20, %s2577_s21  ;;  %p2585_p5 = scmp.lt.u32.totalorder %s2577_s21, %s3446_s15 }
 0x628   : > { %p2579_p13 = pnand %p2578_p12, %p2773_p3 }
 0x629   : > { %p2584_p4 = por %p2583_p2, %p2582_p1 }
 0x62a   : > { %p2580_p0 = pneg %p2579_p13 }
 0x62b   : > { %p2586_p6 = por %p2585_p5, %p2584_p4 }
 0x62d   : > { %p2587_p7 = pnand %p2586_p6, %p2580_p0 }
 0x62f   : > { %2590 = shalt.err (!%p2587_p7)
}
 0x630   : > { %2436 = dma.vmem_to_hbm [thread:$0]  (%p2773_p3), %s2124_s26, 32, %s3446_s15, %s2109_s2  }
 0x631 PF: > { %p2442_p8 = scmp.ge.s32.totalorder %s2657_s24, 2  ;;  %s2135_s0 = sand.u32 1, %s2629_s17  }
 0x632   : > { %s2136_s27 = scalar_lea.sflag [#allocation4], %s2135_s0 }
 0x633   : > { %p2439_p10 = pnand %p2442_p8, %p2783_p9 }
 0x635   : > { %2624 = dma.done.wait (!%p2439_p10), %s2136_s27, 32  }
 0x636   : > { %2626 = vsyncadd (!%p2439_p10), %s2136_s27, 4294967264  ;;  %s24_s24 = sadd.s32 1, %s2657_s24   ;;  %s3524_s21 = sld [smem:[#allocation6_spill]] }
 0x637   : > { %p21_p11 = scmp.ge.s32.totalorder %s24_s24, 6   ;;  %s3525_s29 = sld [smem:[#allocation7_spill]] }
 0x638   : > { %s3526_s23 = sld [smem:[#allocation8_spill]]  ;;  %s3527_s17 = smov %s2633_s18 }
 0x639   : > { %s3528_s18 = smov %s2637_s19  ;;  %s3529_s19 = smov %s2791_s14 }
 0x63a   : > { %s3530_s20 = smov %s2649_s22  ;;  %23 = sbr.rel (!%p21_p11) target bundleno = 9 (0x9), region = 111 }
 0x63d   : > { %s3531_s22 = smov %s3525_s29 }
 0x641   :  { %2141 = vsyncpa [#allocation4], 1 }
 0x642   :  { %2143 = vsyncpa [#allocation4 + $0x1], 1 }

// kernel: tpu_custom_call.1
= control target key start
LH: loop header
LB: loop body
LE: loop exit
PB: predicated region body
PF: predicated region fallthrough
CT: control target
= control target key end

     0   :  { %s3497_s0 = inlined_call_operand.vmem [shape: f32[2,3,256], index: 0, kind: input, shape index: {}]   ;;  %s3498_s1 = inlined_call_operand.vmem [shape: f32[64,3], index: 1, kind: input, shape index: {}]   ;;  %s3499_s2 = inlined_call_operand.vmem [shape: f32[64,1], index: 2, kind: input, shape index: {}]   ;;  %s3500_s3 = inlined_call_operand.vmem [shape: bf16[64,64], index: 3, kind: input, shape index: {}]   ;;  %s3501_s4 = inlined_call_operand.vmem [shape: f32[64,1], index: 4, kind: input, shape index: {}]   ;;  %s3502_s5 = inlined_call_operand.vmem [shape: bf16[64,64], index: 5, kind: input, shape index: {}]   ;;  %s3503_s6 = inlined_call_operand.vmem [shape: f32[64,1], index: 6, kind: input, shape index: {}]   ;;  %s3504_s7 = inlined_call_operand.vmem [shape: bf16[128,64], index: 7, kind: input, shape index: {}]   ;;  %s3505_s8 = inlined_call_operand.vmem [shape: f32[128,1], index: 8, kind: input, shape index: {}]   ;;  %s3506_s9 = inlined_call_operand.vmem [shape: bf16[256,128], index: 9, kind: input, shape index: {}]   ;;  %s3507_s10 = inlined_call_operand.vmem [shape: f32[256,1], index: 10, kind: input, shape index: {}]   ;;  %s3508_s11 = inlined_call_operand.hbm [shape: f32[2,1,256], index: 11, kind: output, shape index: {}]  }
   0x1   :  { %3512 = sst [smem:[#allocation9_spill]] %s3497_s0 }
   0x2   :  { %3513 = sst [smem:[#allocation10_spill]] %s3498_s1 }
   0x3   :  { %3514 = sst [smem:[#allocation11_spill]] %s3499_s2 }
   0x4   :  { %16 = vsyncpa [#allocation4], 0 }
   0x5   :  { %18 = vsyncpa [#allocation4 + $0x1], 0  ;;  %s2724_s17 = smov 0   ;;  %s2726_s18 = smov 0  }
   0x6   :  { %s2728_s19 = smov 0   ;;  %s2730_s20 = smov 0  }
   0x7   :  { %s2732_s21 = smov 0   ;;  %s2734_s22 = smov 0  }
   0x8   :  { %s2736_s23 = smov 0   ;;  %s2738_s24 = smov 0  }
   0x9 LB: > { %3515 = sst [smem:[#allocation6_spill]] %s2653_s23  ;;  %s2199_s25 = sadd.s32 4294967295, %s2657_s24   ;;  %s2657_s24 = sphi %s2738_s24, %s24_s24   ;;  %s2653_s23 = sphi %s2736_s23, %s3526_s23   ;;  %s2649_s22 = sphi %s2734_s22, %s3531_s22   ;;  %s2645_s21 = sphi %s2732_s21, %s3524_s21   ;;  %s2641_s20 = sphi %s2730_s20, %s3530_s20   ;;  %s2637_s19 = sphi %s2728_s19, %s3529_s19   ;;  %s2633_s18 = sphi %s2726_s18, %s3528_s18   ;;  %s2629_s17 = sphi %s2724_s17, %s3527_s17  }
   0xa   : > { %s2200_s26 = sadd.s32 4294967294, %s2657_s24   ;;  %s33_s27 = sadd.s32 1, %s2649_s22 }
   0xb   : > { %p34_p0 = scmp.ge.s32.totalorder %s33_s27, 2  ;;  %s36_s28 = sadd.s32 1, %s2653_s23 }
   0xc   : > { %p291_p1 = scmp.ne.s32.totalorder %s2637_s19, %s2633_s18  ;;  %p292_p2 = scmp.eq.s32.totalorder %s2199_s25, 3 }
   0xd   : > { %s3533_s27 = smov (%p34_p0, %s33_s27), 0  ;;  %s3535_s28 = smov (!%p34_p0, %s36_s28), %s2653_s23 }
   0xe   : > { %3516 = sst [smem:[#allocation7_spill]] %s3533_s27  ;;  %p2773_p3 = por %p292_p2, %p291_p1 }
   0xf   : > { %p297_p4 = scmp.ne.s32.totalorder %s2633_s18, %s2629_s17  ;;  %p38_p5 = scmp.ge.s32.totalorder %s3535_s28, 2 }
  0x10   : > { %p298_p6 = scmp.eq.s32.totalorder %s2200_s26, 3  ;;  %p2203_p7 = scmp.ge.s32.totalorder %s2657_s24, 1 }
  0x11   : > { %p357_p8 = scmp.lt.s32.totalorder %s2657_s24, 5  ;;  %s3537_s28 = smov (%p38_p5, %s3535_s28), 0 }
  0x12   : > { %3518 = sst [smem:[#allocation8_spill]] %s3537_s28  ;;  %p2783_p9 = por %p298_p6, %p297_p4 }
  0x13   : > { %p358_p10 = pnand %p2203_p7, %p357_p8  ;;  %s278_s12 = ssub.s32 %s2653_s23, %s3537_s28 }
  0x14   : > { %s281_s13 = sadd.s32 1, %s2637_s19  ;;  %p279_p11 = scmp.eq.s32.totalorder %s278_s12, 0  ;;  %v2659_v2 = vmov (!%p358_p10), 0   ;;  %v2660_v7 = vmov (!%p358_p10), 1   ;;  %v2661_v11 = vmov (!%p358_p10), 2   ;;  %v652_v18 = vld [vmem:[%s3501_s4 + $0x10] sm:$0xff] (!%p358_p10)  ;;  %v466_v60 = vlaneseq (!%p358_p10) }
  0x15   : > { %361 = sbr.rel (%p358_p10) target bundleno = 1585 (0x631), region = 64  ;;  %s3520_s2 = sld [smem:[#allocation11_spill]] (!%p358_p10)  ;;  %2512 = vset.pattern.permute.xlu1 (!%p358_p10), %v2659_v2  ;;  %2511 = vset.pattern.permute.xlu0 (!%p358_p10), %v2659_v2  ;;  %v655_v19 = vld [vmem:[%s3501_s4 + $0x28] sm:$0xff] (!%p358_p10)  ;;  %v657_v21 = vld [vmem:[%s3501_s4 + $0x38] sm:$0xff] (!%p358_p10)  ;;  %v650_v24 = vld [vmem:[%s3501_s4] sm:$0xff] (!%p358_p10)  ;;  %vm718_vm0 = vcmask (!%p358_p10), 523264  }
  0x16   : > { %s2791_s14 = scalar_select %p279_p11, %s2637_s19, %s281_s13  }
  0x17   : > { %s3521_s1 = sld [smem:[#allocation10_spill]] (!%p358_p10)  ;;  %s3510_s28 = sand.u32 (!%p358_p10), 1, %s2633_s18   ;;  %v817_v22 = vld [vmem:[%s3503_s6 + $0x8] sm:$0xff] (!%p358_p10)  ;;  %v819_v23 = vld [vmem:[%s3503_s6 + $0x18] sm:$0xff] (!%p358_p10)  ;;  %v2531_v28 = vld [vmem:[%s3500_s3] sm:$0xff] (!%p358_p10)  }
  0x18   : > { %s2843_s12 = sshll.u32 (!%p358_p10), %s3510_s28, 1  ;;  %v821_v25 = vld [vmem:[%s3503_s6 + $0x28] sm:$0xff] (!%p358_p10)  ;;  %v823_v26 = vld [vmem:[%s3503_s6 + $0x38] sm:$0xff] (!%p358_p10)  ;;  %2324 = vmatprep.mubr.msk.bf16.mxu0 (!%p358_p10), %vm718_vm0, %v2531_v28  ;;  %v654_v32 = vld [vmem:[%s3501_s4 + $0x20] sm:$0xff] (!%p358_p10)  ;;  %p400_p12 = scmp.lt.s32.totalorder (!%p358_p10), %s2645_s21, 1 }
  0x19   : > { %v651_v27 = vld [vmem:[%s3501_s4 + $0x8] sm:$0xff] (!%p358_p10)  ;;  %v653_v30 = vld [vmem:[%s3501_s4 + $0x18] sm:$0xff] (!%p358_p10)  ;;  %v656_v34 = vld [vmem:[%s3501_s4 + $0x30] sm:$0xff] (!%p358_p10)  ;;  %p402_p13 = scmp.lt.s32.totalorder (!%p358_p10), %s2641_s20, 1  ;;  %s3522_s0 = sld [smem:[#allocation9_spill]] (!%p358_p10) }
  0x1a   : > { %v990_v29 = vld [vmem:[%s3505_s8 + $0x8] sm:$0xff] (!%p358_p10)  ;;  %v992_v31 = vld [vmem:[%s3505_s8 + $0x18] sm:$0xff] (!%p358_p10)  ;;  %v816_v36 = vld [vmem:[%s3503_s6] sm:$0xff] (!%p358_p10)  ;;  %s399_s23 = scalar_lea.vmem (!%p358_p10), [#allocation3], %s2843_s12  ;;  %p2255_p0 = scmp.ne.s32.totalorder (!%p358_p10), %s2641_s20, 0 }
  0x1b   : > { %v418_v0 = vld [vmem:[%s3520_s2] sm:$0xff] (!%p358_p10)  ;;  %v419_v3 = vld [vmem:[%s3520_s2 + $0x8] sm:$0xff] (!%p358_p10)  ;;  %v420_v6 = vld [vmem:[%s3520_s2 + $0x10] sm:$0xff] (!%p358_p10) }
  0x1c   : > { %480 = vperm.xlu1 %2512, %v418_v0   ;;  %v422_v10 = vld [vmem:[%s3520_s2 + $0x20] sm:$0xff]  ;;  %v421_v13 = vld [vmem:[%s3520_s2 + $0x18] sm:$0xff]  ;;  %v424_v14 = vld [vmem:[%s3520_s2 + $0x30] sm:$0xff]  ;;  %s403_s16 = scalar_select %p402_p13, %s2641_s20, 1 }
  0x1d   : > { %v410_v1 = vld [vmem:[%s3521_s1] sm:$0xff]  ;;  %v411_v4 = vld [vmem:[%s3521_s1 + $0x8] sm:$0xff]  ;;  %v413_v5 = vld [vmem:[%s3521_s1 + $0x18] sm:$0xff]  ;;  %vm1851_vm1 = vcmask (!%p2255_p0), 7168  }
  0x1e   : > { %428 = vperm.xlu0 %2511, %v410_v1   ;;  %v412_v8 = vld [vmem:[%s3521_s1 + $0x10] sm:$0xff]  ;;  %v415_v9 = vld [vmem:[%s3521_s1 + $0x28] sm:$0xff]  ;;  %v417_v12 = vld [vmem:[%s3521_s1 + $0x38] sm:$0xff] }
  0x1f   : > { %v414_v15 = vld [vmem:[%s3521_s1 + $0x20] sm:$0xff]  ;;  %v416_v16 = vld [vmem:[%s3521_s1 + $0x30] sm:$0xff]  ;;  %v423_v17 = vld [vmem:[%s3520_s2 + $0x28] sm:$0xff] }
  0x20   : > { %485 = vperm.xlu1 %2512, %v419_v3   ;;  %v425_v20 = vld [vmem:[%s3520_s2 + $0x38] sm:$0xff]  ;;  %v994_v33 = vld [vmem:[%s3505_s8 + $0x28] sm:$0xff]  ;;  %v818_v38 = vld [vmem:[%s3503_s6 + $0x10] sm:$0xff]  ;;  %s401_s2 = scalar_select %p400_p12, %s2645_s21, 1 }
  0x21   : > { %v996_v35 = vld [vmem:[%s3505_s8 + $0x38] sm:$0xff]  ;;  %v998_v37 = vld [vmem:[%s3505_s8 + $0x48] sm:$0xff]  ;;  %v820_v40 = vld [vmem:[%s3503_s6 + $0x20] sm:$0xff] }
  0x22   : > { %433 = vperm.xlu0 %2511, %v411_v4   ;;  %v1000_v39 = vld [vmem:[%s3505_s8 + $0x58] sm:$0xff]  ;;  %v1002_v41 = vld [vmem:[%s3505_s8 + $0x68] sm:$0xff]  ;;  %v822_v42 = vld [vmem:[%s3503_s6 + $0x30] sm:$0xff]  ;;  %s2205_s25 = sshll.u32 %s401_s2, 1 }
  0x23   : > { %v1004_v43 = vld [vmem:[%s3505_s8 + $0x78] sm:$0xff]  ;;  %v989_v44 = vld [vmem:[%s3505_s8] sm:$0xff]  ;;  %v1303_v45 = vld [vmem:[%s3507_s10 + $0x8] sm:$0xff]  ;;  %s405_s1 = sadd.s32 %s2205_s25, %s403_s16 }
  0x24   : > { %2513 = vset.pattern.permute.xlu1 %v2660_v7  ;;  %v991_v48 = vld [vmem:[%s3505_s8 + $0x10] sm:$0xff]  ;;  %v1305_v49 = vld [vmem:[%s3507_s10 + $0x18] sm:$0xff]  ;;  %v993_v52 = vld [vmem:[%s3505_s8 + $0x20] sm:$0xff]  ;;  %s2206_s2 = sshll.u32 %s405_s1, 2 }
  0x25   : > { %531 = vperm.xlu1 %2513, %v411_v4   ;;  %v1307_v53 = vld [vmem:[%s3507_s10 + $0x28] sm:$0xff]  ;;  %v995_v56 = vld [vmem:[%s3505_s8 + $0x30] sm:$0xff]  ;;  %v1309_v57 = vld [vmem:[%s3507_s10 + $0x38] sm:$0xff]  ;;  %s407_s28 = scalar_lea.vmem %s3522_s0, %s2206_s2 }
  0x26   : > { %443 = vperm.xlu0 %2511, %v413_v5   ;;  %v997_v59 = vld [vmem:[%s3505_s8 + $0x40] sm:$0xff]  ;;  %v1311_v62 = vld [vmem:[%s3507_s10 + $0x48] sm:$0xff]  ;;  %v999_v0 = vld [vmem:[%s3505_s8 + $0x50] sm:$0xff] }
  0x27   : > { %v1313_v3 = vld [vmem:[%s3507_s10 + $0x58] sm:$0xff] }
  0x29   : > { %2514 = vset.pattern.permute.xlu1 %v2659_v2 }
  0x2a   : > { %490 = vperm.xlu0 %2511, %v420_v6   ;;  %438 = vperm.xlu1 %2514, %v412_v8  }
  0x2e   : > { %453 = vperm.xlu0 %2511, %v415_v9   ;;  %2515 = vset.pattern.permute.xlu1 %v2661_v11 }
  0x2f   : > { %579 = vperm.xlu1 %2515, %v410_v1  }
  0x32   : > { %500 = vperm.xlu0 %2511, %v422_v10   ;;  %v1315_v10 = vld [vmem:[%s3507_s10 + $0x68] sm:$0xff] }
  0x33   : > { %583 = vperm.xlu1 %2515, %v411_v4  }
  0x36   : > { %463 = vperm.xlu0 %2511, %v417_v12  }
  0x37   : > { %2516 = vset.pattern.permute.xlu1 %v2659_v2 }
  0x38   : > { %495 = vperm.xlu1 %2516, %v421_v13  }
  0x3a   : > { %510 = vperm.xlu0 %2511, %v424_v14  }
  0x3c   : > { %2517 = vset.pattern.permute.xlu1 %v2660_v7 }
  0x3d   : > { %539 = vperm.xlu1 %2517, %v413_v5  }
  0x3e   : > { %2524 = vset.pattern.permute.xlu0 %v2660_v7 }
  0x3f   : > { %527 = vperm.xlu0 %2524, %v410_v1   ;;  %v2978_v1 = vshrl.u32 %v466_v60, 7 }
  0x41   : > { %2518 = vset.pattern.permute.xlu1 %v2659_v2  ;;  %v468_v6 = vsub.s32 0, %v2978_v1 }
  0x42   : > { %448 = vperm.xlu1 %2518, %v414_v15  }
  0x43   : > { %535 = vperm.xlu0 %2524, %v412_v8  }
  0x46   : > { %2519 = vset.pattern.permute.xlu1 %v2661_v11 }
  0x47   : > { %543 = vperm.xlu0 %2524, %v414_v15   ;;  %587 = vperm.xlu1 %2519, %v412_v8   ;;  %v409_v8 = vld [vmem:[%s407_s28] sm:$0x7] }
  0x48   : > { %v3001_v13 = vrot.slane %v409_v8, %v468_v6 }
  0x4b   : > { %551 = vperm.xlu0 %2524, %v416_v16   ;;  %591 = vperm.xlu1 %2519, %v413_v5   ;;  %v1001_v5 = vld [vmem:[%s3505_s8 + $0x60] sm:$0xff] }
  0x4f   : > { %2528 = vset.pattern.permute.xlu0 %v2661_v11  ;;  %2520 = vset.pattern.permute.xlu1 %v2659_v2 }
  0x50   : > { %607 = vperm.xlu0 %2528, %v417_v12   ;;  %505 = vperm.xlu1 %2520, %v423_v17  }
  0x54   : > { %2530 = vset.pattern.permute.xlu0 %v2659_v2  ;;  %2521 = vset.pattern.permute.xlu1 %v2660_v7 }
  0x55   : > { %547 = vperm.xlu1 %2521, %v415_v9   ;;  %670 = vperm.xlu0 %2530, %v652_v18  }
  0x59   : > { %2522 = vset.pattern.permute.xlu1 %v2659_v2  ;;  %685 = vperm.xlu0 %2530, %v655_v19  }
  0x5a   : > { %458 = vperm.xlu1 %2522, %v416_v16  }
  0x5d   : > { %695 = vperm.xlu0 %2530, %v657_v21  }
  0x5e   : > { %2523 = vset.pattern.permute.xlu1 %v2661_v11 }
  0x5f   : > { %595 = vperm.xlu1 %2523, %v414_v15   ;;  %v612_v15 = vsub.s32 2, %v2978_v1 }
  0x61   : > { %831 = vperm.xlu0 %2530, %v817_v22  }
  0x63   : > { %599 = vperm.xlu1 %2523, %v415_v9  }
  0x65   : > { %841 = vperm.xlu0 %2530, %v819_v23   ;;  %v3017_v23 = vrot.slane %v409_v8, %v612_v15  ;;  %v1316_v15 = vld [vmem:[%s3507_s10 + $0x70] sm:$0xff] }
  0x67   : > { %2525 = vset.pattern.permute.xlu1 %v2659_v2 }
  0x68   : > { %515 = vperm.xlu1 %2525, %v425_v20   ;;  %v1302_v20 = vld [vmem:[%s3507_s10] sm:$0xff] }
  0x69   : > { %851 = vperm.xlu0 %2530, %v821_v25  }
  0x6c   : > { %2526 = vset.pattern.permute.xlu1 %v2660_v7  ;;  %v560_v7 = vsub.s32 1, %v2978_v1 }
  0x6d   : > { %555 = vperm.xlu1 %2526, %v417_v12   ;;  %861 = vperm.xlu0 %2530, %v823_v26   ;;  %v1003_v12 = vld [vmem:[%s3505_s8 + $0x70] sm:$0xff] }
  0x6e   : > { %v3003_v14 = vrot.slane %v409_v8, %v560_v7  ;;  %v1314_v8 = vld [vmem:[%s3507_s10 + $0x60] sm:$0xff] }
  0x71   : > { %2527 = vset.pattern.permute.xlu1 %v2661_v11  ;;  %1012 = vperm.xlu0 %2530, %v990_v29   ;;  %v1304_v29 = vld [vmem:[%s3507_s10 + $0x10] sm:$0xff] }
  0x72   : > { %603 = vperm.xlu1 %2527, %v416_v16   ;;  %v1317_v16 = vld [vmem:[%s3507_s10 + $0x78] sm:$0xff] }
  0x75   : > { %1022 = vperm.xlu0 %2530, %v992_v31  }
  0x76   : > { %2529 = vset.pattern.permute.xlu1 %v2659_v2 }
  0x77   : > { %660 = vperm.xlu1 %2529, %v650_v24   ;;  %v1319_v24 = vld [vmem:[%s3507_s10 + $0x88] sm:$0xff] }
  0x79   : > { %1032 = vperm.xlu0 %2530, %v994_v33   ;;  %v1321_v33 = vld [vmem:[%s3507_s10 + $0x98] sm:$0xff] }
  0x7b   : > { %665 = vperm.xlu1 %2529, %v651_v27  }
  0x7d   : > { %1042 = vperm.xlu0 %2530, %v996_v35  }
  0x7f   : > { %675 = vperm.xlu1 %2529, %v653_v30  }
  0x81   : > { %1052 = vperm.xlu0 %2530, %v998_v37   ;;  %v1306_v37 = vld [vmem:[%s3507_s10 + $0x20] sm:$0xff] }
  0x83   : > { %680 = vperm.xlu1 %2529, %v654_v32  }
  0x85   : > { %1062 = vperm.xlu0 %2530, %v1000_v39  }
  0x87   : > { %690 = vperm.xlu1 %2529, %v656_v34  }
  0x89   : > { %1072 = vperm.xlu0 %2530, %v1002_v41   ;;  %v1323_v41 = vld [vmem:[%s3507_s10 + $0xa8] sm:$0xff] }
  0x8b   : > { %826 = vperm.xlu1 %2529, %v816_v36  }
  0x8d   : > { %1082 = vperm.xlu0 %2530, %v1004_v43  }
  0x8f   : > { %836 = vperm.xlu1 %2529, %v818_v38  }
  0x91   : > { %1341 = vperm.xlu0 %2530, %v1303_v45   ;;  %v1308_v45 = vld [vmem:[%s3507_s10 + $0x30] sm:$0xff] }
  0x93   : > { %846 = vperm.xlu1 %2529, %v820_v40  }
  0x95   : > { %1351 = vperm.xlu0 %2530, %v1305_v49  }
  0x97   : > { %856 = vperm.xlu1 %2529, %v822_v42  }
  0x99   : > { %1361 = vperm.xlu0 %2530, %v1307_v53  }
  0x9b   : > { %v2938_v46 = vpop.permute.xlu1 %480  ;;  %1007 = vperm.xlu1 %2529, %v989_v44  }
  0x9d   : > { %v429_v47 = vpop.permute.xlu0 %428  ;;  %1371 = vperm.xlu0 %2530, %v1309_v57  }
  0x9e   : > { %v470_v21 = vmul.f32 %v3001_v13, %v429_v47 }
  0x9f   : > { %v486_v50 = vpop.permute.xlu1 %485  ;;  %1017 = vperm.xlu1 %2529, %v991_v48  }
  0xa0   : > { %v518_v30 = vadd.f32 %v2938_v46, %v470_v21 }
  0xa1   : > { %v434_v51 = vpop.permute.xlu0 %433  ;;  %1381 = vperm.xlu0 %2530, %v1311_v62  }
  0xa2   : > { %v471_v17 = vmul.f32 %v3001_v13, %v434_v51 }
  0xa3   : > { %1027 = vperm.xlu1 %2529, %v993_v52  }
  0xa4   : > { %v532_v55 = vpop.permute.xlu1 %531  ;;  %v519_v25 = vadd.f32 %v486_v50, %v471_v17  ;;  %v1325_v50 = vld [vmem:[%s3507_s10 + $0xb8] sm:$0xff]  ;;  %v1318_v17 = vld [vmem:[%s3507_s10 + $0x80] sm:$0xff] }
  0xa5   : > { %v2955_v54 = vpop.permute.xlu0 %443  ;;  %1391 = vperm.xlu0 %2530, %v1313_v3   ;;  %v563_v22 = vmul.f32 %v3003_v14, %v532_v55  ;;  %v1329_v3 = vld [vmem:[%s3507_s10 + $0xd8] sm:$0xff] }
  0xa6   : > { %v473_v46 = vmul.f32 %v3001_v13, %v2955_v54  ;;  %v1310_v54 = vld [vmem:[%s3507_s10 + $0x40] sm:$0xff] }
  0xa7   : > { %1037 = vperm.xlu1 %2529, %v995_v56   ;;  %v571_v31 = vadd.f32 %v563_v22, %v519_v25  ;;  %v1320_v22 = vld [vmem:[%s3507_s10 + $0x90] sm:$0xff] }
  0xa9   : > { %v2964_v58 = vpop.permute.xlu0 %490  ;;  %v439_v61 = vpop.permute.xlu1 %438  ;;  %1401 = vperm.xlu0 %2530, %v1315_v10   ;;  %v1331_v10 = vld [vmem:[%s3507_s10 + $0xe8] sm:$0xff] }
  0xaa   : > { %v472_v42 = vmul.f32 %v3001_v13, %v439_v61 }
  0xab   : > { %1047 = vperm.xlu1 %2529, %v997_v59   ;;  %v1327_v59 = vld [vmem:[%s3507_s10 + $0xc8] sm:$0xff] }
  0xac   : > { %v520_v51 = vadd.f32 %v2964_v58, %v472_v42 }
  0xad   : > { %v2972_v63 = vpop.permute.xlu0 %453  ;;  %1411 = vperm.xlu0 %2530, %v1317_v16   ;;  %v1333_v16 = vld [vmem:[%s3507_s10 + $0xf8] sm:$0xff] }
  0xae   : > { %v580_v2 = vpop.permute.xlu1 %579 }
  0xaf   : > { %1057 = vperm.xlu1 %2529, %v999_v0   ;;  %v614_v34 = vmul.f32 %v3017_v23, %v580_v2  ;;  %v1312_v0 = vld [vmem:[%s3507_s10 + $0x50] sm:$0xff] }
  0xb1   : > { %v2986_v4 = vpop.permute.xlu0 %500  ;;  %1421 = vperm.xlu0 %2530, %v1319_v24  }
  0xb2   : > { %v584_v9 = vpop.permute.xlu1 %583 }
  0xb3   : > { %1067 = vperm.xlu1 %2529, %v1001_v5   ;;  %v615_v26 = vmul.f32 %v3017_v23, %v584_v9 }
  0xb5   : > { %v2996_v11 = vpop.permute.xlu0 %463  ;;  %v623_v35 = vadd.f32 %v615_v26, %v571_v31  ;;  %1431 = vperm.xlu0 %2530, %v1321_v33  }
  0xb7   : > { %v496_v18 = vpop.permute.xlu1 %495  ;;  %1077 = vperm.xlu1 %2529, %v1003_v12   ;;  %v631_v44 = vmax.f32 %v623_v35, 0.0 }
  0xb8   : > { %v521_v55 = vadd.f32 %v496_v18, %v473_v46 }
  0xb9   : > { %v3010_v19 = vpop.permute.xlu0 %510  ;;  %1441 = vperm.xlu0 %2530, %v1323_v41   ;;  %v1326_v41 = vld [vmem:[%s3507_s10 + $0xc0] sm:$0xff] }
  0xbb   : > { %1336 = vperm.xlu1 %2529, %v1302_v20  }
  0xbc   : > { %v540_v27 = vpop.permute.xlu1 %539 }
  0xbd   : > { %v565_v52 = vmul.f32 %v3003_v14, %v540_v27  ;;  %1451 = vperm.xlu0 %2530, %v1325_v50   ;;  %v475_v27 = vmul.f32 %v3001_v13, %v2972_v63  ;;  %v1324_v63 = vld [vmem:[%s3507_s10 + $0xb0] sm:$0xff] }
  0xbe   : > { %v528_v28 = vpop.permute.xlu0 %527 }
  0xbf   : > { %v562_v32 = vmul.f32 %v3003_v14, %v528_v28  ;;  %1346 = vperm.xlu1 %2529, %v1304_v29   ;;  %v573_v58 = vadd.f32 %v565_v52, %v521_v55 }
  0xc1   : > { %v570_v36 = vadd.f32 %v562_v32, %v518_v30  ;;  %v449_v38 = vpop.permute.xlu1 %448  ;;  %1461 = vperm.xlu0 %2530, %v1327_v59   ;;  %v1322_v30 = vld [vmem:[%s3507_s10 + $0xa0] sm:$0xff] }
  0xc2   : > { %v536_v40 = vpop.permute.xlu0 %535  ;;  %v474_v18 = vmul.f32 %v3001_v13, %v449_v38 }
  0xc3   : > { %v622_v39 = vadd.f32 %v614_v34, %v570_v36  ;;  %1356 = vperm.xlu1 %2529, %v1306_v37   ;;  %v564_v47 = vmul.f32 %v3003_v14, %v536_v40 }
  0xc4   : > { %v522_v24 = vadd.f32 %v2986_v4, %v474_v18 }
  0xc5   : > { %v630_v43 = vmax.f32 %v622_v39, 0.0  ;;  %v572_v56 = vadd.f32 %v564_v47, %v520_v51  ;;  %1471 = vperm.xlu0 %2530, %v1329_v3   ;;  %v1328_v47 = vld [vmem:[%s3507_s10 + $0xd0] sm:$0xff] }
  0xc6   : > { %v588_v49 = vpop.permute.xlu1 %587  ;;  %v544_v21 = vpop.permute.xlu0 %543 }
  0xc7   : > { %v646_v48 = vpack.c.bf16 %v631_v44, %v630_v43  ;;  %v616_v53 = vmul.f32 %v3017_v23, %v588_v49  ;;  %1366 = vperm.xlu1 %2529, %v1308_v45   ;;  %v566_v25 = vmul.f32 %v3003_v14, %v544_v21  ;;  %v477_v44 = vmul.f32 %v3001_v13, %v2996_v11  ;;  %v1330_v11 = vld [vmem:[%s3507_s10 + $0xe0] sm:$0xff] }
  0xc9   : > { %2316 = vmatprep.subr.bf16.mxu0 %v646_v48  ;;  %v624_v61 = vadd.f32 %v616_v53, %v572_v56  ;;  %1481 = vperm.xlu0 %2530, %v1331_v10   ;;  %v574_v31 = vadd.f32 %v566_v25, %v522_v24 }
  0xca   : > { %2317 = vmatpush3.bf16.msra.mxu0 %v646_v48  ;;  %v592_v57 = vpop.permute.xlu1 %591  ;;  %v552_v37 = vpop.permute.xlu0 %551 }
  0xcb   : > { %v617_v62 = vmul.f32 %v3017_v23, %v592_v57  ;;  %1376 = vperm.xlu1 %2529, %v1310_v54   ;;  %v632_v5 = vmax.f32 %v624_v61, 0.0  ;;  %v568_v51 = vmul.f32 %v3003_v14, %v552_v37  ;;  %v2532_v61 = vld [vmem:[%s3500_s3 + $0x8] sm:$0xff]  }
  0xcd   : > { %v625_v2 = vadd.f32 %v617_v62, %v573_v58  ;;  %1491 = vperm.xlu0 %2530, %v1333_v16   ;;  %v2534_v62 = vld [vmem:[%s3500_s3 + $0x18] sm:$0xff]  }
  0xcf   : > { %v633_v6 = vmax.f32 %v625_v2, 0.0  ;;  %v506_v7 = vpop.permute.xlu1 %505  ;;  %1386 = vperm.xlu1 %2529, %v1312_v0   ;;  %v608_v45 = vpop.permute.xlu0 %607  ;;  %v2535_v0 = vld [vmem:[%s3502_s5] sm:$0xff]  }
  0xd0   : > { %v523_v32 = vadd.f32 %v506_v7, %v475_v27  ;;  %v621_v52 = vmul.f32 %v3017_v23, %v608_v45  ;;  %2340 = vmatprep.mubr.msk.bf16.mxu1 %vm718_vm0, %v2535_v0  ;;  %v2539_v45 = vld [vmem:[%s3504_s7] sm:$0xff]  }
  0xd1   : > { %v647_v9 = vpack.c.bf16 %v633_v6, %v632_v5 }
  0xd3   : > { %2318 = vmatprep.subr.bf16.mxu0 %v647_v9  ;;  %1396 = vperm.xlu1 %2529, %v1314_v8  }
  0xd4   : > { %v548_v12 = vpop.permute.xlu1 %547  ;;  %2319 = vmatpush3.bf16.msra.mxu0 %v647_v9  ;;  %v671_v6 = vpop.permute.xlu0 %670 }
  0xd5   : > { %v567_v28 = vmul.f32 %v3003_v14, %v548_v12 }
  0xd7   : > { %1406 = vperm.xlu1 %2529, %v1316_v15   ;;  %v575_v34 = vadd.f32 %v567_v28, %v523_v32 }
  0xd8   : > { %v686_v18 = vpop.permute.xlu0 %685 }
  0xd9   : > { %v459_v20 = vpop.permute.xlu1 %458 }
  0xda   : > { %v476_v43 = vmul.f32 %v3001_v13, %v459_v20 }
  0xdb   : > { %1416 = vperm.xlu1 %2529, %v1318_v17  }
  0xdc   : > { %v524_v50 = vadd.f32 %v3010_v19, %v476_v43  ;;  %v1332_v19 = vld [vmem:[%s3507_s10 + $0xf0] sm:$0xff]  ;;  %v696_v32 = vpop.permute.xlu0 %695 }
  0xdd   : > { %v2537_v43 = vld [vmem:[%s3502_s5 + $0x10] sm:$0xff]  }
  0xde   : > { %v596_v26 = vpop.permute.xlu1 %595  ;;  %v576_v54 = vadd.f32 %v568_v51, %v524_v50 }
  0xdf   : > { %v618_v29 = vmul.f32 %v3017_v23, %v596_v26  ;;  %1426 = vperm.xlu1 %2529, %v1320_v22  }
  0xe1   : > { %v626_v4 = vadd.f32 %v618_v29, %v574_v31 }
  0xe2   : > { %v600_v33 = vpop.permute.xlu1 %599 }
  0xe3   : > { %v619_v35 = vmul.f32 %v3017_v23, %v600_v33  ;;  %1436 = vperm.xlu1 %2529, %v1322_v30   ;;  %v634_v38 = vmax.f32 %v626_v4, 0.0 }
  0xe5   : > { %v627_v36 = vadd.f32 %v619_v35, %v575_v34 }
  0xe7   : > { %v635_v39 = vmax.f32 %v627_v36, 0.0  ;;  %v516_v40 = vpop.permute.xlu1 %515  ;;  %1446 = vperm.xlu1 %2529, %v1324_v63  }
  0xe8   : > { %v525_v48 = vadd.f32 %v516_v40, %v477_v44  ;;  %v2538_v44 = vld [vmem:[%s3502_s5 + $0x18] sm:$0xff]  }
  0xe9   : > { %v648_v42 = vpack.c.bf16 %v635_v39, %v634_v38 }
  0xeb   : > { %2320 = vmatprep.subr.bf16.mxu0 %v648_v42  ;;  %1456 = vperm.xlu1 %2529, %v1326_v41  }
  0xec   : > { %v556_v46 = vpop.permute.xlu1 %555  ;;  %2321 = vmatpush3.bf16.msra.mxu0 %v648_v42  ;;  %v2536_v42 = vld [vmem:[%s3502_s5 + $0x8] sm:$0xff]  }
  0xed   : > { %v569_v49 = vmul.f32 %v3003_v14, %v556_v46 }
  0xef   : > { %v577_v53 = vadd.f32 %v569_v49, %v525_v48  ;;  %1466 = vperm.xlu1 %2529, %v1328_v47   ;;  %v832_v47 = vpop.permute.xlu0 %831 }
  0xf1   : > { %v604_v13 = vpop.permute.xlu1 %603  ;;  %v629_v55 = vadd.f32 %v621_v52, %v577_v53 }
  0xf2   : > { %v620_v56 = vmul.f32 %v3017_v23, %v604_v13  ;;  %v2533_v23 = vld [vmem:[%s3500_s3 + $0x10] sm:$0xff]  }
  0xf3   : > { %1476 = vperm.xlu1 %2529, %v1330_v11   ;;  %v637_v14 = vmax.f32 %v629_v55, 0.0  ;;  %v842_v49 = vpop.permute.xlu0 %841 }
  0xf4   : > { %v628_v57 = vadd.f32 %v620_v56, %v576_v54 }
  0xf6   : > { %v636_v59 = vmax.f32 %v628_v57, 0.0  ;;  %v661_v2 = vpop.permute.xlu1 %660 }
  0xf7   : > { %1486 = vperm.xlu1 %2529, %v1332_v19   ;;  %v852_v56 = vpop.permute.xlu0 %851 }
  0xf8   : > { %v649_v58 = vpack.c.bf16 %v637_v14, %v636_v59 }
  0xfa   : > { %2322 = vmatprep.subr.bf16.mxu0 %v649_v58  ;;  %v666_v3 = vpop.permute.xlu1 %665 }
  0xfb   : > { %2323 = vmatpush3.bf16.msra.mxu0 %v649_v58 }
  0xfe   : > { %2325 = vmatmul.mubr.msk.bf16.vlgmr.msra.gmra.mrb[0].mxu0 %vm718_vm0, %v2532_v61  ;;  %v676_v5 = vpop.permute.xlu1 %675 }
  0xff   : > { %2328 = vmatprep.mubr.msk.bf16.mxu0 %vm718_vm0, %v2533_v23 }
 0x102   : > { %v681_v10 = vpop.permute.xlu1 %680 }
 0x106   : > { %2329 = vmatmul.mubr.msk.bf16.gmra.mrb[4].mxu0 %vm718_vm0, %v2534_v62  ;;  %v691_v27 = vpop.permute.xlu1 %690 }
 0x107   : > { %2356 = vmatprep.mubr.msk.bf16.mxu0 %vm718_vm0, %v2539_v45 }
 0x10a   : > { %v827_v46 = vpop.permute.xlu1 %826 }
 0x10e   : > { %v837_v48 = vpop.permute.xlu1 %836 }
 0x112   : > { %v847_v53 = vpop.permute.xlu1 %846 }
 0x116   : > { %v857_v23 = vpop.permute.xlu1 %856 }
 0x1d1   : > { %v2326_v7 = vpop.f32.mrb[0].mxu0 }
 0x1d2   : > { %v774_v8 = vadd.f32 %v2326_v7, %v671_v6  ;;  %v765_v9 = vpop.f32.mrb[1].mxu0 }
 0x1d3   : > { %v766_v12 = vadd.f32 %v765_v9, %v661_v2  ;;  %v2327_v15 = vpop.f32.mrb[2].mxu0 }
 0x1d4   : > { %v777_v16 = vadd.f32 %v2327_v15, %v676_v5  ;;  %v768_v17 = vpop.f32.mrb[3].mxu0  ;;  %v798_v21 = vmax.f32 %v774_v8, 0.0  ;;  %v862_v5 = vpop.permute.xlu0 %861 }
 0x1d5   : > { %v769_v20 = vadd.f32 %v768_v17, %v666_v3  ;;  %v796_v24 = vmax.f32 %v766_v12, 0.0 }
 0x1d6   : > { %v799_v22 = vmax.f32 %v777_v16, 0.0 }
 0x1d7   : > { %v797_v25 = vmax.f32 %v769_v20, 0.0 }
 0x1d8   : > { %v813_v26 = vpack.c.bf16 %v799_v22, %v798_v21  ;;  %v2540_v21 = vld [vmem:[%s3504_s7 + $0x8] sm:$0xff]   ;;  %v2541_v22 = vld [vmem:[%s3504_s7 + $0x10] sm:$0xff]  }
 0x1d9   : > { %v2330_v28 = vpop.f32.mrb[4].mxu0  ;;  %v812_v29 = vpack.c.bf16 %v797_v25, %v796_v24  ;;  %v2542_v24 = vld [vmem:[%s3504_s7 + $0x18] sm:$0xff]   ;;  %v2543_v25 = vld [vmem:[%s3504_s7 + $0x20] sm:$0xff]  }
 0x1da   : > { %v790_v30 = vadd.f32 %v2330_v28, %v691_v27  ;;  %v781_v31 = vpop.f32.mrb[5].mxu0  ;;  %v2545_v27 = vld [vmem:[%s3504_s7 + $0x30] sm:$0xff]   ;;  %v2546_v28 = vld [vmem:[%s3504_s7 + $0x38] sm:$0xff]  }
 0x1db   : > { %v782_v33 = vadd.f32 %v781_v31, %v681_v10  ;;  %v2331_v34 = vpop.f32.mrb[6].mxu0  ;;  %2332 = vmatprep.subr.bf16.mxu1 %v812_v29  ;;  %v1008_v31 = vpop.permute.xlu1 %1007 }
 0x1dc   : > { %v793_v4 = vadd.f32 %v2331_v34, %v696_v32  ;;  %v784_v35 = vpop.f32.mrb[7].mxu0  ;;  %2333 = vmatpush3.bf16.msra.mxu1 %v812_v29  ;;  %v802_v36 = vmax.f32 %v790_v30, 0.0  ;;  %v2547_v29 = vld [vmem:[%s3506_s9] sm:$0xff]   ;;  %v2548_v30 = vld [vmem:[%s3506_s9 + $0x30] sm:$0xff]   ;;  %v1013_v32 = vpop.permute.xlu0 %1012 }
 0x1dd   : > { %v785_v63 = vadd.f32 %v784_v35, %v686_v18  ;;  %2334 = vmatprep.subr.bf16.mxu1 %v813_v26  ;;  %v800_v38 = vmax.f32 %v782_v33, 0.0 }
 0x1de   : > { %v803_v37 = vmax.f32 %v793_v4, 0.0 }
 0x1df   : > { %v801_v39 = vmax.f32 %v785_v63, 0.0  ;;  %v1018_v33 = vpop.permute.xlu1 %1017 }
 0x1e0   : > { %v815_v40 = vpack.c.bf16 %v803_v37, %v802_v36  ;;  %2335 = vmatpush3.bf16.msra.mxu1 %v813_v26  ;;  %v2544_v26 = vld [vmem:[%s3504_s7 + $0x28] sm:$0xff]   ;;  %v1023_v34 = vpop.permute.xlu0 %1022 }
 0x1e1   : > { %v814_v41 = vpack.c.bf16 %v801_v39, %v800_v38 }
 0x1e3   : > { %2336 = vmatprep.subr.bf16.mxu1 %v814_v41  ;;  %v1028_v4 = vpop.permute.xlu1 %1027 }
 0x1e4   : > { %2337 = vmatpush3.bf16.msra.mxu1 %v814_v41  ;;  %v1033_v35 = vpop.permute.xlu0 %1032 }
 0x1e5   : > { %2338 = vmatprep.subr.bf16.mxu1 %v815_v40 }
 0x1e7   : > { %v1038_v63 = vpop.permute.xlu1 %1037 }
 0x1e8   : > { %2339 = vmatpush3.bf16.msra.mxu1 %v815_v40  ;;  %v1043_v39 = vpop.permute.xlu0 %1042 }
 0x1eb   : > { %2341 = vmatmul.mubr.msk.bf16.vlgmr.msra.gmra.mrb[0].mxu1 %vm718_vm0, %v2536_v42 }
 0x1ec   : > { %2344 = vmatprep.mubr.msk.bf16.mxu1 %vm718_vm0, %v2537_v43 }
 0x1f3   : > { %2345 = vmatmul.mubr.msk.bf16.gmra.mrb[4].mxu1 %vm718_vm0, %v2538_v44 }
 0x1f4   : > { %2400 = vmatprep.mubr.bf16.mxu1 %v2548_v30 }
 0x2be   : > { %v2342_v50 = vpop.f32.mrb[0].mxu1 }
 0x2bf   : > { %v939_v51 = vadd.f32 %v2342_v50, %v837_v48  ;;  %v930_v52 = vpop.f32.mrb[1].mxu1 }
 0x2c0   : > { %v931_v11 = vadd.f32 %v930_v52, %v827_v46  ;;  %v2343_v13 = vpop.f32.mrb[2].mxu1 }
 0x2c1   : > { %v942_v54 = vadd.f32 %v2343_v13, %v842_v49  ;;  %v933_v55 = vpop.f32.mrb[3].mxu1  ;;  %v963_v19 = vmax.f32 %v939_v51, 0.0  ;;  %v1053_v51 = vpop.permute.xlu0 %1052 }
 0x2c2   : > { %v934_v57 = vadd.f32 %v933_v55, %v832_v47  ;;  %v961_v59 = vmax.f32 %v931_v11, 0.0  ;;  %v1048_v47 = vpop.permute.xlu1 %1047 }
 0x2c3   : > { %v964_v14 = vmax.f32 %v942_v54, 0.0 }
 0x2c4   : > { %v962_v58 = vmax.f32 %v934_v57, 0.0 }
 0x2c5   : > { %v986_v61 = vpack.c.bf16 %v964_v14, %v963_v19 }
 0x2c6   : > { %v985_v62 = vpack.c.bf16 %v962_v58, %v961_v59  ;;  %v2346_v0 = vpop.f32.mrb[4].mxu1  ;;  %v1058_v19 = vpop.permute.xlu1 %1057 }
 0x2c7   : > { %v955_v2 = vadd.f32 %v2346_v0, %v857_v23  ;;  %v946_v3 = vpop.f32.mrb[5].mxu1 }
 0x2c8   : > { %v947_v6 = vadd.f32 %v946_v3, %v847_v53  ;;  %v2347_v7 = vpop.f32.mrb[6].mxu1  ;;  %2348 = vmatprep.subr.bf16.mxu0 %v985_v62 }
 0x2c9   : > { %v958_v8 = vadd.f32 %v2347_v7, %v862_v5  ;;  %v949_v9 = vpop.f32.mrb[7].mxu1  ;;  %2349 = vmatpush3.bf16.msra.mxu0 %v985_v62  ;;  %v967_v12 = vmax.f32 %v955_v2, 0.0 }
 0x2ca   : > { %v950_v10 = vadd.f32 %v949_v9, %v852_v56  ;;  %2350 = vmatprep.subr.bf16.mxu0 %v986_v61  ;;  %v965_v16 = vmax.f32 %v947_v6, 0.0  ;;  %v1068_v7 = vpop.permute.xlu1 %1067 }
 0x2cb   : > { %v968_v15 = vmax.f32 %v958_v8, 0.0 }
 0x2cc   : > { %v966_v17 = vmax.f32 %v950_v10, 0.0 }
 0x2cd   : > { %v988_v18 = vpack.c.bf16 %v968_v15, %v967_v12  ;;  %2351 = vmatpush3.bf16.msra.mxu0 %v986_v61  ;;  %v1063_v61 = vpop.permute.xlu0 %1062 }
 0x2ce   : > { %v987_v20 = vpack.c.bf16 %v966_v17, %v965_v16 }
 0x2d0   : > { %2352 = vmatprep.subr.bf16.mxu0 %v987_v20 }
 0x2d1   : > { %2353 = vmatpush3.bf16.msra.mxu0 %v987_v20  ;;  %v1073_v15 = vpop.permute.xlu0 %1072 }
 0x2d2   : > { %2354 = vmatprep.subr.bf16.mxu0 %v988_v18 }
 0x2d5   : > { %2355 = vmatpush3.bf16.msra.mxu0 %v988_v18 }
 0x2d8   : > { %2357 = vmatmul.mubr.msk.bf16.vlgmr.msra.gmra.mrb[8].mxu0 %vm718_vm0, %v2540_v21 }
 0x2d9   : > { %2360 = vmatprep.mubr.msk.bf16.mxu0 %vm718_vm0, %v2541_v22 }
 0x2e0   : > { %2361 = vmatmul.mubr.msk.bf16.gmra.mrb[12].mxu0 %vm718_vm0, %v2542_v24  ;;  %v1078_v24 = vpop.permute.xlu1 %1077 }
 0x2e1   : > { %2364 = vmatprep.mubr.msk.bf16.mxu0 %vm718_vm0, %v2543_v25 }
 0x2e8   : > { %2365 = vmatmul.mubr.msk.bf16.gmra.mrb[16].mxu0 %vm718_vm0, %v2544_v26 }
 0x2e9   : > { %2368 = vmatprep.mubr.msk.bf16.mxu0 %vm718_vm0, %v2545_v27 }
 0x2f0   : > { %2369 = vmatmul.mubr.msk.bf16.gmra.mrb[20].mxu0 %vm718_vm0, %v2546_v28 }
 0x2f1   : > { %2388 = vmatprep.mubr.bf16.mxu0 %v2547_v29  ;;  %v1083_v29 = vpop.permute.xlu0 %1082 }
 0x3ab   : > { %v2358_v36 = vpop.f32.mrb[8].mxu0 }
 0x3ac   : > { %v1192_v37 = vadd.f32 %v2358_v36, %v1018_v33  ;;  %v1183_v38 = vpop.f32.mrb[9].mxu0 }
 0x3ad   : > { %v1184_v40 = vadd.f32 %v1183_v38, %v1008_v31  ;;  %v2359_v41 = vpop.f32.mrb[10].mxu0 }
 0x3ae   : > { %v1195_v42 = vadd.f32 %v2359_v41, %v1023_v34  ;;  %v1186_v43 = vpop.f32.mrb[11].mxu0  ;;  %v1248_v45 = vmax.f32 %v1192_v37, 0.0  ;;  %v2551_v41 = vld [vmem:[%s3506_s9 + $0x10] sm:$0xff]  }
 0x3af   : > { %v1187_v44 = vadd.f32 %v1186_v43, %v1013_v32  ;;  %v1246_v48 = vmax.f32 %v1184_v40, 0.0  ;;  %v2550_v40 = vld [vmem:[%s3506_s9 + $0x38] sm:$0xff]  }
 0x3b0   : > { %v1249_v46 = vmax.f32 %v1195_v42, 0.0  ;;  %v2552_v42 = vld [vmem:[%s3506_s9 + $0x40] sm:$0xff]   ;;  %v2553_v43 = vld [vmem:[%s3506_s9 + $0x18] sm:$0xff]  }
 0x3b1   : > { %v1247_v49 = vmax.f32 %v1187_v44, 0.0  ;;  %v2554_v44 = vld [vmem:[%s3506_s9 + $0x48] sm:$0xff]  }
 0x3b2   : > { %v1295_v50 = vpack.c.bf16 %v1249_v46, %v1248_v45  ;;  %v2555_v45 = vld [vmem:[%s3506_s9 + $0x20] sm:$0xff]   ;;  %v2556_v46 = vld [vmem:[%s3506_s9 + $0x50] sm:$0xff]  }
 0x3b3   : > { %v1294_v52 = vpack.c.bf16 %v1247_v49, %v1246_v48  ;;  %v2362_v53 = vpop.f32.mrb[12].mxu0  ;;  %v2558_v48 = vld [vmem:[%s3506_s9 + $0x58] sm:$0xff]   ;;  %v2559_v49 = vld [vmem:[%s3506_s9 + $0x60] sm:$0xff]  }
 0x3b4   : > { %v1208_v11 = vadd.f32 %v2362_v53, %v1038_v63  ;;  %v1199_v13 = vpop.f32.mrb[13].mxu0  ;;  %v1337_v53 = vpop.permute.xlu1 %1336 }
 0x3b5   : > { %v1200_v54 = vadd.f32 %v1199_v13, %v1028_v4  ;;  %v2363_v55 = vpop.f32.mrb[14].mxu0  ;;  %2372 = vmatprep.subr.bf16.mxu0 %v1294_v52  ;;  %2420 = vmatprep.subr.bf16.mxu1 %v1294_v52 }
 0x3b6   : > { %v1211_v56 = vadd.f32 %v2363_v55, %v1043_v39  ;;  %v1202_v57 = vpop.f32.mrb[15].mxu0  ;;  %2373 = vmatpush3.bf16.msra.mxu0 %v1294_v52  ;;  %2428 = vmatpush3.bf16.msra.mxu1 %v1294_v52  ;;  %v1252_v59 = vmax.f32 %v1208_v11, 0.0  ;;  %v2549_v39 = vld [vmem:[%s3506_s9 + $0x8] sm:$0xff]   ;;  %v2562_v52 = vld [vmem:[%s3506_s9 + $0x78] sm:$0xff]   ;;  %v1342_v11 = vpop.permute.xlu0 %1341 }
 0x3b7   : > { %v1203_v14 = vadd.f32 %v1202_v57, %v1033_v35  ;;  %2374 = vmatprep.subr.bf16.mxu0 %v1295_v50  ;;  %2421 = vmatprep.subr.bf16.mxu1 %v1295_v50  ;;  %v1250_v23 = vmax.f32 %v1200_v54, 0.0 }
 0x3b8   : > { %v1253_v58 = vmax.f32 %v1211_v56, 0.0  ;;  %v1347_v13 = vpop.permute.xlu1 %1346 }
 0x3b9   : > { %v1251_v62 = vmax.f32 %v1203_v14, 0.0 }
 0x3ba   : > { %v1297_v0 = vpack.c.bf16 %v1253_v58, %v1252_v59  ;;  %2375 = vmatpush3.bf16.msra.mxu0 %v1295_v50  ;;  %2429 = vmatpush3.bf16.msra.mxu1 %v1295_v50  ;;  %v2560_v50 = vld [vmem:[%s3506_s9 + $0x68] sm:$0xff]   ;;  %v1352_v54 = vpop.permute.xlu0 %1351 }
 0x3bb   : > { %v1296_v2 = vpack.c.bf16 %v1251_v62, %v1250_v23  ;;  %v2366_v3 = vpop.f32.mrb[16].mxu0 }
 0x3bc   : > { %v1224_v5 = vadd.f32 %v2366_v3, %v1058_v19  ;;  %v1215_v6 = vpop.f32.mrb[17].mxu0  ;;  %v3224_v55 = vpop.permute.xlu1 %1356 }
 0x3bd   : > { %v1216_v8 = vadd.f32 %v1215_v6, %v1048_v47  ;;  %v2367_v9 = vpop.f32.mrb[18].mxu0  ;;  %2376 = vmatprep.subr.bf16.mxu0 %v1296_v2  ;;  %2422 = vmatprep.subr.bf16.mxu1 %v1296_v2  ;;  %v2557_v47 = vld [vmem:[%s3506_s9 + $0x28] sm:$0xff]  }
 0x3be   : > { %v1227_v10 = vadd.f32 %v2367_v9, %v1063_v61  ;;  %v1218_v12 = vpop.f32.mrb[19].mxu0  ;;  %2377 = vmatpush3.bf16.msra.mxu0 %v1296_v2  ;;  %2430 = vmatpush3.bf16.msra.mxu1 %v1296_v2  ;;  %v1256_v17 = vmax.f32 %v1224_v5, 0.0  ;;  %v3226_v56 = vpop.permute.xlu0 %1361 }
 0x3bf   : > { %v1219_v16 = vadd.f32 %v1218_v12, %v1053_v51  ;;  %2378 = vmatprep.subr.bf16.mxu0 %v1297_v0  ;;  %2423 = vmatprep.subr.bf16.mxu1 %v1297_v0  ;;  %v1254_v20 = vmax.f32 %v1216_v8, 0.0  ;;  %v2561_v51 = vld [vmem:[%s3506_s9 + $0x70] sm:$0xff]  }
 0x3c0   : > { %v1257_v18 = vmax.f32 %v1227_v10, 0.0  ;;  %v1367_v57 = vpop.permute.xlu1 %1366 }
 0x3c1   : > { %v1255_v21 = vmax.f32 %v1219_v16, 0.0 }
 0x3c2   : > { %v1299_v22 = vpack.c.bf16 %v1257_v18, %v1256_v17  ;;  %2379 = vmatpush3.bf16.msra.mxu0 %v1297_v0  ;;  %2431 = vmatpush3.bf16.msra.mxu1 %v1297_v0  ;;  %v1372_v19 = vpop.permute.xlu0 %1371 }
 0x3c3   : > { %v1298_v25 = vpack.c.bf16 %v1255_v21, %v1254_v20  ;;  %v2370_v26 = vpop.f32.mrb[20].mxu0 }
 0x3c4   : > { %v1240_v27 = vadd.f32 %v2370_v26, %v1078_v24  ;;  %v1231_v28 = vpop.f32.mrb[21].mxu0  ;;  %v3228_v14 = vpop.permute.xlu1 %1376 }
 0x3c5   : > { %v1232_v30 = vadd.f32 %v1231_v28, %v1068_v7  ;;  %v2371_v31 = vpop.f32.mrb[22].mxu0  ;;  %2380 = vmatprep.subr.bf16.mxu0 %v1298_v25  ;;  %2424 = vmatprep.subr.bf16.mxu1 %v1298_v25 }
 0x3c6   : > { %v1243_v32 = vadd.f32 %v2371_v31, %v1083_v29  ;;  %v1234_v33 = vpop.f32.mrb[23].mxu0  ;;  %2381 = vmatpush3.bf16.msra.mxu0 %v1298_v25  ;;  %2432 = vmatpush3.bf16.msra.mxu1 %v1298_v25  ;;  %v1260_v4 = vmax.f32 %v1240_v27, 0.0  ;;  %v3230_v59 = vpop.permute.xlu0 %1381 }
 0x3c7   : > { %v1235_v34 = vadd.f32 %v1234_v33, %v1073_v15  ;;  %2382 = vmatprep.subr.bf16.mxu0 %v1299_v22  ;;  %2425 = vmatprep.subr.bf16.mxu1 %v1299_v22  ;;  %v1258_v63 = vmax.f32 %v1232_v30, 0.0 }
 0x3c8   : > { %v1261_v35 = vmax.f32 %v1243_v32, 0.0  ;;  %v3232_v58 = vpop.permute.xlu1 %1386 }
 0x3c9   : > { %v1259_v36 = vmax.f32 %v1235_v34, 0.0 }
 0x3ca   : > { %v1301_v37 = vpack.c.bf16 %v1261_v35, %v1260_v4  ;;  %2383 = vmatpush3.bf16.msra.mxu0 %v1299_v22  ;;  %2433 = vmatpush3.bf16.msra.mxu1 %v1299_v22  ;;  %v3234_v61 = vpop.permute.xlu0 %1391 }
 0x3cb   : > { %v1300_v38 = vpack.c.bf16 %v1259_v36, %v1258_v63 }
 0x3cc   : > { %v1397_v23 = vpop.permute.xlu1 %1396 }
 0x3cd   : > { %2384 = vmatprep.subr.bf16.mxu0 %v1300_v38  ;;  %2426 = vmatprep.subr.bf16.mxu1 %v1300_v38 }
 0x3ce   : > { %2385 = vmatpush3.bf16.msra.mxu0 %v1300_v38  ;;  %2434 = vmatpush3.bf16.msra.mxu1 %v1300_v38  ;;  %v1402_v62 = vpop.permute.xlu0 %1401 }
 0x3cf   : > { %2386 = vmatprep.subr.bf16.mxu0 %v1301_v37  ;;  %2427 = vmatprep.subr.bf16.mxu1 %v1301_v37 }
 0x3d0   : > { %v1407_v0 = vpop.permute.xlu1 %1406 }
 0x3d2   : > { %2387 = vmatpush3.bf16.msra.mxu0 %v1301_v37  ;;  %2435 = vmatpush3.bf16.msra.mxu1 %v1301_v37  ;;  %v1412_v2 = vpop.permute.xlu0 %1411 }
 0x3d4   : > { %v1417_v22 = vpop.permute.xlu1 %1416 }
 0x3d5   : > { %2389 = vmatmul.mubr.bf16.vlgmr.msra.gmra.mrb[24].mxu0 %v2549_v39  ;;  %2401 = vmatmul.mubr.bf16.vlgmr.msra.gmra.mrb[8].mxu1 %v2550_v40 }
 0x3d6   : > { %2392 = vmatprep.mubr.bf16.mxu0 %v2551_v41  ;;  %2404 = vmatprep.mubr.bf16.mxu1 %v2552_v42  ;;  %v1422_v24 = vpop.permute.xlu0 %1421 }
 0x3d8   : > { %v1427_v39 = vpop.permute.xlu1 %1426 }
 0x3da   : > { %v1432_v40 = vpop.permute.xlu0 %1431 }
 0x3dd   : > { %2393 = vmatmul.mubr.bf16.gmra.mrb[28].mxu0 %v2553_v43  ;;  %2405 = vmatmul.mubr.bf16.gmra.mrb[12].mxu1 %v2554_v44 }
 0x3de   : > { %2396 = vmatprep.mubr.bf16.mxu0 %v2555_v45  ;;  %2408 = vmatprep.mubr.bf16.mxu1 %v2556_v46 }
 0x3e5   : > { %2397 = vmatmul.mubr.bf16.gmra.mrb[32].mxu0 %v2557_v47  ;;  %2409 = vmatmul.mubr.bf16.gmra.mrb[16].mxu1 %v2558_v48 }
 0x3e6   : > { %2412 = vmatprep.mubr.bf16.mxu1 %v2559_v49 }
 0x3ed   : > { %2413 = vmatmul.mubr.bf16.gmra.mrb[20].mxu1 %v2560_v50 }
 0x3ee   : > { %2416 = vmatprep.mubr.bf16.mxu1 %v2561_v51 }
 0x3f5   : > { %2417 = vmatmul.mubr.bf16.gmra.mrb[24].mxu1 %v2562_v52 }
 0x4a8   : > { %v2390_v3 = vpop.f32.mrb[24].mxu0  ;;  %v2402_v5 = vpop.f32.mrb[8].mxu1 }
 0x4a9   : > { %v1633_v6 = vadd.f32 %v2390_v3, %v1347_v13  ;;  %v1624_v7 = vpop.f32.mrb[25].mxu0  ;;  %v1672_v8 = vpop.f32.mrb[9].mxu1  ;;  %v1681_v16 = vadd.f32 %v2402_v5, %v1407_v0 }
 0x4aa   : > { %v1625_v9 = vadd.f32 %v1624_v7, %v1337_v53  ;;  %v2391_v10 = vpop.f32.mrb[26].mxu0  ;;  %v2403_v12 = vpop.f32.mrb[10].mxu1  ;;  %v1673_v26 = vadd.f32 %v1672_v8, %v1397_v23 }
 0x4ab   : > { %v1753_v15 = vmax.f32 %v1633_v6, 0.0  ;;  %v1627_v17 = vpop.f32.mrb[27].mxu0  ;;  %v1675_v18 = vpop.f32.mrb[11].mxu1  ;;  %v1636_v21 = vadd.f32 %v2391_v10, %v1352_v54  ;;  %v1765_v25 = vmax.f32 %v1681_v16, 0.0  ;;  %v1684_v28 = vadd.f32 %v2403_v12, %v1412_v2 }
 0x4ac   : > { %v1751_v20 = vmax.f32 %v1625_v9, 0.0  ;;  %v1763_v4 = vmax.f32 %v1673_v26, 0.0  ;;  %v1628_v35 = vadd.f32 %v1627_v17, %v1342_v11  ;;  %v1676_v38 = vadd.f32 %v1675_v18, %v1402_v62  ;;  %v1437_v8 = vpop.permute.xlu1 %1436  ;;  %v1442_v12 = vpop.permute.xlu0 %1441 }
 0x4ad   : > { %1787 = vmax.xlane.f32.xlu0 %v1753_v15  ;;  %v1754_v27 = vmax.f32 %v1636_v21, 0.0  ;;  %v1766_v37 = vmax.f32 %v1684_v28, 0.0 }
 0x4ae   : > { %1783 = vmax.xlane.f32.xlu1 %v1751_v20  ;;  %v1752_v41 = vmax.f32 %v1628_v35, 0.0  ;;  %v1764_v43 = vmax.f32 %v1676_v38, 0.0 }
 0x4b0   : > { %v2394_v29 = vpop.f32.mrb[28].mxu0  ;;  %v2406_v30 = vpop.f32.mrb[12].mxu1 }
 0x4b1   : > { %v1688_v31 = vpop.f32.mrb[13].mxu1  ;;  %1811 = vmax.xlane.f32.xlu0 %v1765_v25  ;;  %v1640_v32 = vpop.f32.mrb[29].mxu0  ;;  %v1649_v42 = vadd.f32 %v2394_v29, %v1367_v57  ;;  %v1697_v52 = vadd.f32 %v2406_v30, %v1427_v39 }
 0x4b2   : > { %v2395_v33 = vpop.f32.mrb[30].mxu0  ;;  %v2407_v34 = vpop.f32.mrb[14].mxu1  ;;  %1789 = vmax.xlane.f32.xlu1 %v1754_v27  ;;  %v1641_v57 = vadd.f32 %v1640_v32, %v3224_v55  ;;  %v1689_v5 = vadd.f32 %v1688_v31, %v1417_v22 }
 0x4b3   : > { %v1643_v63 = vpop.f32.mrb[31].mxu0  ;;  %v1691_v36 = vpop.f32.mrb[15].mxu1  ;;  %v1652_v44 = vadd.f32 %v2395_v33, %v1372_v19  ;;  %v1757_v51 = vmax.f32 %v1649_v42, 0.0  ;;  %v1700_v54 = vadd.f32 %v2407_v34, %v1432_v40  ;;  %v1769_v23 = vmax.f32 %v1697_v52, 0.0 }
 0x4b4   : > { %v1644_v62 = vadd.f32 %v1643_v63, %v3226_v56  ;;  %v1755_v6 = vmax.f32 %v1641_v57, 0.0  ;;  %v1692_v10 = vadd.f32 %v1691_v36, %v1422_v24  ;;  %v1767_v15 = vmax.f32 %v1689_v5, 0.0  ;;  %v1447_v20 = vpop.permute.xlu1 %1446  ;;  %v1452_v22 = vpop.permute.xlu0 %1451 }
 0x4b5   : > { %1807 = vmax.xlane.f32.xlu0 %v1763_v4  ;;  %v1758_v13 = vmax.f32 %v1652_v44, 0.0  ;;  %v1770_v19 = vmax.f32 %v1700_v54, 0.0 }
 0x4b6   : > { %1813 = vmax.xlane.f32.xlu1 %v1766_v37  ;;  %v1756_v9 = vmax.f32 %v1644_v62, 0.0  ;;  %v1768_v16 = vmax.f32 %v1692_v10, 0.0 }
 0x4b8   : > { %v2398_v45 = vpop.f32.mrb[32].mxu0  ;;  %v2410_v46 = vpop.f32.mrb[16].mxu1 }
 0x4b9   : > { %v1656_v47 = vpop.f32.mrb[33].mxu0  ;;  %v1704_v48 = vpop.f32.mrb[17].mxu1  ;;  %1785 = vmax.xlane.f32.xlu0 %v1752_v41  ;;  %v1665_v55 = vadd.f32 %v2398_v45, %v3232_v58  ;;  %v1713_v26 = vadd.f32 %v2410_v46, %v1447_v20 }
 0x4ba   : > { %v2399_v49 = vpop.f32.mrb[34].mxu0  ;;  %v2411_v50 = vpop.f32.mrb[18].mxu1  ;;  %1809 = vmax.xlane.f32.xlu1 %v1764_v43  ;;  %v1657_v58 = vadd.f32 %v1656_v47, %v3228_v14  ;;  %v1705_v34 = vadd.f32 %v1704_v48, %v1437_v8 }
 0x4bb   : > { %v1659_v53 = vpop.f32.mrb[35].mxu0  ;;  %v1707_v11 = vpop.f32.mrb[19].mxu1  ;;  %v1668_v56 = vadd.f32 %v2399_v49, %v3234_v61  ;;  %v1761_v25 = vmax.f32 %v1665_v55, 0.0  ;;  %v1716_v28 = vadd.f32 %v2411_v50, %v1452_v22  ;;  %v1773_v29 = vmax.f32 %v1713_v26, 0.0 }
 0x4bc   : > { %v1457_v30 = vpop.permute.xlu1 %1456  ;;  %v1660_v61 = vadd.f32 %v1659_v53, %v3230_v59  ;;  %v1462_v32 = vpop.permute.xlu0 %1461  ;;  %v1759_v33 = vmax.f32 %v1657_v58, 0.0  ;;  %v1708_v35 = vadd.f32 %v1707_v11, %v1442_v12  ;;  %v1771_v37 = vmax.f32 %v1705_v34, 0.0 }
 0x4bd   : > { %1795 = vmax.xlane.f32.xlu0 %v1757_v51  ;;  %v1762_v24 = vmax.f32 %v1668_v56, 0.0  ;;  %v1774_v31 = vmax.f32 %v1716_v28, 0.0 }
 0x4be   : > { %1797 = vmax.xlane.f32.xlu1 %v1758_v13  ;;  %v1760_v4 = vmax.f32 %v1660_v61, 0.0  ;;  %v1772_v39 = vmax.f32 %v1708_v35, 0.0 }
 0x4c0   : > { %v2414_v0 = vpop.f32.mrb[20].mxu1  ;;  %v1467_v63 = vpop.permute.xlu1 %1466 }
 0x4c1   : > { %v1720_v2 = vpop.f32.mrb[21].mxu1  ;;  %1819 = vmax.xlane.f32.xlu0 %v1769_v23  ;;  %v1472_v36 = vpop.permute.xlu0 %1471  ;;  %v1729_v38 = vadd.f32 %v2414_v0, %v1467_v63 }
 0x4c2   : > { %v2415_v3 = vpop.f32.mrb[22].mxu1  ;;  %1821 = vmax.xlane.f32.xlu1 %v1770_v19  ;;  %v1721_v41 = vadd.f32 %v1720_v2, %v1457_v30 }
 0x4c3   : > { %v1723_v7 = vpop.f32.mrb[23].mxu1  ;;  %v1732_v40 = vadd.f32 %v2415_v3, %v1472_v36  ;;  %v1777_v14 = vmax.f32 %v1729_v38, 0.0 }
 0x4c4   : > { %v1477_v59 = vpop.permute.xlu1 %1476  ;;  %v1724_v43 = vadd.f32 %v1723_v7, %v1462_v32  ;;  %v1775_v45 = vmax.f32 %v1721_v41, 0.0 }
 0x4c5   : > { %1791 = vmax.xlane.f32.xlu0 %v1755_v6  ;;  %v1778_v42 = vmax.f32 %v1732_v40, 0.0  ;;  %v1482_v44 = vpop.permute.xlu0 %1481 }
 0x4c6   : > { %1793 = vmax.xlane.f32.xlu1 %v1756_v9  ;;  %v1776_v47 = vmax.f32 %v1724_v43, 0.0 }
 0x4c8   : > { %v2418_v17 = vpop.f32.mrb[24].mxu1  ;;  %v1487_v49 = vpop.permute.xlu1 %1486 }
 0x4c9   : > { %v1736_v18 = vpop.f32.mrb[25].mxu1  ;;  %1815 = vmax.xlane.f32.xlu0 %v1767_v15  ;;  %v1492_v50 = vpop.permute.xlu0 %1491  ;;  %v1745_v51 = vadd.f32 %v2418_v17, %v1487_v49 }
 0x4ca   : > { %v2419_v21 = vpop.f32.mrb[26].mxu1  ;;  %1817 = vmax.xlane.f32.xlu1 %v1768_v16  ;;  %v1737_v46 = vadd.f32 %v1736_v18, %v1477_v59 }
 0x4cb   : > { %v1739_v27 = vpop.f32.mrb[27].mxu1  ;;  %v1748_v53 = vadd.f32 %v2419_v21, %v1492_v50  ;;  %v1781_v13 = vmax.f32 %v1745_v51, 0.0 }
 0x4cc   : > { %v1740_v48 = vadd.f32 %v1739_v27, %v1482_v44  ;;  %v1779_v52 = vmax.f32 %v1737_v46, 0.0 }
 0x4cd   : > { %1803 = vmax.xlane.f32.xlu0 %v1761_v25  ;;  %v1782_v54 = vmax.f32 %v1748_v53, 0.0 }
 0x4ce   : > { %1805 = vmax.xlane.f32.xlu1 %v1762_v24  ;;  %v1780_v11 = vmax.f32 %v1740_v48, 0.0 }
 0x4d1   : > { %1827 = vmax.xlane.f32.xlu0 %v1773_v29 }
 0x4d2   : > { %1829 = vmax.xlane.f32.xlu1 %v1774_v31 }
 0x4d5   : > { %1799 = vmax.xlane.f32.xlu0 %v1759_v33 }
 0x4d6   : > { %1801 = vmax.xlane.f32.xlu1 %v1760_v4 }
 0x4d9   : > { %1823 = vmax.xlane.f32.xlu0 %v1771_v37 }
 0x4da   : > { %1825 = vmax.xlane.f32.xlu1 %v1772_v39 }
 0x4dd   : > { %1835 = vmax.xlane.f32.xlu0 %v1777_v14 }
 0x4de   : > { %1837 = vmax.xlane.f32.xlu1 %v1778_v42 }
 0x4e1   : > { %1831 = vmax.xlane.f32.xlu0 %v1775_v45 }
 0x4e2   : > { %1833 = vmax.xlane.f32.xlu1 %v1776_v47 }
 0x4e5   : > { %1839 = vmax.xlane.f32.xlu0 %v1779_v52 }
 0x4e6   : > { %1841 = vmax.xlane.f32.xlu1 %v1780_v11 }
 0x4e9   : > { %1843 = vmax.xlane.f32.xlu0 %v1781_v13 }
 0x4ea   : > { %1845 = vmax.xlane.f32.xlu1 %v1782_v54 }
 0x53a   : > { %v3242_v23 = vpop.xlane.xlu0 %1787 }
 0x53b   : > { %v3244_v57 = vpop.xlane.xlu1 %1783  ;;  %1854 = vst.msk [vmem:[#allocation2 + $0x10] sm:$0xff] (!%p2255_p0), %vm1851_vm1, %v3242_v23 }
 0x53c   : > { %1852 = vst.msk [vmem:[#allocation2] sm:$0xff] (!%p2255_p0), %vm1851_vm1, %v3244_v57 }
 0x53e   : > { %v3246_v19 = vpop.xlane.xlu0 %1811 }
 0x53f   : > { %v3248_v62 = vpop.xlane.xlu1 %1789  ;;  %1866 = vst.msk [vmem:[#allocation2 + $0x70] sm:$0xff] (!%p2255_p0), %vm1851_vm1, %v3246_v19 }
 0x540   : > { %1855 = vst.msk [vmem:[#allocation2 + $0x18] sm:$0xff] (!%p2255_p0), %vm1851_vm1, %v3248_v62 }
 0x542   : > { %v3250_v0 = vpop.xlane.xlu0 %1807 }
 0x543   : > { %v3252_v2 = vpop.xlane.xlu1 %1813  ;;  %1864 = vst.msk [vmem:[#allocation2 + $0x60] sm:$0xff] (!%p2255_p0), %vm1851_vm1, %v3250_v0 }
 0x544   : > { %1867 = vst.msk [vmem:[#allocation2 + $0x78] sm:$0xff] (!%p2255_p0), %vm1851_vm1, %v3252_v2 }
 0x546   : > { %v3254_v3 = vpop.xlane.xlu0 %1785 }
 0x547   : > { %v3256_v5 = vpop.xlane.xlu1 %1809  ;;  %1853 = vst.msk [vmem:[#allocation2 + $0x8] sm:$0xff] (!%p2255_p0), %vm1851_vm1, %v3254_v3 }
 0x548   : > { %1865 = vst.msk [vmem:[#allocation2 + $0x68] sm:$0xff] (!%p2255_p0), %vm1851_vm1, %v3256_v5 }
 0x54a   : > { %v3258_v6 = vpop.xlane.xlu0 %1795 }
 0x54b   : > { %v3260_v7 = vpop.xlane.xlu1 %1797  ;;  %1858 = vst.msk [vmem:[#allocation2 + $0x30] sm:$0xff] (!%p2255_p0), %vm1851_vm1, %v3258_v6 }
 0x54c   : > { %1859 = vst.msk [vmem:[#allocation2 + $0x38] sm:$0xff] (!%p2255_p0), %vm1851_vm1, %v3260_v7 }
 0x54e   : > { %v3262_v8 = vpop.xlane.xlu0 %1819 }
 0x54f   : > { %v3264_v9 = vpop.xlane.xlu1 %1821  ;;  %1870 = vst.msk [vmem:[#allocation2 + $0x90] sm:$0xff] (!%p2255_p0), %vm1851_vm1, %v3262_v8 }
 0x550   : > { %1871 = vst.msk [vmem:[#allocation2 + $0x98] sm:$0xff] (!%p2255_p0), %vm1851_vm1, %v3264_v9 }
 0x552   : > { %v3266_v10 = vpop.xlane.xlu0 %1791 }
 0x553   : > { %v3268_v12 = vpop.xlane.xlu1 %1793  ;;  %1856 = vst.msk [vmem:[#allocation2 + $0x20] sm:$0xff] (!%p2255_p0), %vm1851_vm1, %v3266_v10 }
 0x554   : > { %1857 = vst.msk [vmem:[#allocation2 + $0x28] sm:$0xff] (!%p2255_p0), %vm1851_vm1, %v3268_v12 }
 0x556   : > { %v3270_v15 = vpop.xlane.xlu0 %1815 }
 0x557   : > { %v3272_v55 = vpop.xlane.xlu1 %1817  ;;  %1868 = vst.msk [vmem:[#allocation2 + $0x80] sm:$0xff] (!%p2255_p0), %vm1851_vm1, %v3270_v15 }
 0x558   : > { %1869 = vst.msk [vmem:[#allocation2 + $0x88] sm:$0xff] (!%p2255_p0), %vm1851_vm1, %v3272_v55 }
 0x55a   : > { %v3274_v16 = vpop.xlane.xlu0 %1803 }
 0x55b   : > { %v3276_v56 = vpop.xlane.xlu1 %1805  ;;  %1862 = vst.msk [vmem:[#allocation2 + $0x50] sm:$0xff] (!%p2255_p0), %vm1851_vm1, %v3274_v16 }
 0x55c   : > { %1863 = vst.msk [vmem:[#allocation2 + $0x58] sm:$0xff] (!%p2255_p0), %vm1851_vm1, %v3276_v56 }
 0x55e   : > { %v3278_v17 = vpop.xlane.xlu0 %1827 }
 0x55f   : > { %v3280_v18 = vpop.xlane.xlu1 %1829  ;;  %1874 = vst.msk [vmem:[#allocation2 + $0xb0] sm:$0xff] (!%p2255_p0), %vm1851_vm1, %v3278_v17 }
 0x560   : > { %1875 = vst.msk [vmem:[#allocation2 + $0xb8] sm:$0xff] (!%p2255_p0), %vm1851_vm1, %v3280_v18 }
 0x562   : > { %v3282_v20 = vpop.xlane.xlu0 %1799 }
 0x563   : > { %v3284_v21 = vpop.xlane.xlu1 %1801  ;;  %1860 = vst.msk [vmem:[#allocation2 + $0x40] sm:$0xff] (!%p2255_p0), %vm1851_vm1, %v3282_v20 }
 0x564   : > { %1861 = vst.msk [vmem:[#allocation2 + $0x48] sm:$0xff] (!%p2255_p0), %vm1851_vm1, %v3284_v21 }
 0x566   : > { %v3286_v22 = vpop.xlane.xlu0 %1823 }
 0x567   : > { %v3288_v25 = vpop.xlane.xlu1 %1825  ;;  %1872 = vst.msk [vmem:[#allocation2 + $0xa0] sm:$0xff] (!%p2255_p0), %vm1851_vm1, %v3286_v22 }
 0x568   : > { %1873 = vst.msk [vmem:[#allocation2 + $0xa8] sm:$0xff] (!%p2255_p0), %vm1851_vm1, %v3288_v25 }
 0x56a   : > { %v3290_v26 = vpop.xlane.xlu0 %1835 }
 0x56b   : > { %v3292_v27 = vpop.xlane.xlu1 %1837  ;;  %1878 = vst.msk [vmem:[#allocation2 + $0xd0] sm:$0xff] (!%p2255_p0), %vm1851_vm1, %v3290_v26 }
 0x56c   : > { %1879 = vst.msk [vmem:[#allocation2 + $0xd8] sm:$0xff] (!%p2255_p0), %vm1851_vm1, %v3292_v27 }
 0x56e   : > { %v3294_v24 = vpop.xlane.xlu0 %1831 }
 0x56f   : > { %v3296_v28 = vpop.xlane.xlu1 %1833  ;;  %1876 = vst.msk [vmem:[#allocation2 + $0xc0] sm:$0xff] (!%p2255_p0), %vm1851_vm1, %v3294_v24 }
 0x570   : > { %1877 = vst.msk [vmem:[#allocation2 + $0xc8] sm:$0xff] (!%p2255_p0), %vm1851_vm1, %v3296_v28 }
 0x571   : > { %1850 = sbr.rel (%p2255_p0) target bundleno = 1401 (0x579), region = 68 }
 0x572   : > { %v3298_v29 = vpop.xlane.xlu0 %1839 }
 0x573   : > { %v3300_v58 = vpop.xlane.xlu1 %1841  ;;  %1880 = vst.msk [vmem:[#allocation2 + $0xe0] sm:$0xff] (!%p2255_p0), %vm1851_vm1, %v3298_v29 }
 0x574   : > { %1881 = vst.msk [vmem:[#allocation2 + $0xe8] sm:$0xff] (!%p2255_p0), %vm1851_vm1, %v3300_v58 }
 0x576   : > { %v3302_v30 = vpop.xlane.xlu0 %1843 }
 0x577   : > { %v3304_v31 = vpop.xlane.xlu1 %1845  ;;  %1882 = vst.msk [vmem:[#allocation2 + $0xf0] sm:$0xff] (!%p2255_p0), %vm1851_vm1, %v3302_v30 }
 0x578   : > { %1883 = vst.msk [vmem:[#allocation2 + $0xf8] sm:$0xff] %vm1851_vm1, %v3304_v31 }
 0x579 PF: > { %p2256_p1 = scmp.le.s32.totalorder %s2641_s20, 0 }
 0x57a   : > { %v1888_v61 = vld [vmem:[#allocation2] sm:$0xff] (!%p2256_p1)  ;;  %vm1952_vm2 = vcmask (!%p2256_p1), 7168   ;;  %v1889_v32 = vld [vmem:[#allocation2 + $0x8] sm:$0xff] (!%p2256_p1)  ;;  %v1890_v33 = vld [vmem:[#allocation2 + $0x10] sm:$0xff] (!%p2256_p1) }
 0x57b   : > { %1887 = sbr.rel (%p2256_p1) target bundleno = 1421 (0x58d), region = 72  ;;  %v1920_v34 = vmax.f32 (!%p2256_p1), %v1888_v61, %v3244_v57  ;;  %v1921_v4 = vmax.f32 (!%p2256_p1), %v1889_v32, %v3254_v3  ;;  %v1922_v35 = vmax.f32 (!%p2256_p1), %v1890_v33, %v3242_v23  ;;  %v1891_v63 = vld [vmem:[#allocation2 + $0x18] sm:$0xff] (!%p2256_p1)  ;;  %v1892_v36 = vld [vmem:[#allocation2 + $0x20] sm:$0xff] (!%p2256_p1)  ;;  %v1893_v37 = vld [vmem:[#allocation2 + $0x28] sm:$0xff] (!%p2256_p1) }
 0x57c   : > { %v1923_v38 = vmax.f32 (!%p2256_p1), %v1891_v63, %v3248_v62  ;;  %v1924_v39 = vmax.f32 (!%p2256_p1), %v1892_v36, %v3266_v10  ;;  %v1925_v40 = vmax.f32 (!%p2256_p1), %v1893_v37, %v3268_v12  ;;  %v1894_v14 = vld [vmem:[#allocation2 + $0x30] sm:$0xff] (!%p2256_p1)  ;;  %v1895_v41 = vld [vmem:[#allocation2 + $0x38] sm:$0xff] (!%p2256_p1)  ;;  %v1896_v59 = vld [vmem:[#allocation2 + $0x40] sm:$0xff] (!%p2256_p1) }
 0x57d   : > { %1953 = vst.msk [vmem:[#allocation2] sm:$0xff] (!%p2256_p1), %vm1952_vm2, %v1920_v34  ;;  %1954 = vst.msk [vmem:[#allocation2 + $0x8] sm:$0xff] (!%p2256_p1), %vm1952_vm2, %v1921_v4  ;;  %v1926_v42 = vmax.f32 (!%p2256_p1), %v1894_v14, %v3258_v6  ;;  %v1927_v43 = vmax.f32 (!%p2256_p1), %v1895_v41, %v3260_v7  ;;  %v1928_v44 = vmax.f32 (!%p2256_p1), %v1896_v59, %v3282_v20  ;;  %v1897_v45 = vld [vmem:[#allocation2 + $0x48] sm:$0xff] (!%p2256_p1)  ;;  %v1898_v46 = vld [vmem:[#allocation2 + $0x50] sm:$0xff] (!%p2256_p1) }
 0x57e   : > { %1955 = vst.msk [vmem:[#allocation2 + $0x10] sm:$0xff] (!%p2256_p1), %vm1952_vm2, %v1922_v35  ;;  %v1899_v47 = vld [vmem:[#allocation2 + $0x58] sm:$0xff] (!%p2256_p1)  ;;  %1956 = vst.msk [vmem:[#allocation2 + $0x18] sm:$0xff] (!%p2256_p1), %vm1952_vm2, %v1923_v38  ;;  %v1929_v48 = vmax.f32 (!%p2256_p1), %v1897_v45, %v3284_v21  ;;  %v1930_v49 = vmax.f32 (!%p2256_p1), %v1898_v46, %v3274_v16  ;;  %v1900_v51 = vld [vmem:[#allocation2 + $0x60] sm:$0xff] (!%p2256_p1) }
 0x57f   : > { %1957 = vst.msk [vmem:[#allocation2 + $0x20] sm:$0xff] (!%p2256_p1), %vm1952_vm2, %v1924_v39  ;;  %1958 = vst.msk [vmem:[#allocation2 + $0x28] sm:$0xff] (!%p2256_p1), %vm1952_vm2, %v1925_v40  ;;  %v1931_v50 = vmax.f32 (!%p2256_p1), %v1899_v47, %v3276_v56  ;;  %v1901_v52 = vld [vmem:[#allocation2 + $0x68] sm:$0xff] (!%p2256_p1)  ;;  %v1902_v53 = vld [vmem:[#allocation2 + $0x70] sm:$0xff] (!%p2256_p1)  ;;  %v1932_v11 = vmax.f32 (!%p2256_p1), %v1900_v51, %v3250_v0 }
 0x580   : > { %1959 = vst.msk [vmem:[#allocation2 + $0x30] sm:$0xff] (!%p2256_p1), %vm1952_vm2, %v1926_v42  ;;  %1960 = vst.msk [vmem:[#allocation2 + $0x38] sm:$0xff] (!%p2256_p1), %vm1952_vm2, %v1927_v43  ;;  %v1933_v13 = vmax.f32 (!%p2256_p1), %v1901_v52, %v3256_v5  ;;  %v1934_v54 = vmax.f32 (!%p2256_p1), %v1902_v53, %v3246_v19  ;;  %v1903_v23 = vld [vmem:[#allocation2 + $0x78] sm:$0xff] (!%p2256_p1)  ;;  %v1904_v57 = vld [vmem:[#allocation2 + $0x80] sm:$0xff] (!%p2256_p1) }
 0x581   : > { %1961 = vst.msk [vmem:[#allocation2 + $0x40] sm:$0xff] (!%p2256_p1), %vm1952_vm2, %v1928_v44  ;;  %v1905_v62 = vld [vmem:[#allocation2 + $0x88] sm:$0xff] (!%p2256_p1)  ;;  %1962 = vst.msk [vmem:[#allocation2 + $0x48] sm:$0xff] (!%p2256_p1), %vm1952_vm2, %v1929_v48  ;;  %v1935_v3 = vmax.f32 (!%p2256_p1), %v1903_v23, %v3252_v2  ;;  %v1936_v6 = vmax.f32 (!%p2256_p1), %v1904_v57, %v3270_v15  ;;  %v1906_v0 = vld [vmem:[#allocation2 + $0x90] sm:$0xff] (!%p2256_p1) }
 0x582   : > { %1963 = vst.msk [vmem:[#allocation2 + $0x50] sm:$0xff] %vm1952_vm2, %v1930_v49  ;;  %1964 = vst.msk [vmem:[#allocation2 + $0x58] sm:$0xff] %vm1952_vm2, %v1931_v50  ;;  %v1937_v7 = vmax.f32 %v1905_v62, %v3272_v55  ;;  %v1907_v10 = vld [vmem:[#allocation2 + $0x98] sm:$0xff]  ;;  %v1908_v5 = vld [vmem:[#allocation2 + $0xa0] sm:$0xff]  ;;  %v1938_v19 = vmax.f32 %v1906_v0, %v3262_v8 }
 0x583   : > { %1965 = vst.msk [vmem:[#allocation2 + $0x60] sm:$0xff] %vm1952_vm2, %v1932_v11  ;;  %1966 = vst.msk [vmem:[#allocation2 + $0x68] sm:$0xff] %vm1952_vm2, %v1933_v13  ;;  %v1939_v12 = vmax.f32 %v1907_v10, %v3264_v9  ;;  %v1940_v16 = vmax.f32 %v1908_v5, %v3286_v22  ;;  %v1909_v2 = vld [vmem:[#allocation2 + $0xa8] sm:$0xff]  ;;  %v1910_v56 = vld [vmem:[#allocation2 + $0xb0] sm:$0xff] }
 0x584   : > { %1967 = vst.msk [vmem:[#allocation2 + $0x70] sm:$0xff] %vm1952_vm2, %v1934_v54  ;;  %v1911_v15 = vld [vmem:[#allocation2 + $0xb8] sm:$0xff]  ;;  %1968 = vst.msk [vmem:[#allocation2 + $0x78] sm:$0xff] %vm1952_vm2, %v1935_v3  ;;  %v1941_v55 = vmax.f32 %v1909_v2, %v3288_v25  ;;  %v1942_v20 = vmax.f32 %v1910_v56, %v3278_v17  ;;  %v1912_v8 = vld [vmem:[#allocation2 + $0xc0] sm:$0xff] }
 0x585   : > { %1969 = vst.msk [vmem:[#allocation2 + $0x80] sm:$0xff] %vm1952_vm2, %v1936_v6  ;;  %1970 = vst.msk [vmem:[#allocation2 + $0x88] sm:$0xff] %vm1952_vm2, %v1937_v7  ;;  %v1943_v21 = vmax.f32 %v1911_v15, %v3280_v18  ;;  %v1913_v61 = vld [vmem:[#allocation2 + $0xc8] sm:$0xff]  ;;  %v1914_v9 = vld [vmem:[#allocation2 + $0xd0] sm:$0xff]  ;;  %v1944_v22 = vmax.f32 %v1912_v8, %v3294_v24 }
 0x586   : > { %1971 = vst.msk [vmem:[#allocation2 + $0x90] sm:$0xff] %vm1952_vm2, %v1938_v19  ;;  %1972 = vst.msk [vmem:[#allocation2 + $0x98] sm:$0xff] %vm1952_vm2, %v1939_v12  ;;  %v1945_v32 = vmax.f32 %v1913_v61, %v3296_v28  ;;  %v1946_v33 = vmax.f32 %v1914_v9, %v3290_v26  ;;  %v1915_v25 = vld [vmem:[#allocation2 + $0xd8] sm:$0xff]  ;;  %v1916_v34 = vld [vmem:[#allocation2 + $0xe0] sm:$0xff] }
 0x587   : > { %1973 = vst.msk [vmem:[#allocation2 + $0xa0] sm:$0xff] %vm1952_vm2, %v1940_v16  ;;  %v1917_v17 = vld [vmem:[#allocation2 + $0xe8] sm:$0xff]  ;;  %1974 = vst.msk [vmem:[#allocation2 + $0xa8] sm:$0xff] %vm1952_vm2, %v1941_v55  ;;  %v1947_v18 = vmax.f32 %v1915_v25, %v3292_v27  ;;  %v1948_v4 = vmax.f32 %v1916_v34, %v3298_v29  ;;  %v1918_v24 = vld [vmem:[#allocation2 + $0xf0] sm:$0xff] }
 0x588   : > { %1975 = vst.msk [vmem:[#allocation2 + $0xb0] sm:$0xff] %vm1952_vm2, %v1942_v20  ;;  %1976 = vst.msk [vmem:[#allocation2 + $0xb8] sm:$0xff] %vm1952_vm2, %v1943_v21  ;;  %v1949_v35 = vmax.f32 %v1917_v17, %v3300_v58  ;;  %v1919_v63 = vld [vmem:[#allocation2 + $0xf8] sm:$0xff]  ;;  %v1950_v26 = vmax.f32 %v1918_v24, %v3302_v30 }
 0x589   : > { %1977 = vst.msk [vmem:[#allocation2 + $0xc0] sm:$0xff] %vm1952_vm2, %v1944_v22  ;;  %1978 = vst.msk [vmem:[#allocation2 + $0xc8] sm:$0xff] %vm1952_vm2, %v1945_v32  ;;  %v1951_v28 = vmax.f32 %v1919_v63, %v3304_v31 }
 0x58a   : > { %1979 = vst.msk [vmem:[#allocation2 + $0xd0] sm:$0xff] %vm1952_vm2, %v1946_v33  ;;  %1980 = vst.msk [vmem:[#allocation2 + $0xd8] sm:$0xff] %vm1952_vm2, %v1947_v18 }
 0x58b   : > { %1981 = vst.msk [vmem:[#allocation2 + $0xe0] sm:$0xff] %vm1952_vm2, %v1948_v4  ;;  %1982 = vst.msk [vmem:[#allocation2 + $0xe8] sm:$0xff] %vm1952_vm2, %v1949_v35 }
 0x58c   : > { %1983 = vst.msk [vmem:[#allocation2 + $0xf0] sm:$0xff] %vm1952_vm2, %v1950_v26  ;;  %1984 = vst.msk [vmem:[#allocation2 + $0xf8] sm:$0xff] %vm1952_vm2, %v1951_v28 }
 0x58d PF: > { %p2257_p2 = scmp.ne.s32.totalorder %s2641_s20, 1 }
 0x58e   : > { %v2005_v27 = vld [vmem:[#allocation2 + $0x80] sm:$0xff] (!%p2257_p2)  ;;  %v2006_v58 = vld [vmem:[#allocation2 + $0x88] sm:$0xff] (!%p2257_p2)  ;;  %v2007_v31 = vld [vmem:[#allocation2 + $0x90] sm:$0xff] (!%p2257_p2)  ;;  %v2662_v6 = vmov (!%p2257_p2), 1966171168   ;;  %vm2105_vm3 = vcmp.lt.s32.totalorder (!%p2257_p2), %v466_v60, 256 }
 0x58f   : > { %1988 = sbr.rel (%p2257_p2) target bundleno = 1560 (0x618), region = 76  ;;  %v1989_v29 = vld [vmem:[#allocation2] sm:$0xff] (!%p2257_p2)  ;;  %2053 = vxpose.xlu1.b32.start [1/16] (narrow) (!%p2257_p2), %v2005_v27, 8  ;;  %v1990_v30 = vld [vmem:[#allocation2 + $0x8] sm:$0xff] (!%p2257_p2)  ;;  %v2008_v37 = vld [vmem:[#allocation2 + $0x98] sm:$0xff] (!%p2257_p2)  ;;  %v2089_v7 = vunpack.c.l.s4 (!%p2257_p2), %v2662_v6 }
 0x590   : > { %2021 = vxpose.xlu0.b32.start [1/16] (narrow) (!%p2257_p2), %v1989_v29, 8  ;;  %v1991_v36 = vld [vmem:[#allocation2 + $0x10] sm:$0xff] (!%p2257_p2)  ;;  %v1992_v38 = vld [vmem:[#allocation2 + $0x18] sm:$0xff] (!%p2257_p2)  ;;  %v2009_v39 = vld [vmem:[#allocation2 + $0xa0] sm:$0xff] (!%p2257_p2) }
 0x591   : > { %v1993_v40 = vld [vmem:[#allocation2 + $0x20] sm:$0xff] (!%p2257_p2)  ;;  %v2010_v14 = vld [vmem:[#allocation2 + $0xa8] sm:$0xff] (!%p2257_p2)  ;;  %v2011_v59 = vld [vmem:[#allocation2 + $0xb0] sm:$0xff] (!%p2257_p2)  ;;  %v2090_v0 = vunpack.c.0.s8 (!%p2257_p2), %v2089_v7 }
 0x592   : > { %v1994_v41 = vld [vmem:[#allocation2 + $0x28] sm:$0xff] (!%p2257_p2)  ;;  %v1995_v42 = vld [vmem:[#allocation2 + $0x30] sm:$0xff] (!%p2257_p2)  ;;  %v2012_v43 = vld [vmem:[#allocation2 + $0xb8] sm:$0xff] (!%p2257_p2) }
 0x593   : > { %2054 = vxpose.xlu1.b32.cont [2/16] (narrow) (!%p2257_p2), %v2006_v58, 8  ;;  %v1996_v44 = vld [vmem:[#allocation2 + $0x38] sm:$0xff] (!%p2257_p2)  ;;  %v2013_v45 = vld [vmem:[#allocation2 + $0xc0] sm:$0xff] (!%p2257_p2)  ;;  %v2014_v47 = vld [vmem:[#allocation2 + $0xc8] sm:$0xff] (!%p2257_p2)  ;;  %v2093_v10 = vsub.s32 (!%p2257_p2), %v2090_v0, %v2978_v1 }
 0x594   : > { %2022 = vxpose.xlu0.b32.cont [2/16] (narrow) (!%p2257_p2), %v1990_v30, 8  ;;  %v1997_v46 = vld [vmem:[#allocation2 + $0x40] sm:$0xff] (!%p2257_p2)  ;;  %v1998_v48 = vld [vmem:[#allocation2 + $0x48] sm:$0xff] (!%p2257_p2)  ;;  %v2015_v49 = vld [vmem:[#allocation2 + $0xd0] sm:$0xff] (!%p2257_p2) }
 0x595   : > { %v1999_v50 = vld [vmem:[#allocation2 + $0x50] sm:$0xff] (!%p2257_p2)  ;;  %v2016_v51 = vld [vmem:[#allocation2 + $0xd8] sm:$0xff] (!%p2257_p2)  ;;  %v2017_v53 = vld [vmem:[#allocation2 + $0xe0] sm:$0xff] (!%p2257_p2) }
 0x596   : > { %v2000_v52 = vld [vmem:[#allocation2 + $0x58] sm:$0xff]  ;;  %v2001_v11 = vld [vmem:[#allocation2 + $0x60] sm:$0xff]  ;;  %v2018_v13 = vld [vmem:[#allocation2 + $0xe8] sm:$0xff] }
 0x597   : > { %2055 = vxpose.xlu1.b32.cont [3/16] (narrow) %v2007_v31, 8  ;;  %v2002_v54 = vld [vmem:[#allocation2 + $0x68] sm:$0xff]  ;;  %v2019_v23 = vld [vmem:[#allocation2 + $0xf0] sm:$0xff]  ;;  %v2020_v62 = vld [vmem:[#allocation2 + $0xf8] sm:$0xff] }
 0x598   : > { %2023 = vxpose.xlu0.b32.cont [3/16] (narrow) %v1991_v36, 8  ;;  %v2003_v57 = vld [vmem:[#allocation2 + $0x70] sm:$0xff]  ;;  %v2004_v3 = vld [vmem:[#allocation2 + $0x78] sm:$0xff] }
 0x59b   : > { %2056 = vxpose.xlu1.b32.cont [4/16] (narrow) %v2008_v37, 8 }
 0x59c   : > { %2024 = vxpose.xlu0.b32.cont [4/16] (narrow) %v1992_v38, 8 }
 0x59f   : > { %2057 = vxpose.xlu1.b32.cont [5/16] (narrow) %v2009_v39, 8 }
 0x5a0   : > { %2025 = vxpose.xlu0.b32.cont [5/16] (narrow) %v1993_v40, 8 }
 0x5a3   : > { %2058 = vxpose.xlu1.b32.cont [6/16] (narrow) %v2010_v14, 8 }
 0x5a4   : > { %2026 = vxpose.xlu0.b32.cont [6/16] (narrow) %v1994_v41, 8 }
 0x5a7   : > { %2059 = vxpose.xlu1.b32.cont [7/16] (narrow) %v2011_v59, 8 }
 0x5a8   : > { %2027 = vxpose.xlu0.b32.cont [7/16] (narrow) %v1995_v42, 8 }
 0x5ab   : > { %2060 = vxpose.xlu1.b32.cont [8/16] (narrow) %v2012_v43, 8 }
 0x5ac   : > { %2028 = vxpose.xlu0.b32.cont [8/16] (narrow) %v1996_v44, 8 }
 0x5af   : > { %2061 = vxpose.xlu1.b32.cont [9/16] (narrow) %v2013_v45, 8 }
 0x5b0   : > { %2029 = vxpose.xlu0.b32.cont [9/16] (narrow) %v1997_v46, 8 }
 0x5b3   : > { %2062 = vxpose.xlu1.b32.cont [10/16] (narrow) %v2014_v47, 8 }
 0x5b4   : > { %2030 = vxpose.xlu0.b32.cont [10/16] (narrow) %v1998_v48, 8 }
 0x5b7   : > { %2063 = vxpose.xlu1.b32.cont [11/16] (narrow) %v2015_v49, 8 }
 0x5b8   : > { %2031 = vxpose.xlu0.b32.cont [11/16] (narrow) %v1999_v50, 8 }
 0x5bb   : > { %2064 = vxpose.xlu1.b32.cont [12/16] (narrow) %v2016_v51, 8 }
 0x5bc   : > { %2032 = vxpose.xlu0.b32.cont [12/16] (narrow) %v2000_v52, 8 }
 0x5bf   : > { %2065 = vxpose.xlu1.b32.cont [13/16] (narrow) %v2017_v53, 8 }
 0x5c0   : > { %2033 = vxpose.xlu0.b32.cont [13/16] (narrow) %v2001_v11, 8 }
 0x5c3   : > { %2066 = vxpose.xlu1.b32.cont [14/16] (narrow) %v2018_v13, 8 }
 0x5c4   : > { %2034 = vxpose.xlu0.b32.cont [14/16] (narrow) %v2002_v54, 8 }
 0x5c7   : > { %2067 = vxpose.xlu1.b32.cont [15/16] (narrow) %v2019_v23, 8 }
 0x5c8   : > { %2035 = vxpose.xlu0.b32.cont [15/16] (narrow) %v2003_v57, 8 }
 0x5cb   : > { %2068 = vxpose.xlu1.b32.end [16/16] (narrow) %v2020_v62, 8 }
 0x5cc   : > { %2036 = vxpose.xlu0.b32.end [16/16] (narrow) %v2004_v3, 8 }
 0x60f   : > { %v2069_v5 = vpop.trf.xlu1 }
 0x610   : > { %v2037_v19 = vpop.trf.xlu0 }
 0x611   : > { %v2087_v12 = vcombine.low %v2037_v19, %v2069_v5 }
 0x613   : > { %v2094_v16 = vrot.slane %v2087_v12, %v2093_v10 }
 0x615   : > { %v2101_v2 = vrot.slane %v2094_v16, %v2093_v10 }
 0x617   : > { %2107 = vst.msk [vmem:[%s399_s23] sm:$0x3] %vm2105_vm3, %v2101_v2 }
 0x618 PF: > { %s2263_s20 = sshll.u32 %s2645_s21, 5  ;;  %s2123_s26 = sshll.u32 %s399_s23, 4  ;;  %s2124_s26 = int_to_ptr.vmem [resolvable:$true] %s2123_s26 }
 0x619   : > { %s3446_s15 = scalar_lea.hbm %s3508_s11, %s2263_s20  ;;  %s3523_s27 = sand.u32 1, %s2633_s18  }
 0x61a   : > { %s2109_s2 = scalar_lea.sflag [#allocation4], %s3523_s27  ;;  %s2563_s16 = scalar_lea.vmem %s2124_s26, 32 }
 0x61b   : > { %p2564_p4 = scmp.ne.s32.totalorder %s2124_s26, %s2563_s16  ;;  %s2663_s25 = smov [#allocation3]  }
 0x61c   : > { %s2567_s13 = sshll.u32 %s2663_s25, 4  ;;  %s2568_s13 = int_to_ptr.vmem [resolvable:$false] %s2567_s13 }
 0x61d   : > { %p2565_p5 = pnand %p2564_p4, %p2773_p3  ;;  %s2569_s0 = scalar_lea.vmem %s2568_s13, 64 }
 0x61e   : > { %p2570_p7 = scmp.lt.s32.totalorder %s2124_s26, %s2568_s13  ;;  %p2571_p8 = scmp.lt.s32.totalorder %s2569_s0, %s2563_s16 }
 0x61f   : > { %p2566_p6 = pneg %p2565_p5 }
 0x620   : > { %p2572_p10 = por %p2571_p8, %p2570_p7 }
 0x622   : > { %p2573_p11 = pnand %p2572_p10, %p2566_p6 }
 0x624   : > { %2576 = shalt.err (!%p2573_p11)
}
 0x625   : > { %s2577_s21 = scalar_lea.hbm %s3446_s15, 32  ;;  %s2581_s20 = scalar_lea.hbm %s3508_s11, 64 }
 0x626   : > { %p2578_p12 = scmp.ne.s32.totalorder %s3446_s15, %s2577_s21  ;;  %p2582_p1 = scmp.lt.u32.totalorder %s3446_s15, %s3508_s11 }
 0x627   : > { %p2583_p2 = scmp.lt.u32.totalorder %s2581_s20, %s2577_s21  ;;  %p2585_p5 = scmp.lt.u32.totalorder %s2577_s21, %s3446_s15 }
 0x628   : > { %p2579_p13 = pnand %p2578_p12, %p2773_p3 }
 0x629   : > { %p2584_p4 = por %p2583_p2, %p2582_p1 }
 0x62a   : > { %p2580_p0 = pneg %p2579_p13 }
 0x62b   : > { %p2586_p6 = por %p2585_p5, %p2584_p4 }
 0x62d   : > { %p2587_p7 = pnand %p2586_p6, %p2580_p0 }
 0x62f   : > { %2590 = shalt.err (!%p2587_p7)
}
 0x630   : > { %2436 = dma.vmem_to_hbm [thread:$0]  (%p2773_p3), %s2124_s26, 32, %s3446_s15, %s2109_s2  }
 0x631 PF: > { %p2442_p8 = scmp.ge.s32.totalorder %s2657_s24, 2  ;;  %s2135_s0 = sand.u32 1, %s2629_s17  }
 0x632   : > { %s2136_s27 = scalar_lea.sflag [#allocation4], %s2135_s0 }
 0x633   : > { %p2439_p10 = pnand %p2442_p8, %p2783_p9 }
 0x635   : > { %2624 = dma.done.wait (!%p2439_p10), %s2136_s27, 32  }
 0x636   : > { %2626 = vsyncadd (!%p2439_p10), %s2136_s27, 4294967264  ;;  %s24_s24 = sadd.s32 1, %s2657_s24   ;;  %s3524_s21 = sld [smem:[#allocation6_spill]] }
 0x637   : > { %p21_p11 = scmp.ge.s32.totalorder %s24_s24, 6   ;;  %s3525_s29 = sld [smem:[#allocation7_spill]] }
 0x638   : > { %s3526_s23 = sld [smem:[#allocation8_spill]]  ;;  %s3527_s17 = smov %s2633_s18 }
 0x639   : > { %s3528_s18 = smov %s2637_s19  ;;  %s3529_s19 = smov %s2791_s14 }
 0x63a   : > { %s3530_s20 = smov %s2649_s22  ;;  %23 = sbr.rel (!%p21_p11) target bundleno = 9 (0x9), region = 111 }
 0x63d   : > { %s3531_s22 = smov %s3525_s29 }
 0x641   :  { %2141 = vsyncpa [#allocation4], 1 }
 0x642   :  { %2143 = vsyncpa [#allocation4 + $0x1], 1 }

</bundles_post_ra>
